<compile_context>
chip_gen: v7x
topology: tpu7x:2x2x1
jax: 0.10.0
libtpu: 0.0.40
codegen_flags: <defaults>
</compile_context>

<pallas_src>
import jax
import jax.numpy as jnp
from jax import lax
from jax.experimental import pallas as pl
from jax.experimental.pallas import tpu as pltpu


def _sigmoid(x):
    # exp on the EUP + approx reciprocal (EUP slot) + one cheap VPU Newton step
    # -> near-f32-exact sigmoid without a full-precision divide.
    d = 1.0 + jnp.exp(-x)
    r = pl.reciprocal(d, approx=True)
    return r * (2.0 - d * r)


def _make_lstm_kernel(layers, hidden, t_chunk):
    H = hidden
    n_w = 1 + 2 * (layers - 1)

    def kernel(xp_ref, reset_ref, *args):
        w_refs = args[:n_w]
        out_ref = args[n_w]
        h_ref = args[n_w + 1]          # VMEM scratch (layers, tile_b, H) f32
        c_ref = args[n_w + 2]          # VMEM scratch (layers, tile_b, H) f32

        @pl.when(pl.program_id(1) == 0)
        def _():
            h_ref[...] = jnp.zeros_like(h_ref)
            c_ref[...] = jnp.zeros_like(c_ref)

        # Hoist resident weight loads out of the time loop.
        w_hh0 = w_refs[0][...]                                   # (H, 4H)
        w_cat = [w_refs[1 + 2 * (l - 1)][...] for l in range(1, layers)]  # (2H, 4H)
        b_cat = [w_refs[2 + 2 * (l - 1)][...] for l in range(1, layers)]  # (1, 4H) f32
        mxu_dtype = w_hh0.dtype

        def step(tt, carry):
            keep = 1.0 - reset_ref[tt]                           # (tile_b, 1) f32
            outs = []
            recent = None
            for l in range(layers):
                h_prev = h_ref[l]                                # (tile_b, H) f32
                c_prev = c_ref[l]
                if l == 0:
                    # Input projection + bias were precomputed outside the kernel.
                    gates = xp_ref[tt] + jnp.dot(
                        h_prev.astype(mxu_dtype), w_hh0,
                        preferred_element_type=jnp.float32)
                else:
                    # Fused [W_ih; W_hh] matmul, K = 2H.
                    inp = jnp.concatenate([recent, h_prev], axis=-1)
                    gates = jnp.dot(inp.astype(mxu_dtype), w_cat[l - 1],
                                    preferred_element_type=jnp.float32) + b_cat[l - 1]

                # Gate columns are permuted to [i | f | o | g] by the wrapper.
                sg = _sigmoid(gates[:, :3 * H])
                i_g = sg[:, 0:H]
                f_g = sg[:, H:2 * H]
                o_g = sg[:, 2 * H:3 * H]
                g_g = jnp.tanh(gates[:, 3 * H:4 * H])

                c_new = f_g * c_prev + i_g * g_g
                h_new = o_g * jnp.tanh(c_new)

                outs.append(h_new)
                # Reset applies AFTER this timestep's output; the next layer still
                # consumes the pre-reset h_new ("recent").
                h_ref[l] = h_new * keep
                c_ref[l] = c_new * keep
                recent = h_new

            # Single lane-dense (layers*H wide) store per timestep.
            out_ref[tt] = jnp.concatenate(outs, axis=-1).astype(out_ref.dtype)
            return carry

        lax.fori_loop(0, t_chunk, step, 0, unroll=True)

    return kernel


def multilayer_lstm_forward(x, weights, reset=None, *, tile_b=8, t_chunk=8,
                            mxu_dtype=jnp.bfloat16):
    """Forward pass of pylego MultilayerLSTM (default cell wiring).

    x: (B, S, input_size). weights: per layer (w_ih (4H, in_l), w_hh (4H, H),
    b_ih (4H,), b_hh (4H,)) in PyTorch nn.LSTMCell layout / [i, f, g, o] order.
    Returns (B, S, layers, H) float32.
    """
    B, S, In = x.shape
    layers = len(weights)
    H = weights[0][1].shape[1]
    G = 4 * H

    if reset is None:
        reset = jnp.zeros((B, S), jnp.float32)

    t_chunk = max(1, min(t_chunk, S))
    pad_b = (-B) % tile_b
    pad_s = (-S) % t_chunk
    Bp, Sp = B + pad_b, S + pad_s
    if pad_b or pad_s:
        x = jnp.pad(x, ((0, pad_b), (0, pad_s), (0, 0)))
        reset = jnp.pad(reset, ((0, pad_b), (0, pad_s)))

    # Time-major layouts: grid-varying time dim leading, (sublane, lane) last.
    x_tm = jnp.transpose(x, (1, 0, 2)).astype(jnp.float32)                   # (Sp, Bp, In)
    reset_tm = jnp.transpose(reset, (1, 0)).astype(jnp.float32)[..., None]   # (Sp, Bp, 1)

    # Permute gate rows from PyTorch [i, f, g, o] to [i, f, o, g].
    perm = jnp.concatenate([jnp.arange(0, H), jnp.arange(H, 2 * H),
                            jnp.arange(3 * H, 4 * H), jnp.arange(2 * H, 3 * H)])

    # Layer 0: hoist input projection (+ bias) off the serial critical path.
    w_ih0, w_hh0, b_ih0, b_hh0 = weights[0]
    w_ih0_t = w_ih0[perm].T.astype(jnp.float32)                  # (In, 4H)
    b0 = (b_ih0 + b_hh0)[perm].astype(jnp.float32)               # (4H,)
    x_proj = jnp.einsum('sbi,ig->sbg', x_tm, w_ih0_t,
                        precision='highest') + b0                # (Sp, Bp, 4H) f32

    flat_w = [w_hh0[perm].T.astype(mxu_dtype)]                   # (H, 4H)
    for l in range(1, layers):
        w_ih, w_hh, b_ih, b_hh = weights[l]
        w_cat = jnp.concatenate([w_ih[perm], w_hh[perm]], axis=1).T.astype(mxu_dtype)
        b_l = (b_ih + b_hh)[perm].astype(jnp.float32).reshape(1, G)
        flat_w += [w_cat, b_l]

    grid = (Bp // tile_b, Sp // t_chunk)

    in_specs = [
        pl.BlockSpec((t_chunk, tile_b, G), lambda i, t: (t, i, 0)),   # layer-0 preacts
        pl.BlockSpec((t_chunk, tile_b, 1), lambda i, t: (t, i, 0)),   # reset chunk
        pl.BlockSpec((H, G), lambda i, t: (0, 0)),                    # W_hh0 (resident)
    ]
    for _ in range(1, layers):
        in_specs += [
            pl.BlockSpec((2 * H, G), lambda i, t: (0, 0)),            # [W_ih;W_hh] (resident)
            pl.BlockSpec((1, G), lambda i, t: (0, 0)),                # bias (resident)
        ]
    out_spec = pl.BlockSpec((t_chunk, tile_b, layers * H), lambda i, t: (t, i, 0))

    flops = int(2 * Bp * Sp * (H * G + (layers - 1) * 2 * H * G))
    transcendentals = int(Bp * Sp * layers * 6 * H)
    bytes_accessed = int(4 * (x_proj.size + reset_tm.size + Sp * Bp * layers * H)
                         + sum(int(a.size) * a.dtype.itemsize for a in flat_w))

    out_tm = pl.pallas_call(
        _make_lstm_kernel(layers, H, t_chunk),
        out_shape=jax.ShapeDtypeStruct((Sp, Bp, layers * H), jnp.float32),
        grid_spec=pltpu.PrefetchScalarGridSpec(
            num_scalar_prefetch=0,
            grid=grid,
            in_specs=in_specs,
            out_specs=out_spec,
            scratch_shapes=[pltpu.VMEM((layers, tile_b, H), jnp.float32),   # h state
                            pltpu.VMEM((layers, tile_b, H), jnp.float32)],  # c state
        ),
        compiler_params=pltpu.CompilerParams(
            dimension_semantics=("parallel", "arbitrary")),
        cost_estimate=pl.CostEstimate(flops=flops,
                                      transcendentals=transcendentals,
                                      bytes_accessed=bytes_accessed),
    )(x_proj, reset_tm, *flat_w)

    out = jnp.transpose(out_tm, (1, 0, 2))[:B, :S]               # (B, S, layers*H)
    return out.reshape(B, S, layers, H)


def _ref_sigmoid(x):
    return 1.0 / (1.0 + jnp.exp(-x))


def reference_forward(x, weights, reset):
    """Pure-JAX reference with identical PyTorch MultilayerLSTM semantics."""
    B, S, _ = x.shape
    layers = len(weights)
    H = weights[0][1].shape[1]
    h = [jnp.zeros((B, H), jnp.float32) for _ in range(layers)]
    c = [jnp.zeros((B, H), jnp.float32) for _ in range(layers)]
    outs = []
    for t in range(S):
        recent = x[:, t].astype(jnp.float32)
        step = []
        for l, (w_ih, w_hh, b_ih, b_hh) in enumerate(weights):
            gates = (jnp.dot(recent, w_ih.T, precision='highest')
                     + jnp.dot(h[l], w_hh.T, precision='highest') + b_ih + b_hh)
            i_g = _ref_sigmoid(gates[:, :H])
            f_g = _ref_sigmoid(gates[:, H:2 * H])
            g_g = jnp.tanh(gates[:, 2 * H:3 * H])
            o_g = _ref_sigmoid(gates[:, 3 * H:])
            c[l] = f_g * c[l] + i_g * g_g
            h[l] = o_g * jnp.tanh(c[l])
            step.append(h[l])
            recent = h[l]
        outs.append(jnp.stack(step, axis=1))                     # (B, layers, H)
        keep = (1.0 - reset[:, t])[:, None]
        h = [hh * keep for hh in h]
        c = [cc * keep for cc in c]
    return jnp.stack(outs, axis=1)                               # (B, S, layers, H)


if __name__ == "__main__":
    key = jax.random.PRNGKey(0)
    keys = jax.random.split(key, 10)

    batch, seq = 16, 8                         # 2 batch blocks of tile_b=8 (v7x: both TCs)
    input_size, hidden, layers = 32, 64, 2     # layers*hidden = 128 -> lane-dense output

    x = jax.random.normal(keys[0], (batch, seq, input_size), jnp.float32)
    # reset in {0, 1}: state zeroed AFTER that timestep's output.
    reset = (jax.random.uniform(keys[1], (batch, seq)) > 0.7).astype(jnp.float32)

    # Per-layer nn.LSTMCell parameters in PyTorch layout.
    weights = []
    kidx = 2
    in_sizes = [input_size] + [hidden] * (layers - 1)
    for l in range(layers):
        std = 1.0 / (hidden ** 0.5)
        w_ih = std * jax.random.normal(keys[kidx], (4 * hidden, in_sizes[l]), jnp.float32)
        w_hh = std * jax.random.normal(keys[kidx + 1], (4 * hidden, hidden), jnp.float32)
        b_ih = std * jax.random.normal(keys[kidx + 2], (4 * hidden,), jnp.float32)
        b_hh = std * jax.random.normal(keys[kidx + 3], (4 * hidden,), jnp.float32)
        kidx += 4
        weights.append((w_ih, w_hh, b_ih, b_hh))

    ref = reference_forward(x, weights, reset)

    # Tight parity check with f32 MXU inputs.
    out_f32 = jax.block_until_ready(
        multilayer_lstm_forward(x, weights, reset, tile_b=8, t_chunk=8,
                                mxu_dtype=jnp.float32))
    assert out_f32.shape == (batch, seq, layers, hidden)
    err_f32 = float(jnp.max(jnp.abs(out_f32 - ref)))
    assert err_f32 < 5e-3, err_f32

    # Performance default: bf16 MXU inputs (f32 accumulation / state); looser
    # tolerance accounts for bf16 rounding across the recurrence.
    out_bf16 = jax.block_until_ready(
        multilayer_lstm_forward(x, weights, reset, tile_b=8, t_chunk=8,
                                mxu_dtype=jnp.bfloat16))
    err_bf16 = float(jnp.max(jnp.abs(out_bf16 - ref)))
    assert err_bf16 < 3e-2, err_bf16

    print("KERNEL_OK")
</pallas_src>

<mosaic_0001>
module attributes {stable_mosaic.version = 11 : i64} {
  func.func @kernel(%arg0: i32, %arg1: i32, %arg2: memref<8x8x256xf32, #tpu.memory_space<vmem>>, %arg3: memref<8x8x1xf32, #tpu.memory_space<vmem>>, %arg4: memref<64x256xf32, #tpu.memory_space<vmem>>, %arg5: memref<128x256xf32, #tpu.memory_space<vmem>>, %arg6: memref<1x256xf32, #tpu.memory_space<vmem>>, %arg7: memref<8x8x128xf32, #tpu.memory_space<vmem>>, %arg8: memref<2x8x64xf32, #tpu.memory_space<vmem>>, %arg9: memref<2x8x64xf32, #tpu.memory_space<vmem>>) attributes {dimension_semantics = [#tpu.dimension_semantics<parallel>, #tpu.dimension_semantics<arbitrary>], iteration_bounds = array<i64: 2, 1>, scalar_prefetch = 0 : i64, scratch_operands = 2 : i64, tpu.core_type = #tpu.core_type<tc>, window_params = [{transform_indices = @transform_0, window_bounds = array<i64: 8, 8, 256>}, {transform_indices = @transform_1, window_bounds = array<i64: 8, 8, 1>}, {pipeline_mode = #tpu.pipeline_mode<synchronous>, transform_indices = @transform_2, window_bounds = array<i64: 64, 256>}, {pipeline_mode = #tpu.pipeline_mode<synchronous>, transform_indices = @transform_3, window_bounds = array<i64: 128, 256>}, {pipeline_mode = #tpu.pipeline_mode<synchronous>, transform_indices = @transform_4, window_bounds = array<i64: 1, 256>}, {transform_indices = @transform_5, window_bounds = array<i64: 8, 8, 128>}]} {
    %c0_i32 = arith.constant 0 : i32
    %0 = arith.cmpi eq, %arg1, %c0_i32 : i32
    %1 = arith.extui %0 : i1 to i32
    %c0_i32_0 = arith.constant 0 : i32
    %2 = arith.cmpi ne, %1, %c0_i32_0 : i32
    scf.if %2 {
      %cst_317 = arith.constant 0.000000e+00 : f32
      %718 = vector.broadcast %cst_317 : f32 to vector<2x8x64xf32>
      %c0_318 = arith.constant 0 : index
      %c0_319 = arith.constant 0 : index
      %c0_320 = arith.constant 0 : index
      %719 = vector.load %arg8[%c0_318, %c0_319, %c0_320] : memref<2x8x64xf32, #tpu.memory_space<vmem>>, vector<2x8x64xf32>
      tpu.vector_store %arg8[%c0_318, %c0_319, %c0_320], %718 {strides = array<i32>} : memref<2x8x64xf32, #tpu.memory_space<vmem>>, vector<2x8x64xf32>,
      %cst_321 = arith.constant 0.000000e+00 : f32
      %720 = vector.broadcast %cst_321 : f32 to vector<2x8x64xf32>
      %c0_322 = arith.constant 0 : index
      %c0_323 = arith.constant 0 : index
      %c0_324 = arith.constant 0 : index
      %721 = vector.load %arg9[%c0_322, %c0_323, %c0_324] : memref<2x8x64xf32, #tpu.memory_space<vmem>>, vector<2x8x64xf32>
      tpu.vector_store %arg9[%c0_322, %c0_323, %c0_324], %720 {strides = array<i32>} : memref<2x8x64xf32, #tpu.memory_space<vmem>>, vector<2x8x64xf32>,
    } else {
    }
    %c0 = arith.constant 0 : index
    %c0_1 = arith.constant 0 : index
    %3 = vector.load %arg4[%c0, %c0_1] : memref<64x256xf32, #tpu.memory_space<vmem>>, vector<64x256xf32>
    %c0_2 = arith.constant 0 : index
    %c0_3 = arith.constant 0 : index
    %4 = vector.load %arg5[%c0_2, %c0_3] : memref<128x256xf32, #tpu.memory_space<vmem>>, vector<128x256xf32>
    %c0_4 = arith.constant 0 : index
    %c0_5 = arith.constant 0 : index
    %5 = vector.load %arg6[%c0_4, %c0_5] : memref<1x256xf32, #tpu.memory_space<vmem>>, vector<1x256xf32>
    %c0_i32_6 = arith.constant 0 : i32
    %6 = arith.index_cast %c0_i32_6 : i32 to index
    %c0_7 = arith.constant 0 : index
    %c0_8 = arith.constant 0 : index
    %7 = vector.load %arg3[%6, %c0_7, %c0_8] : memref<8x8x1xf32, #tpu.memory_space<vmem>>, vector<1x8x1xf32>
    %8 = vector.shape_cast %7 : vector<1x8x1xf32> to vector<8x1xf32>
    %cst = arith.constant 1.000000e+00 : f32
    %9 = vector.broadcast %cst : f32 to vector<8x1xf32>
    %10 = arith.subf %9, %8 : vector<8x1xf32>
    %c0_9 = arith.constant 0 : index
    %c0_10 = arith.constant 0 : index
    %c0_11 = arith.constant 0 : index
    %11 = vector.load %arg8[%c0_9, %c0_10, %c0_11] : memref<2x8x64xf32, #tpu.memory_space<vmem>>, vector<1x8x64xf32>
    %12 = vector.shape_cast %11 : vector<1x8x64xf32> to vector<8x64xf32>
    %c0_12 = arith.constant 0 : index
    %c0_13 = arith.constant 0 : index
    %c0_14 = arith.constant 0 : index
    %13 = vector.load %arg9[%c0_12, %c0_13, %c0_14] : memref<2x8x64xf32, #tpu.memory_space<vmem>>, vector<1x8x64xf32>
    %14 = vector.shape_cast %13 : vector<1x8x64xf32> to vector<8x64xf32>
    %15 = arith.index_cast %c0_i32_6 : i32 to index
    %c0_15 = arith.constant 0 : index
    %c0_16 = arith.constant 0 : index
    %16 = vector.load %arg2[%15, %c0_15, %c0_16] : memref<8x8x256xf32, #tpu.memory_space<vmem>>, vector<1x8x256xf32>
    %17 = vector.shape_cast %16 : vector<1x8x256xf32> to vector<8x256xf32>
    %cst_17 = arith.constant dense<0.000000e+00> : vector<8x256xf32>
    %18 = tpu.matmul %12, %3, %cst_17 {dimension_numbers = #tpu.dot_dimension_numbers<[1], [0], [0], [1], [0, 0, 1, 1], [], []>} : vector<8x64xf32>, vector<64x256xf32>, vector<8x256xf32> -> vector<8x256xf32>
    %19 = arith.addf %17, %18 : vector<8x256xf32>
    %20 = vector.extract_strided_slice %19 {offsets = [0, 0], sizes = [8, 192], strides = [1, 1]} : vector<8x256xf32> to vector<8x192xf32>
    %cst_18 = arith.constant 0.000000e+00 : f32
    %21 = vector.broadcast %cst_18 : f32 to vector<8x192xf32>
    %22 = arith.subf %21, %20 : vector<8x192xf32>
    %23 = math.exp %22 : vector<8x192xf32>
    %cst_19 = arith.constant 1.000000e+00 : f32
    %24 = vector.broadcast %cst_19 : f32 to vector<8x192xf32>
    %25 = arith.addf %24, %23 : vector<8x192xf32>
    %26 = tpu.reciprocal %25 {approx = true} : vector<8x192xf32> -> vector<8x192xf32>
    %27 = arith.mulf %25, %26 : vector<8x192xf32>
    %cst_20 = arith.constant 2.000000e+00 : f32
    %28 = vector.broadcast %cst_20 : f32 to vector<8x192xf32>
    %29 = arith.subf %28, %27 : vector<8x192xf32>
    %30 = arith.mulf %26, %29 : vector<8x192xf32>
    %31 = vector.extract_strided_slice %30 {offsets = [0, 0], sizes = [8, 64], strides = [1, 1]} : vector<8x192xf32> to vector<8x64xf32>
    %32 = vector.extract_strided_slice %30 {offsets = [0, 64], sizes = [8, 64], strides = [1, 1]} : vector<8x192xf32> to vector<8x64xf32>
    %33 = vector.extract_strided_slice %30 {offsets = [0, 128], sizes = [8, 64], strides = [1, 1]} : vector<8x192xf32> to vector<8x64xf32>
    %34 = vector.extract_strided_slice %19 {offsets = [0, 192], sizes = [8, 64], strides = [1, 1]} : vector<8x256xf32> to vector<8x64xf32>
    %35 = math.tanh %34 : vector<8x64xf32>
    %36 = arith.mulf %32, %14 : vector<8x64xf32>
    %37 = arith.mulf %31, %35 : vector<8x64xf32>
    %38 = arith.addf %36, %37 : vector<8x64xf32>
    %39 = math.tanh %38 : vector<8x64xf32>
    %40 = arith.mulf %33, %39 : vector<8x64xf32>
    %41 = vector.broadcast %10 : vector<8x1xf32> to vector<8x64xf32>
    %42 = arith.mulf %40, %41 : vector<8x64xf32>
    %c0_21 = arith.constant 0 : index
    %c0_22 = arith.constant 0 : index
    %c0_23 = arith.constant 0 : index
    %43 = vector.load %arg8[%c0_21, %c0_22, %c0_23] : memref<2x8x64xf32, #tpu.memory_space<vmem>>, vector<1x8x64xf32>
    %44 = vector.shape_cast %43 : vector<1x8x64xf32> to vector<8x64xf32>
    %45 = vector.shape_cast %42 : vector<8x64xf32> to vector<1x8x64xf32>
    tpu.vector_store %arg8[%c0_21, %c0_22, %c0_23], %45 {strides = array<i32>} : memref<2x8x64xf32, #tpu.memory_space<vmem>>, vector<1x8x64xf32>,
    %46 = vector.broadcast %10 : vector<8x1xf32> to vector<8x64xf32>
    %47 = arith.mulf %38, %46 : vector<8x64xf32>
    %c0_24 = arith.constant 0 : index
    %c0_25 = arith.constant 0 : index
    %c0_26 = arith.constant 0 : index
    %48 = vector.load %arg9[%c0_24, %c0_25, %c0_26] : memref<2x8x64xf32, #tpu.memory_space<vmem>>, vector<1x8x64xf32>
    %49 = vector.shape_cast %48 : vector<1x8x64xf32> to vector<8x64xf32>
    %50 = vector.shape_cast %47 : vector<8x64xf32> to vector<1x8x64xf32>
    tpu.vector_store %arg9[%c0_24, %c0_25, %c0_26], %50 {strides = array<i32>} : memref<2x8x64xf32, #tpu.memory_space<vmem>>, vector<1x8x64xf32>,
    %c1 = arith.constant 1 : index
    %c0_27 = arith.constant 0 : index
    %c0_28 = arith.constant 0 : index
    %51 = vector.load %arg8[%c1, %c0_27, %c0_28] : memref<2x8x64xf32, #tpu.memory_space<vmem>>, vector<1x8x64xf32>
    %52 = vector.shape_cast %51 : vector<1x8x64xf32> to vector<8x64xf32>
    %c1_29 = arith.constant 1 : index
    %c0_30 = arith.constant 0 : index
    %c0_31 = arith.constant 0 : index
    %53 = vector.load %arg9[%c1_29, %c0_30, %c0_31] : memref<2x8x64xf32, #tpu.memory_space<vmem>>, vector<1x8x64xf32>
    %54 = vector.shape_cast %53 : vector<1x8x64xf32> to vector<8x64xf32>
    %55 = tpu.concatenate %40, %52 in 1 : vector<8x64xf32>, vector<8x64xf32> -> vector<8x128xf32>
    %cst_32 = arith.constant dense<0.000000e+00> : vector<8x256xf32>
    %56 = tpu.matmul %55, %4, %cst_32 {dimension_numbers = #tpu.dot_dimension_numbers<[1], [0], [0], [1], [0, 0, 1, 1], [], []>} : vector<8x128xf32>, vector<128x256xf32>, vector<8x256xf32> -> vector<8x256xf32>
    %57 = vector.broadcast %5 : vector<1x256xf32> to vector<8x256xf32>
    %58 = arith.addf %56, %57 : vector<8x256xf32>
    %59 = vector.extract_strided_slice %58 {offsets = [0, 0], sizes = [8, 192], strides = [1, 1]} : vector<8x256xf32> to vector<8x192xf32>
    %cst_33 = arith.constant 0.000000e+00 : f32
    %60 = vector.broadcast %cst_33 : f32 to vector<8x192xf32>
    %61 = arith.subf %60, %59 : vector<8x192xf32>
    %62 = math.exp %61 : vector<8x192xf32>
    %cst_34 = arith.constant 1.000000e+00 : f32
    %63 = vector.broadcast %cst_34 : f32 to vector<8x192xf32>
    %64 = arith.addf %63, %62 : vector<8x192xf32>
    %65 = tpu.reciprocal %64 {approx = true} : vector<8x192xf32> -> vector<8x192xf32>
    %66 = arith.mulf %64, %65 : vector<8x192xf32>
    %cst_35 = arith.constant 2.000000e+00 : f32
    %67 = vector.broadcast %cst_35 : f32 to vector<8x192xf32>
    %68 = arith.subf %67, %66 : vector<8x192xf32>
    %69 = arith.mulf %65, %68 : vector<8x192xf32>
    %70 = vector.extract_strided_slice %69 {offsets = [0, 0], sizes = [8, 64], strides = [1, 1]} : vector<8x192xf32> to vector<8x64xf32>
    %71 = vector.extract_strided_slice %69 {offsets = [0, 64], sizes = [8, 64], strides = [1, 1]} : vector<8x192xf32> to vector<8x64xf32>
    %72 = vector.extract_strided_slice %69 {offsets = [0, 128], sizes = [8, 64], strides = [1, 1]} : vector<8x192xf32> to vector<8x64xf32>
    %73 = vector.extract_strided_slice %58 {offsets = [0, 192], sizes = [8, 64], strides = [1, 1]} : vector<8x256xf32> to vector<8x64xf32>
    %74 = math.tanh %73 : vector<8x64xf32>
    %75 = arith.mulf %71, %54 : vector<8x64xf32>
    %76 = arith.mulf %70, %74 : vector<8x64xf32>
    %77 = arith.addf %75, %76 : vector<8x64xf32>
    %78 = math.tanh %77 : vector<8x64xf32>
    %79 = arith.mulf %72, %78 : vector<8x64xf32>
    %80 = vector.broadcast %10 : vector<8x1xf32> to vector<8x64xf32>
    %81 = arith.mulf %79, %80 : vector<8x64xf32>
    %c1_36 = arith.constant 1 : index
    %c0_37 = arith.constant 0 : index
    %c0_38 = arith.constant 0 : index
    %82 = vector.load %arg8[%c1_36, %c0_37, %c0_38] : memref<2x8x64xf32, #tpu.memory_space<vmem>>, vector<1x8x64xf32>
    %83 = vector.shape_cast %82 : vector<1x8x64xf32> to vector<8x64xf32>
    %84 = vector.shape_cast %81 : vector<8x64xf32> to vector<1x8x64xf32>
    tpu.vector_store %arg8[%c1_36, %c0_37, %c0_38], %84 {strides = array<i32>} : memref<2x8x64xf32, #tpu.memory_space<vmem>>, vector<1x8x64xf32>,
    %85 = vector.broadcast %10 : vector<8x1xf32> to vector<8x64xf32>
    %86 = arith.mulf %77, %85 : vector<8x64xf32>
    %c1_39 = arith.constant 1 : index
    %c0_40 = arith.constant 0 : index
    %c0_41 = arith.constant 0 : index
    %87 = vector.load %arg9[%c1_39, %c0_40, %c0_41] : memref<2x8x64xf32, #tpu.memory_space<vmem>>, vector<1x8x64xf32>
    %88 = vector.shape_cast %87 : vector<1x8x64xf32> to vector<8x64xf32>
    %89 = vector.shape_cast %86 : vector<8x64xf32> to vector<1x8x64xf32>
    tpu.vector_store %arg9[%c1_39, %c0_40, %c0_41], %89 {strides = array<i32>} : memref<2x8x64xf32, #tpu.memory_space<vmem>>, vector<1x8x64xf32>,
    %90 = tpu.concatenate %40, %79 in 1 : vector<8x64xf32>, vector<8x64xf32> -> vector<8x128xf32>
    %91 = arith.index_cast %c0_i32_6 : i32 to index
    %c0_42 = arith.constant 0 : index
    %c0_43 = arith.constant 0 : index
    %92 = vector.load %arg7[%91, %c0_42, %c0_43] : memref<8x8x128xf32, #tpu.memory_space<vmem>>, vector<1x8x128xf32>
    %93 = vector.shape_cast %92 : vector<1x8x128xf32> to vector<8x128xf32>
    %94 = vector.shape_cast %90 : vector<8x128xf32> to vector<1x8x128xf32>
    tpu.vector_store %arg7[%91, %c0_42, %c0_43], %94 {strides = array<i32>} : memref<8x8x128xf32, #tpu.memory_space<vmem>>, vector<1x8x128xf32>,
    %c1_i32 = arith.constant 1 : i32
    %95 = arith.index_cast %c1_i32 : i32 to index
    %c0_44 = arith.constant 0 : index
    %c0_45 = arith.constant 0 : index
    %96 = vector.load %arg3[%95, %c0_44, %c0_45] : memref<8x8x1xf32, #tpu.memory_space<vmem>>, vector<1x8x1xf32>
    %97 = vector.shape_cast %96 : vector<1x8x1xf32> to vector<8x1xf32>
    %cst_46 = arith.constant 1.000000e+00 : f32
    %98 = vector.broadcast %cst_46 : f32 to vector<8x1xf32>
    %99 = arith.subf %98, %97 : vector<8x1xf32>
    %c0_47 = arith.constant 0 : index
    %c0_48 = arith.constant 0 : index
    %c0_49 = arith.constant 0 : index
    %100 = vector.load %arg8[%c0_47, %c0_48, %c0_49] : memref<2x8x64xf32, #tpu.memory_space<vmem>>, vector<1x8x64xf32>
    %101 = vector.shape_cast %100 : vector<1x8x64xf32> to vector<8x64xf32>
    %c0_50 = arith.constant 0 : index
    %c0_51 = arith.constant 0 : index
    %c0_52 = arith.constant 0 : index
    %102 = vector.load %arg9[%c0_50, %c0_51, %c0_52] : memref<2x8x64xf32, #tpu.memory_space<vmem>>, vector<1x8x64xf32>
    %103 = vector.shape_cast %102 : vector<1x8x64xf32> to vector<8x64xf32>
    %104 = arith.index_cast %c1_i32 : i32 to index
    %c0_53 = arith.constant 0 : index
    %c0_54 = arith.constant 0 : index
    %105 = vector.load %arg2[%104, %c0_53, %c0_54] : memref<8x8x256xf32, #tpu.memory_space<vmem>>, vector<1x8x256xf32>
    %106 = vector.shape_cast %105 : vector<1x8x256xf32> to vector<8x256xf32>
    %cst_55 = arith.constant dense<0.000000e+00> : vector<8x256xf32>
    %107 = tpu.matmul %101, %3, %cst_55 {dimension_numbers = #tpu.dot_dimension_numbers<[1], [0], [0], [1], [0, 0, 1, 1], [], []>} : vector<8x64xf32>, vector<64x256xf32>, vector<8x256xf32> -> vector<8x256xf32>
    %108 = arith.addf %106, %107 : vector<8x256xf32>
    %109 = vector.extract_strided_slice %108 {offsets = [0, 0], sizes = [8, 192], strides = [1, 1]} : vector<8x256xf32> to vector<8x192xf32>
    %cst_56 = arith.constant 0.000000e+00 : f32
    %110 = vector.broadcast %cst_56 : f32 to vector<8x192xf32>
    %111 = arith.subf %110, %109 : vector<8x192xf32>
    %112 = math.exp %111 : vector<8x192xf32>
    %cst_57 = arith.constant 1.000000e+00 : f32
    %113 = vector.broadcast %cst_57 : f32 to vector<8x192xf32>
    %114 = arith.addf %113, %112 : vector<8x192xf32>
    %115 = tpu.reciprocal %114 {approx = true} : vector<8x192xf32> -> vector<8x192xf32>
    %116 = arith.mulf %114, %115 : vector<8x192xf32>
    %cst_58 = arith.constant 2.000000e+00 : f32
    %117 = vector.broadcast %cst_58 : f32 to vector<8x192xf32>
    %118 = arith.subf %117, %116 : vector<8x192xf32>
    %119 = arith.mulf %115, %118 : vector<8x192xf32>
    %120 = vector.extract_strided_slice %119 {offsets = [0, 0], sizes = [8, 64], strides = [1, 1]} : vector<8x192xf32> to vector<8x64xf32>
    %121 = vector.extract_strided_slice %119 {offsets = [0, 64], sizes = [8, 64], strides = [1, 1]} : vector<8x192xf32> to vector<8x64xf32>
    %122 = vector.extract_strided_slice %119 {offsets = [0, 128], sizes = [8, 64], strides = [1, 1]} : vector<8x192xf32> to vector<8x64xf32>
    %123 = vector.extract_strided_slice %108 {offsets = [0, 192], sizes = [8, 64], strides = [1, 1]} : vector<8x256xf32> to vector<8x64xf32>
    %124 = math.tanh %123 : vector<8x64xf32>
    %125 = arith.mulf %121, %103 : vector<8x64xf32>
    %126 = arith.mulf %120, %124 : vector<8x64xf32>
    %127 = arith.addf %125, %126 : vector<8x64xf32>
    %128 = math.tanh %127 : vector<8x64xf32>
    %129 = arith.mulf %122, %128 : vector<8x64xf32>
    %130 = vector.broadcast %99 : vector<8x1xf32> to vector<8x64xf32>
    %131 = arith.mulf %129, %130 : vector<8x64xf32>
    %c0_59 = arith.constant 0 : index
    %c0_60 = arith.constant 0 : index
    %c0_61 = arith.constant 0 : index
    %132 = vector.load %arg8[%c0_59, %c0_60, %c0_61] : memref<2x8x64xf32, #tpu.memory_space<vmem>>, vector<1x8x64xf32>
    %133 = vector.shape_cast %132 : vector<1x8x64xf32> to vector<8x64xf32>
    %134 = vector.shape_cast %131 : vector<8x64xf32> to vector<1x8x64xf32>
    tpu.vector_store %arg8[%c0_59, %c0_60, %c0_61], %134 {strides = array<i32>} : memref<2x8x64xf32, #tpu.memory_space<vmem>>, vector<1x8x64xf32>,
    %135 = vector.broadcast %99 : vector<8x1xf32> to vector<8x64xf32>
    %136 = arith.mulf %127, %135 : vector<8x64xf32>
    %c0_62 = arith.constant 0 : index
    %c0_63 = arith.constant 0 : index
    %c0_64 = arith.constant 0 : index
    %137 = vector.load %arg9[%c0_62, %c0_63, %c0_64] : memref<2x8x64xf32, #tpu.memory_space<vmem>>, vector<1x8x64xf32>
    %138 = vector.shape_cast %137 : vector<1x8x64xf32> to vector<8x64xf32>
    %139 = vector.shape_cast %136 : vector<8x64xf32> to vector<1x8x64xf32>
    tpu.vector_store %arg9[%c0_62, %c0_63, %c0_64], %139 {strides = array<i32>} : memref<2x8x64xf32, #tpu.memory_space<vmem>>, vector<1x8x64xf32>,
    %c1_65 = arith.constant 1 : index
    %c0_66 = arith.constant 0 : index
    %c0_67 = arith.constant 0 : index
    %140 = vector.load %arg8[%c1_65, %c0_66, %c0_67] : memref<2x8x64xf32, #tpu.memory_space<vmem>>, vector<1x8x64xf32>
    %141 = vector.shape_cast %140 : vector<1x8x64xf32> to vector<8x64xf32>
    %c1_68 = arith.constant 1 : index
    %c0_69 = arith.constant 0 : index
    %c0_70 = arith.constant 0 : index
    %142 = vector.load %arg9[%c1_68, %c0_69, %c0_70] : memref<2x8x64xf32, #tpu.memory_space<vmem>>, vector<1x8x64xf32>
    %143 = vector.shape_cast %142 : vector<1x8x64xf32> to vector<8x64xf32>
    %144 = tpu.concatenate %129, %141 in 1 : vector<8x64xf32>, vector<8x64xf32> -> vector<8x128xf32>
    %cst_71 = arith.constant dense<0.000000e+00> : vector<8x256xf32>
    %145 = tpu.matmul %144, %4, %cst_71 {dimension_numbers = #tpu.dot_dimension_numbers<[1], [0], [0], [1], [0, 0, 1, 1], [], []>} : vector<8x128xf32>, vector<128x256xf32>, vector<8x256xf32> -> vector<8x256xf32>
    %146 = vector.broadcast %5 : vector<1x256xf32> to vector<8x256xf32>
    %147 = arith.addf %145, %146 : vector<8x256xf32>
    %148 = vector.extract_strided_slice %147 {offsets = [0, 0], sizes = [8, 192], strides = [1, 1]} : vector<8x256xf32> to vector<8x192xf32>
    %cst_72 = arith.constant 0.000000e+00 : f32
    %149 = vector.broadcast %cst_72 : f32 to vector<8x192xf32>
    %150 = arith.subf %149, %148 : vector<8x192xf32>
    %151 = math.exp %150 : vector<8x192xf32>
    %cst_73 = arith.constant 1.000000e+00 : f32
    %152 = vector.broadcast %cst_73 : f32 to vector<8x192xf32>
    %153 = arith.addf %152, %151 : vector<8x192xf32>
    %154 = tpu.reciprocal %153 {approx = true} : vector<8x192xf32> -> vector<8x192xf32>
    %155 = arith.mulf %153, %154 : vector<8x192xf32>
    %cst_74 = arith.constant 2.000000e+00 : f32
    %156 = vector.broadcast %cst_74 : f32 to vector<8x192xf32>
    %157 = arith.subf %156, %155 : vector<8x192xf32>
    %158 = arith.mulf %154, %157 : vector<8x192xf32>
    %159 = vector.extract_strided_slice %158 {offsets = [0, 0], sizes = [8, 64], strides = [1, 1]} : vector<8x192xf32> to vector<8x64xf32>
    %160 = vector.extract_strided_slice %158 {offsets = [0, 64], sizes = [8, 64], strides = [1, 1]} : vector<8x192xf32> to vector<8x64xf32>
    %161 = vector.extract_strided_slice %158 {offsets = [0, 128], sizes = [8, 64], strides = [1, 1]} : vector<8x192xf32> to vector<8x64xf32>
    %162 = vector.extract_strided_slice %147 {offsets = [0, 192], sizes = [8, 64], strides = [1, 1]} : vector<8x256xf32> to vector<8x64xf32>
    %163 = math.tanh %162 : vector<8x64xf32>
    %164 = arith.mulf %160, %143 : vector<8x64xf32>
    %165 = arith.mulf %159, %163 : vector<8x64xf32>
    %166 = arith.addf %164, %165 : vector<8x64xf32>
    %167 = math.tanh %166 : vector<8x64xf32>
    %168 = arith.mulf %161, %167 : vector<8x64xf32>
    %169 = vector.broadcast %99 : vector<8x1xf32> to vector<8x64xf32>
    %170 = arith.mulf %168, %169 : vector<8x64xf32>
    %c1_75 = arith.constant 1 : index
    %c0_76 = arith.constant 0 : index
    %c0_77 = arith.constant 0 : index
    %171 = vector.load %arg8[%c1_75, %c0_76, %c0_77] : memref<2x8x64xf32, #tpu.memory_space<vmem>>, vector<1x8x64xf32>
    %172 = vector.shape_cast %171 : vector<1x8x64xf32> to vector<8x64xf32>
    %173 = vector.shape_cast %170 : vector<8x64xf32> to vector<1x8x64xf32>
    tpu.vector_store %arg8[%c1_75, %c0_76, %c0_77], %173 {strides = array<i32>} : memref<2x8x64xf32, #tpu.memory_space<vmem>>, vector<1x8x64xf32>,
    %174 = vector.broadcast %99 : vector<8x1xf32> to vector<8x64xf32>
    %175 = arith.mulf %166, %174 : vector<8x64xf32>
    %c1_78 = arith.constant 1 : index
    %c0_79 = arith.constant 0 : index
    %c0_80 = arith.constant 0 : index
    %176 = vector.load %arg9[%c1_78, %c0_79, %c0_80] : memref<2x8x64xf32, #tpu.memory_space<vmem>>, vector<1x8x64xf32>
    %177 = vector.shape_cast %176 : vector<1x8x64xf32> to vector<8x64xf32>
    %178 = vector.shape_cast %175 : vector<8x64xf32> to vector<1x8x64xf32>
    tpu.vector_store %arg9[%c1_78, %c0_79, %c0_80], %178 {strides = array<i32>} : memref<2x8x64xf32, #tpu.memory_space<vmem>>, vector<1x8x64xf32>,
    %179 = tpu.concatenate %129, %168 in 1 : vector<8x64xf32>, vector<8x64xf32> -> vector<8x128xf32>
    %180 = arith.index_cast %c1_i32 : i32 to index
    %c0_81 = arith.constant 0 : index
    %c0_82 = arith.constant 0 : index
    %181 = vector.load %arg7[%180, %c0_81, %c0_82] : memref<8x8x128xf32, #tpu.memory_space<vmem>>, vector<1x8x128xf32>
    %182 = vector.shape_cast %181 : vector<1x8x128xf32> to vector<8x128xf32>
    %183 = vector.shape_cast %179 : vector<8x128xf32> to vector<1x8x128xf32>
    tpu.vector_store %arg7[%180, %c0_81, %c0_82], %183 {strides = array<i32>} : memref<8x8x128xf32, #tpu.memory_space<vmem>>, vector<1x8x128xf32>,
    %c2_i32 = arith.constant 2 : i32
    %184 = arith.index_cast %c2_i32 : i32 to index
    %c0_83 = arith.constant 0 : index
    %c0_84 = arith.constant 0 : index
    %185 = vector.load %arg3[%184, %c0_83, %c0_84] : memref<8x8x1xf32, #tpu.memory_space<vmem>>, vector<1x8x1xf32>
    %186 = vector.shape_cast %185 : vector<1x8x1xf32> to vector<8x1xf32>
    %cst_85 = arith.constant 1.000000e+00 : f32
    %187 = vector.broadcast %cst_85 : f32 to vector<8x1xf32>
    %188 = arith.subf %187, %186 : vector<8x1xf32>
    %c0_86 = arith.constant 0 : index
    %c0_87 = arith.constant 0 : index
    %c0_88 = arith.constant 0 : index
    %189 = vector.load %arg8[%c0_86, %c0_87, %c0_88] : memref<2x8x64xf32, #tpu.memory_space<vmem>>, vector<1x8x64xf32>
    %190 = vector.shape_cast %189 : vector<1x8x64xf32> to vector<8x64xf32>
    %c0_89 = arith.constant 0 : index
    %c0_90 = arith.constant 0 : index
    %c0_91 = arith.constant 0 : index
    %191 = vector.load %arg9[%c0_89, %c0_90, %c0_91] : memref<2x8x64xf32, #tpu.memory_space<vmem>>, vector<1x8x64xf32>
    %192 = vector.shape_cast %191 : vector<1x8x64xf32> to vector<8x64xf32>
    %193 = arith.index_cast %c2_i32 : i32 to index
    %c0_92 = arith.constant 0 : index
    %c0_93 = arith.constant 0 : index
    %194 = vector.load %arg2[%193, %c0_92, %c0_93] : memref<8x8x256xf32, #tpu.memory_space<vmem>>, vector<1x8x256xf32>
    %195 = vector.shape_cast %194 : vector<1x8x256xf32> to vector<8x256xf32>
    %cst_94 = arith.constant dense<0.000000e+00> : vector<8x256xf32>
    %196 = tpu.matmul %190, %3, %cst_94 {dimension_numbers = #tpu.dot_dimension_numbers<[1], [0], [0], [1], [0, 0, 1, 1], [], []>} : vector<8x64xf32>, vector<64x256xf32>, vector<8x256xf32> -> vector<8x256xf32>
    %197 = arith.addf %195, %196 : vector<8x256xf32>
    %198 = vector.extract_strided_slice %197 {offsets = [0, 0], sizes = [8, 192], strides = [1, 1]} : vector<8x256xf32> to vector<8x192xf32>
    %cst_95 = arith.constant 0.000000e+00 : f32
    %199 = vector.broadcast %cst_95 : f32 to vector<8x192xf32>
    %200 = arith.subf %199, %198 : vector<8x192xf32>
    %201 = math.exp %200 : vector<8x192xf32>
    %cst_96 = arith.constant 1.000000e+00 : f32
    %202 = vector.broadcast %cst_96 : f32 to vector<8x192xf32>
    %203 = arith.addf %202, %201 : vector<8x192xf32>
    %204 = tpu.reciprocal %203 {approx = true} : vector<8x192xf32> -> vector<8x192xf32>
    %205 = arith.mulf %203, %204 : vector<8x192xf32>
    %cst_97 = arith.constant 2.000000e+00 : f32
    %206 = vector.broadcast %cst_97 : f32 to vector<8x192xf32>
    %207 = arith.subf %206, %205 : vector<8x192xf32>
    %208 = arith.mulf %204, %207 : vector<8x192xf32>
    %209 = vector.extract_strided_slice %208 {offsets = [0, 0], sizes = [8, 64], strides = [1, 1]} : vector<8x192xf32> to vector<8x64xf32>
    %210 = vector.extract_strided_slice %208 {offsets = [0, 64], sizes = [8, 64], strides = [1, 1]} : vector<8x192xf32> to vector<8x64xf32>
    %211 = vector.extract_strided_slice %208 {offsets = [0, 128], sizes = [8, 64], strides = [1, 1]} : vector<8x192xf32> to vector<8x64xf32>
    %212 = vector.extract_strided_slice %197 {offsets = [0, 192], sizes = [8, 64], strides = [1, 1]} : vector<8x256xf32> to vector<8x64xf32>
    %213 = math.tanh %212 : vector<8x64xf32>
    %214 = arith.mulf %210, %192 : vector<8x64xf32>
    %215 = arith.mulf %209, %213 : vector<8x64xf32>
    %216 = arith.addf %214, %215 : vector<8x64xf32>
    %217 = math.tanh %216 : vector<8x64xf32>
    %218 = arith.mulf %211, %217 : vector<8x64xf32>
    %219 = vector.broadcast %188 : vector<8x1xf32> to vector<8x64xf32>
    %220 = arith.mulf %218, %219 : vector<8x64xf32>
    %c0_98 = arith.constant 0 : index
    %c0_99 = arith.constant 0 : index
    %c0_100 = arith.constant 0 : index
    %221 = vector.load %arg8[%c0_98, %c0_99, %c0_100] : memref<2x8x64xf32, #tpu.memory_space<vmem>>, vector<1x8x64xf32>
    %222 = vector.shape_cast %221 : vector<1x8x64xf32> to vector<8x64xf32>
    %223 = vector.shape_cast %220 : vector<8x64xf32> to vector<1x8x64xf32>
    tpu.vector_store %arg8[%c0_98, %c0_99, %c0_100], %223 {strides = array<i32>} : memref<2x8x64xf32, #tpu.memory_space<vmem>>, vector<1x8x64xf32>,
    %224 = vector.broadcast %188 : vector<8x1xf32> to vector<8x64xf32>
    %225 = arith.mulf %216, %224 : vector<8x64xf32>
    %c0_101 = arith.constant 0 : index
    %c0_102 = arith.constant 0 : index
    %c0_103 = arith.constant 0 : index
    %226 = vector.load %arg9[%c0_101, %c0_102, %c0_103] : memref<2x8x64xf32, #tpu.memory_space<vmem>>, vector<1x8x64xf32>
    %227 = vector.shape_cast %226 : vector<1x8x64xf32> to vector<8x64xf32>
    %228 = vector.shape_cast %225 : vector<8x64xf32> to vector<1x8x64xf32>
    tpu.vector_store %arg9[%c0_101, %c0_102, %c0_103], %228 {strides = array<i32>} : memref<2x8x64xf32, #tpu.memory_space<vmem>>, vector<1x8x64xf32>,
    %c1_104 = arith.constant 1 : index
    %c0_105 = arith.constant 0 : index
    %c0_106 = arith.constant 0 : index
    %229 = vector.load %arg8[%c1_104, %c0_105, %c0_106] : memref<2x8x64xf32, #tpu.memory_space<vmem>>, vector<1x8x64xf32>
    %230 = vector.shape_cast %229 : vector<1x8x64xf32> to vector<8x64xf32>
    %c1_107 = arith.constant 1 : index
    %c0_108 = arith.constant 0 : index
    %c0_109 = arith.constant 0 : index
    %231 = vector.load %arg9[%c1_107, %c0_108, %c0_109] : memref<2x8x64xf32, #tpu.memory_space<vmem>>, vector<1x8x64xf32>
    %232 = vector.shape_cast %231 : vector<1x8x64xf32> to vector<8x64xf32>
    %233 = tpu.concatenate %218, %230 in 1 : vector<8x64xf32>, vector<8x64xf32> -> vector<8x128xf32>
    %cst_110 = arith.constant dense<0.000000e+00> : vector<8x256xf32>
    %234 = tpu.matmul %233, %4, %cst_110 {dimension_numbers = #tpu.dot_dimension_numbers<[1], [0], [0], [1], [0, 0, 1, 1], [], []>} : vector<8x128xf32>, vector<128x256xf32>, vector<8x256xf32> -> vector<8x256xf32>
    %235 = vector.broadcast %5 : vector<1x256xf32> to vector<8x256xf32>
    %236 = arith.addf %234, %235 : vector<8x256xf32>
    %237 = vector.extract_strided_slice %236 {offsets = [0, 0], sizes = [8, 192], strides = [1, 1]} : vector<8x256xf32> to vector<8x192xf32>
    %cst_111 = arith.constant 0.000000e+00 : f32
    %238 = vector.broadcast %cst_111 : f32 to vector<8x192xf32>
    %239 = arith.subf %238, %237 : vector<8x192xf32>
    %240 = math.exp %239 : vector<8x192xf32>
    %cst_112 = arith.constant 1.000000e+00 : f32
    %241 = vector.broadcast %cst_112 : f32 to vector<8x192xf32>
    %242 = arith.addf %241, %240 : vector<8x192xf32>
    %243 = tpu.reciprocal %242 {approx = true} : vector<8x192xf32> -> vector<8x192xf32>
    %244 = arith.mulf %242, %243 : vector<8x192xf32>
    %cst_113 = arith.constant 2.000000e+00 : f32
    %245 = vector.broadcast %cst_113 : f32 to vector<8x192xf32>
    %246 = arith.subf %245, %244 : vector<8x192xf32>
    %247 = arith.mulf %243, %246 : vector<8x192xf32>
    %248 = vector.extract_strided_slice %247 {offsets = [0, 0], sizes = [8, 64], strides = [1, 1]} : vector<8x192xf32> to vector<8x64xf32>
    %249 = vector.extract_strided_slice %247 {offsets = [0, 64], sizes = [8, 64], strides = [1, 1]} : vector<8x192xf32> to vector<8x64xf32>
    %250 = vector.extract_strided_slice %247 {offsets = [0, 128], sizes = [8, 64], strides = [1, 1]} : vector<8x192xf32> to vector<8x64xf32>
    %251 = vector.extract_strided_slice %236 {offsets = [0, 192], sizes = [8, 64], strides = [1, 1]} : vector<8x256xf32> to vector<8x64xf32>
    %252 = math.tanh %251 : vector<8x64xf32>
    %253 = arith.mulf %249, %232 : vector<8x64xf32>
    %254 = arith.mulf %248, %252 : vector<8x64xf32>
    %255 = arith.addf %253, %254 : vector<8x64xf32>
    %256 = math.tanh %255 : vector<8x64xf32>
    %257 = arith.mulf %250, %256 : vector<8x64xf32>
    %258 = vector.broadcast %188 : vector<8x1xf32> to vector<8x64xf32>
    %259 = arith.mulf %257, %258 : vector<8x64xf32>
    %c1_114 = arith.constant 1 : index
    %c0_115 = arith.constant 0 : index
    %c0_116 = arith.constant 0 : index
    %260 = vector.load %arg8[%c1_114, %c0_115, %c0_116] : memref<2x8x64xf32, #tpu.memory_space<vmem>>, vector<1x8x64xf32>
    %261 = vector.shape_cast %260 : vector<1x8x64xf32> to vector<8x64xf32>
    %262 = vector.shape_cast %259 : vector<8x64xf32> to vector<1x8x64xf32>
    tpu.vector_store %arg8[%c1_114, %c0_115, %c0_116], %262 {strides = array<i32>} : memref<2x8x64xf32, #tpu.memory_space<vmem>>, vector<1x8x64xf32>,
    %263 = vector.broadcast %188 : vector<8x1xf32> to vector<8x64xf32>
    %264 = arith.mulf %255, %263 : vector<8x64xf32>
    %c1_117 = arith.constant 1 : index
    %c0_118 = arith.constant 0 : index
    %c0_119 = arith.constant 0 : index
    %265 = vector.load %arg9[%c1_117, %c0_118, %c0_119] : memref<2x8x64xf32, #tpu.memory_space<vmem>>, vector<1x8x64xf32>
    %266 = vector.shape_cast %265 : vector<1x8x64xf32> to vector<8x64xf32>
    %267 = vector.shape_cast %264 : vector<8x64xf32> to vector<1x8x64xf32>
    tpu.vector_store %arg9[%c1_117, %c0_118, %c0_119], %267 {strides = array<i32>} : memref<2x8x64xf32, #tpu.memory_space<vmem>>, vector<1x8x64xf32>,
    %268 = tpu.concatenate %218, %257 in 1 : vector<8x64xf32>, vector<8x64xf32> -> vector<8x128xf32>
    %269 = arith.index_cast %c2_i32 : i32 to index
    %c0_120 = arith.constant 0 : index
    %c0_121 = arith.constant 0 : index
    %270 = vector.load %arg7[%269, %c0_120, %c0_121] : memref<8x8x128xf32, #tpu.memory_space<vmem>>, vector<1x8x128xf32>
    %271 = vector.shape_cast %270 : vector<1x8x128xf32> to vector<8x128xf32>
    %272 = vector.shape_cast %268 : vector<8x128xf32> to vector<1x8x128xf32>
    tpu.vector_store %arg7[%269, %c0_120, %c0_121], %272 {strides = array<i32>} : memref<8x8x128xf32, #tpu.memory_space<vmem>>, vector<1x8x128xf32>,
    %c3_i32 = arith.constant 3 : i32
    %273 = arith.index_cast %c3_i32 : i32 to index
    %c0_122 = arith.constant 0 : index
    %c0_123 = arith.constant 0 : index
    %274 = vector.load %arg3[%273, %c0_122, %c0_123] : memref<8x8x1xf32, #tpu.memory_space<vmem>>, vector<1x8x1xf32>
    %275 = vector.shape_cast %274 : vector<1x8x1xf32> to vector<8x1xf32>
    %cst_124 = arith.constant 1.000000e+00 : f32
    %276 = vector.broadcast %cst_124 : f32 to vector<8x1xf32>
    %277 = arith.subf %276, %275 : vector<8x1xf32>
    %c0_125 = arith.constant 0 : index
    %c0_126 = arith.constant 0 : index
    %c0_127 = arith.constant 0 : index
    %278 = vector.load %arg8[%c0_125, %c0_126, %c0_127] : memref<2x8x64xf32, #tpu.memory_space<vmem>>, vector<1x8x64xf32>
    %279 = vector.shape_cast %278 : vector<1x8x64xf32> to vector<8x64xf32>
    %c0_128 = arith.constant 0 : index
    %c0_129 = arith.constant 0 : index
    %c0_130 = arith.constant 0 : index
    %280 = vector.load %arg9[%c0_128, %c0_129, %c0_130] : memref<2x8x64xf32, #tpu.memory_space<vmem>>, vector<1x8x64xf32>
    %281 = vector.shape_cast %280 : vector<1x8x64xf32> to vector<8x64xf32>
    %282 = arith.index_cast %c3_i32 : i32 to index
    %c0_131 = arith.constant 0 : index
    %c0_132 = arith.constant 0 : index
    %283 = vector.load %arg2[%282, %c0_131, %c0_132] : memref<8x8x256xf32, #tpu.memory_space<vmem>>, vector<1x8x256xf32>
    %284 = vector.shape_cast %283 : vector<1x8x256xf32> to vector<8x256xf32>
    %cst_133 = arith.constant dense<0.000000e+00> : vector<8x256xf32>
    %285 = tpu.matmul %279, %3, %cst_133 {dimension_numbers = #tpu.dot_dimension_numbers<[1], [0], [0], [1], [0, 0, 1, 1], [], []>} : vector<8x64xf32>, vector<64x256xf32>, vector<8x256xf32> -> vector<8x256xf32>
    %286 = arith.addf %284, %285 : vector<8x256xf32>
    %287 = vector.extract_strided_slice %286 {offsets = [0, 0], sizes = [8, 192], strides = [1, 1]} : vector<8x256xf32> to vector<8x192xf32>
    %cst_134 = arith.constant 0.000000e+00 : f32
    %288 = vector.broadcast %cst_134 : f32 to vector<8x192xf32>
    %289 = arith.subf %288, %287 : vector<8x192xf32>
    %290 = math.exp %289 : vector<8x192xf32>
    %cst_135 = arith.constant 1.000000e+00 : f32
    %291 = vector.broadcast %cst_135 : f32 to vector<8x192xf32>
    %292 = arith.addf %291, %290 : vector<8x192xf32>
    %293 = tpu.reciprocal %292 {approx = true} : vector<8x192xf32> -> vector<8x192xf32>
    %294 = arith.mulf %292, %293 : vector<8x192xf32>
    %cst_136 = arith.constant 2.000000e+00 : f32
    %295 = vector.broadcast %cst_136 : f32 to vector<8x192xf32>
    %296 = arith.subf %295, %294 : vector<8x192xf32>
    %297 = arith.mulf %293, %296 : vector<8x192xf32>
    %298 = vector.extract_strided_slice %297 {offsets = [0, 0], sizes = [8, 64], strides = [1, 1]} : vector<8x192xf32> to vector<8x64xf32>
    %299 = vector.extract_strided_slice %297 {offsets = [0, 64], sizes = [8, 64], strides = [1, 1]} : vector<8x192xf32> to vector<8x64xf32>
    %300 = vector.extract_strided_slice %297 {offsets = [0, 128], sizes = [8, 64], strides = [1, 1]} : vector<8x192xf32> to vector<8x64xf32>
    %301 = vector.extract_strided_slice %286 {offsets = [0, 192], sizes = [8, 64], strides = [1, 1]} : vector<8x256xf32> to vector<8x64xf32>
    %302 = math.tanh %301 : vector<8x64xf32>
    %303 = arith.mulf %299, %281 : vector<8x64xf32>
    %304 = arith.mulf %298, %302 : vector<8x64xf32>
    %305 = arith.addf %303, %304 : vector<8x64xf32>
    %306 = math.tanh %305 : vector<8x64xf32>
    %307 = arith.mulf %300, %306 : vector<8x64xf32>
    %308 = vector.broadcast %277 : vector<8x1xf32> to vector<8x64xf32>
    %309 = arith.mulf %307, %308 : vector<8x64xf32>
    %c0_137 = arith.constant 0 : index
    %c0_138 = arith.constant 0 : index
    %c0_139 = arith.constant 0 : index
    %310 = vector.load %arg8[%c0_137, %c0_138, %c0_139] : memref<2x8x64xf32, #tpu.memory_space<vmem>>, vector<1x8x64xf32>
    %311 = vector.shape_cast %310 : vector<1x8x64xf32> to vector<8x64xf32>
    %312 = vector.shape_cast %309 : vector<8x64xf32> to vector<1x8x64xf32>
    tpu.vector_store %arg8[%c0_137, %c0_138, %c0_139], %312 {strides = array<i32>} : memref<2x8x64xf32, #tpu.memory_space<vmem>>, vector<1x8x64xf32>,
    %313 = vector.broadcast %277 : vector<8x1xf32> to vector<8x64xf32>
    %314 = arith.mulf %305, %313 : vector<8x64xf32>
    %c0_140 = arith.constant 0 : index
    %c0_141 = arith.constant 0 : index
    %c0_142 = arith.constant 0 : index
    %315 = vector.load %arg9[%c0_140, %c0_141, %c0_142] : memref<2x8x64xf32, #tpu.memory_space<vmem>>, vector<1x8x64xf32>
    %316 = vector.shape_cast %315 : vector<1x8x64xf32> to vector<8x64xf32>
    %317 = vector.shape_cast %314 : vector<8x64xf32> to vector<1x8x64xf32>
    tpu.vector_store %arg9[%c0_140, %c0_141, %c0_142], %317 {strides = array<i32>} : memref<2x8x64xf32, #tpu.memory_space<vmem>>, vector<1x8x64xf32>,
    %c1_143 = arith.constant 1 : index
    %c0_144 = arith.constant 0 : index
    %c0_145 = arith.constant 0 : index
    %318 = vector.load %arg8[%c1_143, %c0_144, %c0_145] : memref<2x8x64xf32, #tpu.memory_space<vmem>>, vector<1x8x64xf32>
    %319 = vector.shape_cast %318 : vector<1x8x64xf32> to vector<8x64xf32>
    %c1_146 = arith.constant 1 : index
    %c0_147 = arith.constant 0 : index
    %c0_148 = arith.constant 0 : index
    %320 = vector.load %arg9[%c1_146, %c0_147, %c0_148] : memref<2x8x64xf32, #tpu.memory_space<vmem>>, vector<1x8x64xf32>
    %321 = vector.shape_cast %320 : vector<1x8x64xf32> to vector<8x64xf32>
    %322 = tpu.concatenate %307, %319 in 1 : vector<8x64xf32>, vector<8x64xf32> -> vector<8x128xf32>
    %cst_149 = arith.constant dense<0.000000e+00> : vector<8x256xf32>
    %323 = tpu.matmul %322, %4, %cst_149 {dimension_numbers = #tpu.dot_dimension_numbers<[1], [0], [0], [1], [0, 0, 1, 1], [], []>} : vector<8x128xf32>, vector<128x256xf32>, vector<8x256xf32> -> vector<8x256xf32>
    %324 = vector.broadcast %5 : vector<1x256xf32> to vector<8x256xf32>
    %325 = arith.addf %323, %324 : vector<8x256xf32>
    %326 = vector.extract_strided_slice %325 {offsets = [0, 0], sizes = [8, 192], strides = [1, 1]} : vector<8x256xf32> to vector<8x192xf32>
    %cst_150 = arith.constant 0.000000e+00 : f32
    %327 = vector.broadcast %cst_150 : f32 to vector<8x192xf32>
    %328 = arith.subf %327, %326 : vector<8x192xf32>
    %329 = math.exp %328 : vector<8x192xf32>
    %cst_151 = arith.constant 1.000000e+00 : f32
    %330 = vector.broadcast %cst_151 : f32 to vector<8x192xf32>
    %331 = arith.addf %330, %329 : vector<8x192xf32>
    %332 = tpu.reciprocal %331 {approx = true} : vector<8x192xf32> -> vector<8x192xf32>
    %333 = arith.mulf %331, %332 : vector<8x192xf32>
    %cst_152 = arith.constant 2.000000e+00 : f32
    %334 = vector.broadcast %cst_152 : f32 to vector<8x192xf32>
    %335 = arith.subf %334, %333 : vector<8x192xf32>
    %336 = arith.mulf %332, %335 : vector<8x192xf32>
    %337 = vector.extract_strided_slice %336 {offsets = [0, 0], sizes = [8, 64], strides = [1, 1]} : vector<8x192xf32> to vector<8x64xf32>
    %338 = vector.extract_strided_slice %336 {offsets = [0, 64], sizes = [8, 64], strides = [1, 1]} : vector<8x192xf32> to vector<8x64xf32>
    %339 = vector.extract_strided_slice %336 {offsets = [0, 128], sizes = [8, 64], strides = [1, 1]} : vector<8x192xf32> to vector<8x64xf32>
    %340 = vector.extract_strided_slice %325 {offsets = [0, 192], sizes = [8, 64], strides = [1, 1]} : vector<8x256xf32> to vector<8x64xf32>
    %341 = math.tanh %340 : vector<8x64xf32>
    %342 = arith.mulf %338, %321 : vector<8x64xf32>
    %343 = arith.mulf %337, %341 : vector<8x64xf32>
    %344 = arith.addf %342, %343 : vector<8x64xf32>
    %345 = math.tanh %344 : vector<8x64xf32>
    %346 = arith.mulf %339, %345 : vector<8x64xf32>
    %347 = vector.broadcast %277 : vector<8x1xf32> to vector<8x64xf32>
    %348 = arith.mulf %346, %347 : vector<8x64xf32>
    %c1_153 = arith.constant 1 : index
    %c0_154 = arith.constant 0 : index
    %c0_155 = arith.constant 0 : index
    %349 = vector.load %arg8[%c1_153, %c0_154, %c0_155] : memref<2x8x64xf32, #tpu.memory_space<vmem>>, vector<1x8x64xf32>
    %350 = vector.shape_cast %349 : vector<1x8x64xf32> to vector<8x64xf32>
    %351 = vector.shape_cast %348 : vector<8x64xf32> to vector<1x8x64xf32>
    tpu.vector_store %arg8[%c1_153, %c0_154, %c0_155], %351 {strides = array<i32>} : memref<2x8x64xf32, #tpu.memory_space<vmem>>, vector<1x8x64xf32>,
    %352 = vector.broadcast %277 : vector<8x1xf32> to vector<8x64xf32>
    %353 = arith.mulf %344, %352 : vector<8x64xf32>
    %c1_156 = arith.constant 1 : index
    %c0_157 = arith.constant 0 : index
    %c0_158 = arith.constant 0 : index
    %354 = vector.load %arg9[%c1_156, %c0_157, %c0_158] : memref<2x8x64xf32, #tpu.memory_space<vmem>>, vector<1x8x64xf32>
    %355 = vector.shape_cast %354 : vector<1x8x64xf32> to vector<8x64xf32>
    %356 = vector.shape_cast %353 : vector<8x64xf32> to vector<1x8x64xf32>
    tpu.vector_store %arg9[%c1_156, %c0_157, %c0_158], %356 {strides = array<i32>} : memref<2x8x64xf32, #tpu.memory_space<vmem>>, vector<1x8x64xf32>,
    %357 = tpu.concatenate %307, %346 in 1 : vector<8x64xf32>, vector<8x64xf32> -> vector<8x128xf32>
    %358 = arith.index_cast %c3_i32 : i32 to index
    %c0_159 = arith.constant 0 : index
    %c0_160 = arith.constant 0 : index
    %359 = vector.load %arg7[%358, %c0_159, %c0_160] : memref<8x8x128xf32, #tpu.memory_space<vmem>>, vector<1x8x128xf32>
    %360 = vector.shape_cast %359 : vector<1x8x128xf32> to vector<8x128xf32>
    %361 = vector.shape_cast %357 : vector<8x128xf32> to vector<1x8x128xf32>
    tpu.vector_store %arg7[%358, %c0_159, %c0_160], %361 {strides = array<i32>} : memref<8x8x128xf32, #tpu.memory_space<vmem>>, vector<1x8x128xf32>,
    %c4_i32 = arith.constant 4 : i32
    %362 = arith.index_cast %c4_i32 : i32 to index
    %c0_161 = arith.constant 0 : index
    %c0_162 = arith.constant 0 : index
    %363 = vector.load %arg3[%362, %c0_161, %c0_162] : memref<8x8x1xf32, #tpu.memory_space<vmem>>, vector<1x8x1xf32>
    %364 = vector.shape_cast %363 : vector<1x8x1xf32> to vector<8x1xf32>
    %cst_163 = arith.constant 1.000000e+00 : f32
    %365 = vector.broadcast %cst_163 : f32 to vector<8x1xf32>
    %366 = arith.subf %365, %364 : vector<8x1xf32>
    %c0_164 = arith.constant 0 : index
    %c0_165 = arith.constant 0 : index
    %c0_166 = arith.constant 0 : index
    %367 = vector.load %arg8[%c0_164, %c0_165, %c0_166] : memref<2x8x64xf32, #tpu.memory_space<vmem>>, vector<1x8x64xf32>
    %368 = vector.shape_cast %367 : vector<1x8x64xf32> to vector<8x64xf32>
    %c0_167 = arith.constant 0 : index
    %c0_168 = arith.constant 0 : index
    %c0_169 = arith.constant 0 : index
    %369 = vector.load %arg9[%c0_167, %c0_168, %c0_169] : memref<2x8x64xf32, #tpu.memory_space<vmem>>, vector<1x8x64xf32>
    %370 = vector.shape_cast %369 : vector<1x8x64xf32> to vector<8x64xf32>
    %371 = arith.index_cast %c4_i32 : i32 to index
    %c0_170 = arith.constant 0 : index
    %c0_171 = arith.constant 0 : index
    %372 = vector.load %arg2[%371, %c0_170, %c0_171] : memref<8x8x256xf32, #tpu.memory_space<vmem>>, vector<1x8x256xf32>
    %373 = vector.shape_cast %372 : vector<1x8x256xf32> to vector<8x256xf32>
    %cst_172 = arith.constant dense<0.000000e+00> : vector<8x256xf32>
    %374 = tpu.matmul %368, %3, %cst_172 {dimension_numbers = #tpu.dot_dimension_numbers<[1], [0], [0], [1], [0, 0, 1, 1], [], []>} : vector<8x64xf32>, vector<64x256xf32>, vector<8x256xf32> -> vector<8x256xf32>
    %375 = arith.addf %373, %374 : vector<8x256xf32>
    %376 = vector.extract_strided_slice %375 {offsets = [0, 0], sizes = [8, 192], strides = [1, 1]} : vector<8x256xf32> to vector<8x192xf32>
    %cst_173 = arith.constant 0.000000e+00 : f32
    %377 = vector.broadcast %cst_173 : f32 to vector<8x192xf32>
    %378 = arith.subf %377, %376 : vector<8x192xf32>
    %379 = math.exp %378 : vector<8x192xf32>
    %cst_174 = arith.constant 1.000000e+00 : f32
    %380 = vector.broadcast %cst_174 : f32 to vector<8x192xf32>
    %381 = arith.addf %380, %379 : vector<8x192xf32>
    %382 = tpu.reciprocal %381 {approx = true} : vector<8x192xf32> -> vector<8x192xf32>
    %383 = arith.mulf %381, %382 : vector<8x192xf32>
    %cst_175 = arith.constant 2.000000e+00 : f32
    %384 = vector.broadcast %cst_175 : f32 to vector<8x192xf32>
    %385 = arith.subf %384, %383 : vector<8x192xf32>
    %386 = arith.mulf %382, %385 : vector<8x192xf32>
    %387 = vector.extract_strided_slice %386 {offsets = [0, 0], sizes = [8, 64], strides = [1, 1]} : vector<8x192xf32> to vector<8x64xf32>
    %388 = vector.extract_strided_slice %386 {offsets = [0, 64], sizes = [8, 64], strides = [1, 1]} : vector<8x192xf32> to vector<8x64xf32>
    %389 = vector.extract_strided_slice %386 {offsets = [0, 128], sizes = [8, 64], strides = [1, 1]} : vector<8x192xf32> to vector<8x64xf32>
    %390 = vector.extract_strided_slice %375 {offsets = [0, 192], sizes = [8, 64], strides = [1, 1]} : vector<8x256xf32> to vector<8x64xf32>
    %391 = math.tanh %390 : vector<8x64xf32>
    %392 = arith.mulf %388, %370 : vector<8x64xf32>
    %393 = arith.mulf %387, %391 : vector<8x64xf32>
    %394 = arith.addf %392, %393 : vector<8x64xf32>
    %395 = math.tanh %394 : vector<8x64xf32>
    %396 = arith.mulf %389, %395 : vector<8x64xf32>
    %397 = vector.broadcast %366 : vector<8x1xf32> to vector<8x64xf32>
    %398 = arith.mulf %396, %397 : vector<8x64xf32>
    %c0_176 = arith.constant 0 : index
    %c0_177 = arith.constant 0 : index
    %c0_178 = arith.constant 0 : index
    %399 = vector.load %arg8[%c0_176, %c0_177, %c0_178] : memref<2x8x64xf32, #tpu.memory_space<vmem>>, vector<1x8x64xf32>
    %400 = vector.shape_cast %399 : vector<1x8x64xf32> to vector<8x64xf32>
    %401 = vector.shape_cast %398 : vector<8x64xf32> to vector<1x8x64xf32>
    tpu.vector_store %arg8[%c0_176, %c0_177, %c0_178], %401 {strides = array<i32>} : memref<2x8x64xf32, #tpu.memory_space<vmem>>, vector<1x8x64xf32>,
    %402 = vector.broadcast %366 : vector<8x1xf32> to vector<8x64xf32>
    %403 = arith.mulf %394, %402 : vector<8x64xf32>
    %c0_179 = arith.constant 0 : index
    %c0_180 = arith.constant 0 : index
    %c0_181 = arith.constant 0 : index
    %404 = vector.load %arg9[%c0_179, %c0_180, %c0_181] : memref<2x8x64xf32, #tpu.memory_space<vmem>>, vector<1x8x64xf32>
    %405 = vector.shape_cast %404 : vector<1x8x64xf32> to vector<8x64xf32>
    %406 = vector.shape_cast %403 : vector<8x64xf32> to vector<1x8x64xf32>
    tpu.vector_store %arg9[%c0_179, %c0_180, %c0_181], %406 {strides = array<i32>} : memref<2x8x64xf32, #tpu.memory_space<vmem>>, vector<1x8x64xf32>,
    %c1_182 = arith.constant 1 : index
    %c0_183 = arith.constant 0 : index
    %c0_184 = arith.constant 0 : index
    %407 = vector.load %arg8[%c1_182, %c0_183, %c0_184] : memref<2x8x64xf32, #tpu.memory_space<vmem>>, vector<1x8x64xf32>
    %408 = vector.shape_cast %407 : vector<1x8x64xf32> to vector<8x64xf32>
    %c1_185 = arith.constant 1 : index
    %c0_186 = arith.constant 0 : index
    %c0_187 = arith.constant 0 : index
    %409 = vector.load %arg9[%c1_185, %c0_186, %c0_187] : memref<2x8x64xf32, #tpu.memory_space<vmem>>, vector<1x8x64xf32>
    %410 = vector.shape_cast %409 : vector<1x8x64xf32> to vector<8x64xf32>
    %411 = tpu.concatenate %396, %408 in 1 : vector<8x64xf32>, vector<8x64xf32> -> vector<8x128xf32>
    %cst_188 = arith.constant dense<0.000000e+00> : vector<8x256xf32>
    %412 = tpu.matmul %411, %4, %cst_188 {dimension_numbers = #tpu.dot_dimension_numbers<[1], [0], [0], [1], [0, 0, 1, 1], [], []>} : vector<8x128xf32>, vector<128x256xf32>, vector<8x256xf32> -> vector<8x256xf32>
    %413 = vector.broadcast %5 : vector<1x256xf32> to vector<8x256xf32>
    %414 = arith.addf %412, %413 : vector<8x256xf32>
    %415 = vector.extract_strided_slice %414 {offsets = [0, 0], sizes = [8, 192], strides = [1, 1]} : vector<8x256xf32> to vector<8x192xf32>
    %cst_189 = arith.constant 0.000000e+00 : f32
    %416 = vector.broadcast %cst_189 : f32 to vector<8x192xf32>
    %417 = arith.subf %416, %415 : vector<8x192xf32>
    %418 = math.exp %417 : vector<8x192xf32>
    %cst_190 = arith.constant 1.000000e+00 : f32
    %419 = vector.broadcast %cst_190 : f32 to vector<8x192xf32>
    %420 = arith.addf %419, %418 : vector<8x192xf32>
    %421 = tpu.reciprocal %420 {approx = true} : vector<8x192xf32> -> vector<8x192xf32>
    %422 = arith.mulf %420, %421 : vector<8x192xf32>
    %cst_191 = arith.constant 2.000000e+00 : f32
    %423 = vector.broadcast %cst_191 : f32 to vector<8x192xf32>
    %424 = arith.subf %423, %422 : vector<8x192xf32>
    %425 = arith.mulf %421, %424 : vector<8x192xf32>
    %426 = vector.extract_strided_slice %425 {offsets = [0, 0], sizes = [8, 64], strides = [1, 1]} : vector<8x192xf32> to vector<8x64xf32>
    %427 = vector.extract_strided_slice %425 {offsets = [0, 64], sizes = [8, 64], strides = [1, 1]} : vector<8x192xf32> to vector<8x64xf32>
    %428 = vector.extract_strided_slice %425 {offsets = [0, 128], sizes = [8, 64], strides = [1, 1]} : vector<8x192xf32> to vector<8x64xf32>
    %429 = vector.extract_strided_slice %414 {offsets = [0, 192], sizes = [8, 64], strides = [1, 1]} : vector<8x256xf32> to vector<8x64xf32>
    %430 = math.tanh %429 : vector<8x64xf32>
    %431 = arith.mulf %427, %410 : vector<8x64xf32>
    %432 = arith.mulf %426, %430 : vector<8x64xf32>
    %433 = arith.addf %431, %432 : vector<8x64xf32>
    %434 = math.tanh %433 : vector<8x64xf32>
    %435 = arith.mulf %428, %434 : vector<8x64xf32>
    %436 = vector.broadcast %366 : vector<8x1xf32> to vector<8x64xf32>
    %437 = arith.mulf %435, %436 : vector<8x64xf32>
    %c1_192 = arith.constant 1 : index
    %c0_193 = arith.constant 0 : index
    %c0_194 = arith.constant 0 : index
    %438 = vector.load %arg8[%c1_192, %c0_193, %c0_194] : memref<2x8x64xf32, #tpu.memory_space<vmem>>, vector<1x8x64xf32>
    %439 = vector.shape_cast %438 : vector<1x8x64xf32> to vector<8x64xf32>
    %440 = vector.shape_cast %437 : vector<8x64xf32> to vector<1x8x64xf32>
    tpu.vector_store %arg8[%c1_192, %c0_193, %c0_194], %440 {strides = array<i32>} : memref<2x8x64xf32, #tpu.memory_space<vmem>>, vector<1x8x64xf32>,
    %441 = vector.broadcast %366 : vector<8x1xf32> to vector<8x64xf32>
    %442 = arith.mulf %433, %441 : vector<8x64xf32>
    %c1_195 = arith.constant 1 : index
    %c0_196 = arith.constant 0 : index
    %c0_197 = arith.constant 0 : index
    %443 = vector.load %arg9[%c1_195, %c0_196, %c0_197] : memref<2x8x64xf32, #tpu.memory_space<vmem>>, vector<1x8x64xf32>
    %444 = vector.shape_cast %443 : vector<1x8x64xf32> to vector<8x64xf32>
    %445 = vector.shape_cast %442 : vector<8x64xf32> to vector<1x8x64xf32>
    tpu.vector_store %arg9[%c1_195, %c0_196, %c0_197], %445 {strides = array<i32>} : memref<2x8x64xf32, #tpu.memory_space<vmem>>, vector<1x8x64xf32>,
    %446 = tpu.concatenate %396, %435 in 1 : vector<8x64xf32>, vector<8x64xf32> -> vector<8x128xf32>
    %447 = arith.index_cast %c4_i32 : i32 to index
    %c0_198 = arith.constant 0 : index
    %c0_199 = arith.constant 0 : index
    %448 = vector.load %arg7[%447, %c0_198, %c0_199] : memref<8x8x128xf32, #tpu.memory_space<vmem>>, vector<1x8x128xf32>
    %449 = vector.shape_cast %448 : vector<1x8x128xf32> to vector<8x128xf32>
    %450 = vector.shape_cast %446 : vector<8x128xf32> to vector<1x8x128xf32>
    tpu.vector_store %arg7[%447, %c0_198, %c0_199], %450 {strides = array<i32>} : memref<8x8x128xf32, #tpu.memory_space<vmem>>, vector<1x8x128xf32>,
    %c5_i32 = arith.constant 5 : i32
    %451 = arith.index_cast %c5_i32 : i32 to index
    %c0_200 = arith.constant 0 : index
    %c0_201 = arith.constant 0 : index
    %452 = vector.load %arg3[%451, %c0_200, %c0_201] : memref<8x8x1xf32, #tpu.memory_space<vmem>>, vector<1x8x1xf32>
    %453 = vector.shape_cast %452 : vector<1x8x1xf32> to vector<8x1xf32>
    %cst_202 = arith.constant 1.000000e+00 : f32
    %454 = vector.broadcast %cst_202 : f32 to vector<8x1xf32>
    %455 = arith.subf %454, %453 : vector<8x1xf32>
    %c0_203 = arith.constant 0 : index
    %c0_204 = arith.constant 0 : index
    %c0_205 = arith.constant 0 : index
    %456 = vector.load %arg8[%c0_203, %c0_204, %c0_205] : memref<2x8x64xf32, #tpu.memory_space<vmem>>, vector<1x8x64xf32>
    %457 = vector.shape_cast %456 : vector<1x8x64xf32> to vector<8x64xf32>
    %c0_206 = arith.constant 0 : index
    %c0_207 = arith.constant 0 : index
    %c0_208 = arith.constant 0 : index
    %458 = vector.load %arg9[%c0_206, %c0_207, %c0_208] : memref<2x8x64xf32, #tpu.memory_space<vmem>>, vector<1x8x64xf32>
    %459 = vector.shape_cast %458 : vector<1x8x64xf32> to vector<8x64xf32>
    %460 = arith.index_cast %c5_i32 : i32 to index
    %c0_209 = arith.constant 0 : index
    %c0_210 = arith.constant 0 : index
    %461 = vector.load %arg2[%460, %c0_209, %c0_210] : memref<8x8x256xf32, #tpu.memory_space<vmem>>, vector<1x8x256xf32>
    %462 = vector.shape_cast %461 : vector<1x8x256xf32> to vector<8x256xf32>
    %cst_211 = arith.constant dense<0.000000e+00> : vector<8x256xf32>
    %463 = tpu.matmul %457, %3, %cst_211 {dimension_numbers = #tpu.dot_dimension_numbers<[1], [0], [0], [1], [0, 0, 1, 1], [], []>} : vector<8x64xf32>, vector<64x256xf32>, vector<8x256xf32> -> vector<8x256xf32>
    %464 = arith.addf %462, %463 : vector<8x256xf32>
    %465 = vector.extract_strided_slice %464 {offsets = [0, 0], sizes = [8, 192], strides = [1, 1]} : vector<8x256xf32> to vector<8x192xf32>
    %cst_212 = arith.constant 0.000000e+00 : f32
    %466 = vector.broadcast %cst_212 : f32 to vector<8x192xf32>
    %467 = arith.subf %466, %465 : vector<8x192xf32>
    %468 = math.exp %467 : vector<8x192xf32>
    %cst_213 = arith.constant 1.000000e+00 : f32
    %469 = vector.broadcast %cst_213 : f32 to vector<8x192xf32>
    %470 = arith.addf %469, %468 : vector<8x192xf32>
    %471 = tpu.reciprocal %470 {approx = true} : vector<8x192xf32> -> vector<8x192xf32>
    %472 = arith.mulf %470, %471 : vector<8x192xf32>
    %cst_214 = arith.constant 2.000000e+00 : f32
    %473 = vector.broadcast %cst_214 : f32 to vector<8x192xf32>
    %474 = arith.subf %473, %472 : vector<8x192xf32>
    %475 = arith.mulf %471, %474 : vector<8x192xf32>
    %476 = vector.extract_strided_slice %475 {offsets = [0, 0], sizes = [8, 64], strides = [1, 1]} : vector<8x192xf32> to vector<8x64xf32>
    %477 = vector.extract_strided_slice %475 {offsets = [0, 64], sizes = [8, 64], strides = [1, 1]} : vector<8x192xf32> to vector<8x64xf32>
    %478 = vector.extract_strided_slice %475 {offsets = [0, 128], sizes = [8, 64], strides = [1, 1]} : vector<8x192xf32> to vector<8x64xf32>
    %479 = vector.extract_strided_slice %464 {offsets = [0, 192], sizes = [8, 64], strides = [1, 1]} : vector<8x256xf32> to vector<8x64xf32>
    %480 = math.tanh %479 : vector<8x64xf32>
    %481 = arith.mulf %477, %459 : vector<8x64xf32>
    %482 = arith.mulf %476, %480 : vector<8x64xf32>
    %483 = arith.addf %481, %482 : vector<8x64xf32>
    %484 = math.tanh %483 : vector<8x64xf32>
    %485 = arith.mulf %478, %484 : vector<8x64xf32>
    %486 = vector.broadcast %455 : vector<8x1xf32> to vector<8x64xf32>
    %487 = arith.mulf %485, %486 : vector<8x64xf32>
    %c0_215 = arith.constant 0 : index
    %c0_216 = arith.constant 0 : index
    %c0_217 = arith.constant 0 : index
    %488 = vector.load %arg8[%c0_215, %c0_216, %c0_217] : memref<2x8x64xf32, #tpu.memory_space<vmem>>, vector<1x8x64xf32>
    %489 = vector.shape_cast %488 : vector<1x8x64xf32> to vector<8x64xf32>
    %490 = vector.shape_cast %487 : vector<8x64xf32> to vector<1x8x64xf32>
    tpu.vector_store %arg8[%c0_215, %c0_216, %c0_217], %490 {strides = array<i32>} : memref<2x8x64xf32, #tpu.memory_space<vmem>>, vector<1x8x64xf32>,
    %491 = vector.broadcast %455 : vector<8x1xf32> to vector<8x64xf32>
    %492 = arith.mulf %483, %491 : vector<8x64xf32>
    %c0_218 = arith.constant 0 : index
    %c0_219 = arith.constant 0 : index
    %c0_220 = arith.constant 0 : index
    %493 = vector.load %arg9[%c0_218, %c0_219, %c0_220] : memref<2x8x64xf32, #tpu.memory_space<vmem>>, vector<1x8x64xf32>
    %494 = vector.shape_cast %493 : vector<1x8x64xf32> to vector<8x64xf32>
    %495 = vector.shape_cast %492 : vector<8x64xf32> to vector<1x8x64xf32>
    tpu.vector_store %arg9[%c0_218, %c0_219, %c0_220], %495 {strides = array<i32>} : memref<2x8x64xf32, #tpu.memory_space<vmem>>, vector<1x8x64xf32>,
    %c1_221 = arith.constant 1 : index
    %c0_222 = arith.constant 0 : index
    %c0_223 = arith.constant 0 : index
    %496 = vector.load %arg8[%c1_221, %c0_222, %c0_223] : memref<2x8x64xf32, #tpu.memory_space<vmem>>, vector<1x8x64xf32>
    %497 = vector.shape_cast %496 : vector<1x8x64xf32> to vector<8x64xf32>
    %c1_224 = arith.constant 1 : index
    %c0_225 = arith.constant 0 : index
    %c0_226 = arith.constant 0 : index
    %498 = vector.load %arg9[%c1_224, %c0_225, %c0_226] : memref<2x8x64xf32, #tpu.memory_space<vmem>>, vector<1x8x64xf32>
    %499 = vector.shape_cast %498 : vector<1x8x64xf32> to vector<8x64xf32>
    %500 = tpu.concatenate %485, %497 in 1 : vector<8x64xf32>, vector<8x64xf32> -> vector<8x128xf32>
    %cst_227 = arith.constant dense<0.000000e+00> : vector<8x256xf32>
    %501 = tpu.matmul %500, %4, %cst_227 {dimension_numbers = #tpu.dot_dimension_numbers<[1], [0], [0], [1], [0, 0, 1, 1], [], []>} : vector<8x128xf32>, vector<128x256xf32>, vector<8x256xf32> -> vector<8x256xf32>
    %502 = vector.broadcast %5 : vector<1x256xf32> to vector<8x256xf32>
    %503 = arith.addf %501, %502 : vector<8x256xf32>
    %504 = vector.extract_strided_slice %503 {offsets = [0, 0], sizes = [8, 192], strides = [1, 1]} : vector<8x256xf32> to vector<8x192xf32>
    %cst_228 = arith.constant 0.000000e+00 : f32
    %505 = vector.broadcast %cst_228 : f32 to vector<8x192xf32>
    %506 = arith.subf %505, %504 : vector<8x192xf32>
    %507 = math.exp %506 : vector<8x192xf32>
    %cst_229 = arith.constant 1.000000e+00 : f32
    %508 = vector.broadcast %cst_229 : f32 to vector<8x192xf32>
    %509 = arith.addf %508, %507 : vector<8x192xf32>
    %510 = tpu.reciprocal %509 {approx = true} : vector<8x192xf32> -> vector<8x192xf32>
    %511 = arith.mulf %509, %510 : vector<8x192xf32>
    %cst_230 = arith.constant 2.000000e+00 : f32
    %512 = vector.broadcast %cst_230 : f32 to vector<8x192xf32>
    %513 = arith.subf %512, %511 : vector<8x192xf32>
    %514 = arith.mulf %510, %513 : vector<8x192xf32>
    %515 = vector.extract_strided_slice %514 {offsets = [0, 0], sizes = [8, 64], strides = [1, 1]} : vector<8x192xf32> to vector<8x64xf32>
    %516 = vector.extract_strided_slice %514 {offsets = [0, 64], sizes = [8, 64], strides = [1, 1]} : vector<8x192xf32> to vector<8x64xf32>
    %517 = vector.extract_strided_slice %514 {offsets = [0, 128], sizes = [8, 64], strides = [1, 1]} : vector<8x192xf32> to vector<8x64xf32>
    %518 = vector.extract_strided_slice %503 {offsets = [0, 192], sizes = [8, 64], strides = [1, 1]} : vector<8x256xf32> to vector<8x64xf32>
    %519 = math.tanh %518 : vector<8x64xf32>
    %520 = arith.mulf %516, %499 : vector<8x64xf32>
    %521 = arith.mulf %515, %519 : vector<8x64xf32>
    %522 = arith.addf %520, %521 : vector<8x64xf32>
    %523 = math.tanh %522 : vector<8x64xf32>
    %524 = arith.mulf %517, %523 : vector<8x64xf32>
    %525 = vector.broadcast %455 : vector<8x1xf32> to vector<8x64xf32>
    %526 = arith.mulf %524, %525 : vector<8x64xf32>
    %c1_231 = arith.constant 1 : index
    %c0_232 = arith.constant 0 : index
    %c0_233 = arith.constant 0 : index
    %527 = vector.load %arg8[%c1_231, %c0_232, %c0_233] : memref<2x8x64xf32, #tpu.memory_space<vmem>>, vector<1x8x64xf32>
    %528 = vector.shape_cast %527 : vector<1x8x64xf32> to vector<8x64xf32>
    %529 = vector.shape_cast %526 : vector<8x64xf32> to vector<1x8x64xf32>
    tpu.vector_store %arg8[%c1_231, %c0_232, %c0_233], %529 {strides = array<i32>} : memref<2x8x64xf32, #tpu.memory_space<vmem>>, vector<1x8x64xf32>,
    %530 = vector.broadcast %455 : vector<8x1xf32> to vector<8x64xf32>
    %531 = arith.mulf %522, %530 : vector<8x64xf32>
    %c1_234 = arith.constant 1 : index
    %c0_235 = arith.constant 0 : index
    %c0_236 = arith.constant 0 : index
    %532 = vector.load %arg9[%c1_234, %c0_235, %c0_236] : memref<2x8x64xf32, #tpu.memory_space<vmem>>, vector<1x8x64xf32>
    %533 = vector.shape_cast %532 : vector<1x8x64xf32> to vector<8x64xf32>
    %534 = vector.shape_cast %531 : vector<8x64xf32> to vector<1x8x64xf32>
    tpu.vector_store %arg9[%c1_234, %c0_235, %c0_236], %534 {strides = array<i32>} : memref<2x8x64xf32, #tpu.memory_space<vmem>>, vector<1x8x64xf32>,
    %535 = tpu.concatenate %485, %524 in 1 : vector<8x64xf32>, vector<8x64xf32> -> vector<8x128xf32>
    %536 = arith.index_cast %c5_i32 : i32 to index
    %c0_237 = arith.constant 0 : index
    %c0_238 = arith.constant 0 : index
    %537 = vector.load %arg7[%536, %c0_237, %c0_238] : memref<8x8x128xf32, #tpu.memory_space<vmem>>, vector<1x8x128xf32>
    %538 = vector.shape_cast %537 : vector<1x8x128xf32> to vector<8x128xf32>
    %539 = vector.shape_cast %535 : vector<8x128xf32> to vector<1x8x128xf32>
    tpu.vector_store %arg7[%536, %c0_237, %c0_238], %539 {strides = array<i32>} : memref<8x8x128xf32, #tpu.memory_space<vmem>>, vector<1x8x128xf32>,
    %c6_i32 = arith.constant 6 : i32
    %540 = arith.index_cast %c6_i32 : i32 to index
    %c0_239 = arith.constant 0 : index
    %c0_240 = arith.constant 0 : index
    %541 = vector.load %arg3[%540, %c0_239, %c0_240] : memref<8x8x1xf32, #tpu.memory_space<vmem>>, vector<1x8x1xf32>
    %542 = vector.shape_cast %541 : vector<1x8x1xf32> to vector<8x1xf32>
    %cst_241 = arith.constant 1.000000e+00 : f32
    %543 = vector.broadcast %cst_241 : f32 to vector<8x1xf32>
    %544 = arith.subf %543, %542 : vector<8x1xf32>
    %c0_242 = arith.constant 0 : index
    %c0_243 = arith.constant 0 : index
    %c0_244 = arith.constant 0 : index
    %545 = vector.load %arg8[%c0_242, %c0_243, %c0_244] : memref<2x8x64xf32, #tpu.memory_space<vmem>>, vector<1x8x64xf32>
    %546 = vector.shape_cast %545 : vector<1x8x64xf32> to vector<8x64xf32>
    %c0_245 = arith.constant 0 : index
    %c0_246 = arith.constant 0 : index
    %c0_247 = arith.constant 0 : index
    %547 = vector.load %arg9[%c0_245, %c0_246, %c0_247] : memref<2x8x64xf32, #tpu.memory_space<vmem>>, vector<1x8x64xf32>
    %548 = vector.shape_cast %547 : vector<1x8x64xf32> to vector<8x64xf32>
    %549 = arith.index_cast %c6_i32 : i32 to index
    %c0_248 = arith.constant 0 : index
    %c0_249 = arith.constant 0 : index
    %550 = vector.load %arg2[%549, %c0_248, %c0_249] : memref<8x8x256xf32, #tpu.memory_space<vmem>>, vector<1x8x256xf32>
    %551 = vector.shape_cast %550 : vector<1x8x256xf32> to vector<8x256xf32>
    %cst_250 = arith.constant dense<0.000000e+00> : vector<8x256xf32>
    %552 = tpu.matmul %546, %3, %cst_250 {dimension_numbers = #tpu.dot_dimension_numbers<[1], [0], [0], [1], [0, 0, 1, 1], [], []>} : vector<8x64xf32>, vector<64x256xf32>, vector<8x256xf32> -> vector<8x256xf32>
    %553 = arith.addf %551, %552 : vector<8x256xf32>
    %554 = vector.extract_strided_slice %553 {offsets = [0, 0], sizes = [8, 192], strides = [1, 1]} : vector<8x256xf32> to vector<8x192xf32>
    %cst_251 = arith.constant 0.000000e+00 : f32
    %555 = vector.broadcast %cst_251 : f32 to vector<8x192xf32>
    %556 = arith.subf %555, %554 : vector<8x192xf32>
    %557 = math.exp %556 : vector<8x192xf32>
    %cst_252 = arith.constant 1.000000e+00 : f32
    %558 = vector.broadcast %cst_252 : f32 to vector<8x192xf32>
    %559 = arith.addf %558, %557 : vector<8x192xf32>
    %560 = tpu.reciprocal %559 {approx = true} : vector<8x192xf32> -> vector<8x192xf32>
    %561 = arith.mulf %559, %560 : vector<8x192xf32>
    %cst_253 = arith.constant 2.000000e+00 : f32
    %562 = vector.broadcast %cst_253 : f32 to vector<8x192xf32>
    %563 = arith.subf %562, %561 : vector<8x192xf32>
    %564 = arith.mulf %560, %563 : vector<8x192xf32>
    %565 = vector.extract_strided_slice %564 {offsets = [0, 0], sizes = [8, 64], strides = [1, 1]} : vector<8x192xf32> to vector<8x64xf32>
    %566 = vector.extract_strided_slice %564 {offsets = [0, 64], sizes = [8, 64], strides = [1, 1]} : vector<8x192xf32> to vector<8x64xf32>
    %567 = vector.extract_strided_slice %564 {offsets = [0, 128], sizes = [8, 64], strides = [1, 1]} : vector<8x192xf32> to vector<8x64xf32>
    %568 = vector.extract_strided_slice %553 {offsets = [0, 192], sizes = [8, 64], strides = [1, 1]} : vector<8x256xf32> to vector<8x64xf32>
    %569 = math.tanh %568 : vector<8x64xf32>
    %570 = arith.mulf %566, %548 : vector<8x64xf32>
    %571 = arith.mulf %565, %569 : vector<8x64xf32>
    %572 = arith.addf %570, %571 : vector<8x64xf32>
    %573 = math.tanh %572 : vector<8x64xf32>
    %574 = arith.mulf %567, %573 : vector<8x64xf32>
    %575 = vector.broadcast %544 : vector<8x1xf32> to vector<8x64xf32>
    %576 = arith.mulf %574, %575 : vector<8x64xf32>
    %c0_254 = arith.constant 0 : index
    %c0_255 = arith.constant 0 : index
    %c0_256 = arith.constant 0 : index
    %577 = vector.load %arg8[%c0_254, %c0_255, %c0_256] : memref<2x8x64xf32, #tpu.memory_space<vmem>>, vector<1x8x64xf32>
    %578 = vector.shape_cast %577 : vector<1x8x64xf32> to vector<8x64xf32>
    %579 = vector.shape_cast %576 : vector<8x64xf32> to vector<1x8x64xf32>
    tpu.vector_store %arg8[%c0_254, %c0_255, %c0_256], %579 {strides = array<i32>} : memref<2x8x64xf32, #tpu.memory_space<vmem>>, vector<1x8x64xf32>,
    %580 = vector.broadcast %544 : vector<8x1xf32> to vector<8x64xf32>
    %581 = arith.mulf %572, %580 : vector<8x64xf32>
    %c0_257 = arith.constant 0 : index
    %c0_258 = arith.constant 0 : index
    %c0_259 = arith.constant 0 : index
    %582 = vector.load %arg9[%c0_257, %c0_258, %c0_259] : memref<2x8x64xf32, #tpu.memory_space<vmem>>, vector<1x8x64xf32>
    %583 = vector.shape_cast %582 : vector<1x8x64xf32> to vector<8x64xf32>
    %584 = vector.shape_cast %581 : vector<8x64xf32> to vector<1x8x64xf32>
    tpu.vector_store %arg9[%c0_257, %c0_258, %c0_259], %584 {strides = array<i32>} : memref<2x8x64xf32, #tpu.memory_space<vmem>>, vector<1x8x64xf32>,
    %c1_260 = arith.constant 1 : index
    %c0_261 = arith.constant 0 : index
    %c0_262 = arith.constant 0 : index
    %585 = vector.load %arg8[%c1_260, %c0_261, %c0_262] : memref<2x8x64xf32, #tpu.memory_space<vmem>>, vector<1x8x64xf32>
    %586 = vector.shape_cast %585 : vector<1x8x64xf32> to vector<8x64xf32>
    %c1_263 = arith.constant 1 : index
    %c0_264 = arith.constant 0 : index
    %c0_265 = arith.constant 0 : index
    %587 = vector.load %arg9[%c1_263, %c0_264, %c0_265] : memref<2x8x64xf32, #tpu.memory_space<vmem>>, vector<1x8x64xf32>
    %588 = vector.shape_cast %587 : vector<1x8x64xf32> to vector<8x64xf32>
    %589 = tpu.concatenate %574, %586 in 1 : vector<8x64xf32>, vector<8x64xf32> -> vector<8x128xf32>
    %cst_266 = arith.constant dense<0.000000e+00> : vector<8x256xf32>
    %590 = tpu.matmul %589, %4, %cst_266 {dimension_numbers = #tpu.dot_dimension_numbers<[1], [0], [0], [1], [0, 0, 1, 1], [], []>} : vector<8x128xf32>, vector<128x256xf32>, vector<8x256xf32> -> vector<8x256xf32>
    %591 = vector.broadcast %5 : vector<1x256xf32> to vector<8x256xf32>
    %592 = arith.addf %590, %591 : vector<8x256xf32>
    %593 = vector.extract_strided_slice %592 {offsets = [0, 0], sizes = [8, 192], strides = [1, 1]} : vector<8x256xf32> to vector<8x192xf32>
    %cst_267 = arith.constant 0.000000e+00 : f32
    %594 = vector.broadcast %cst_267 : f32 to vector<8x192xf32>
    %595 = arith.subf %594, %593 : vector<8x192xf32>
    %596 = math.exp %595 : vector<8x192xf32>
    %cst_268 = arith.constant 1.000000e+00 : f32
    %597 = vector.broadcast %cst_268 : f32 to vector<8x192xf32>
    %598 = arith.addf %597, %596 : vector<8x192xf32>
    %599 = tpu.reciprocal %598 {approx = true} : vector<8x192xf32> -> vector<8x192xf32>
    %600 = arith.mulf %598, %599 : vector<8x192xf32>
    %cst_269 = arith.constant 2.000000e+00 : f32
    %601 = vector.broadcast %cst_269 : f32 to vector<8x192xf32>
    %602 = arith.subf %601, %600 : vector<8x192xf32>
    %603 = arith.mulf %599, %602 : vector<8x192xf32>
    %604 = vector.extract_strided_slice %603 {offsets = [0, 0], sizes = [8, 64], strides = [1, 1]} : vector<8x192xf32> to vector<8x64xf32>
    %605 = vector.extract_strided_slice %603 {offsets = [0, 64], sizes = [8, 64], strides = [1, 1]} : vector<8x192xf32> to vector<8x64xf32>
    %606 = vector.extract_strided_slice %603 {offsets = [0, 128], sizes = [8, 64], strides = [1, 1]} : vector<8x192xf32> to vector<8x64xf32>
    %607 = vector.extract_strided_slice %592 {offsets = [0, 192], sizes = [8, 64], strides = [1, 1]} : vector<8x256xf32> to vector<8x64xf32>
    %608 = math.tanh %607 : vector<8x64xf32>
    %609 = arith.mulf %605, %588 : vector<8x64xf32>
    %610 = arith.mulf %604, %608 : vector<8x64xf32>
    %611 = arith.addf %609, %610 : vector<8x64xf32>
    %612 = math.tanh %611 : vector<8x64xf32>
    %613 = arith.mulf %606, %612 : vector<8x64xf32>
    %614 = vector.broadcast %544 : vector<8x1xf32> to vector<8x64xf32>
    %615 = arith.mulf %613, %614 : vector<8x64xf32>
    %c1_270 = arith.constant 1 : index
    %c0_271 = arith.constant 0 : index
    %c0_272 = arith.constant 0 : index
    %616 = vector.load %arg8[%c1_270, %c0_271, %c0_272] : memref<2x8x64xf32, #tpu.memory_space<vmem>>, vector<1x8x64xf32>
    %617 = vector.shape_cast %616 : vector<1x8x64xf32> to vector<8x64xf32>
    %618 = vector.shape_cast %615 : vector<8x64xf32> to vector<1x8x64xf32>
    tpu.vector_store %arg8[%c1_270, %c0_271, %c0_272], %618 {strides = array<i32>} : memref<2x8x64xf32, #tpu.memory_space<vmem>>, vector<1x8x64xf32>,
    %619 = vector.broadcast %544 : vector<8x1xf32> to vector<8x64xf32>
    %620 = arith.mulf %611, %619 : vector<8x64xf32>
    %c1_273 = arith.constant 1 : index
    %c0_274 = arith.constant 0 : index
    %c0_275 = arith.constant 0 : index
    %621 = vector.load %arg9[%c1_273, %c0_274, %c0_275] : memref<2x8x64xf32, #tpu.memory_space<vmem>>, vector<1x8x64xf32>
    %622 = vector.shape_cast %621 : vector<1x8x64xf32> to vector<8x64xf32>
    %623 = vector.shape_cast %620 : vector<8x64xf32> to vector<1x8x64xf32>
    tpu.vector_store %arg9[%c1_273, %c0_274, %c0_275], %623 {strides = array<i32>} : memref<2x8x64xf32, #tpu.memory_space<vmem>>, vector<1x8x64xf32>,
    %624 = tpu.concatenate %574, %613 in 1 : vector<8x64xf32>, vector<8x64xf32> -> vector<8x128xf32>
    %625 = arith.index_cast %c6_i32 : i32 to index
    %c0_276 = arith.constant 0 : index
    %c0_277 = arith.constant 0 : index
    %626 = vector.load %arg7[%625, %c0_276, %c0_277] : memref<8x8x128xf32, #tpu.memory_space<vmem>>, vector<1x8x128xf32>
    %627 = vector.shape_cast %626 : vector<1x8x128xf32> to vector<8x128xf32>
    %628 = vector.shape_cast %624 : vector<8x128xf32> to vector<1x8x128xf32>
    tpu.vector_store %arg7[%625, %c0_276, %c0_277], %628 {strides = array<i32>} : memref<8x8x128xf32, #tpu.memory_space<vmem>>, vector<1x8x128xf32>,
    %c7_i32 = arith.constant 7 : i32
    %629 = arith.index_cast %c7_i32 : i32 to index
    %c0_278 = arith.constant 0 : index
    %c0_279 = arith.constant 0 : index
    %630 = vector.load %arg3[%629, %c0_278, %c0_279] : memref<8x8x1xf32, #tpu.memory_space<vmem>>, vector<1x8x1xf32>
    %631 = vector.shape_cast %630 : vector<1x8x1xf32> to vector<8x1xf32>
    %cst_280 = arith.constant 1.000000e+00 : f32
    %632 = vector.broadcast %cst_280 : f32 to vector<8x1xf32>
    %633 = arith.subf %632, %631 : vector<8x1xf32>
    %c0_281 = arith.constant 0 : index
    %c0_282 = arith.constant 0 : index
    %c0_283 = arith.constant 0 : index
    %634 = vector.load %arg8[%c0_281, %c0_282, %c0_283] : memref<2x8x64xf32, #tpu.memory_space<vmem>>, vector<1x8x64xf32>
    %635 = vector.shape_cast %634 : vector<1x8x64xf32> to vector<8x64xf32>
    %c0_284 = arith.constant 0 : index
    %c0_285 = arith.constant 0 : index
    %c0_286 = arith.constant 0 : index
    %636 = vector.load %arg9[%c0_284, %c0_285, %c0_286] : memref<2x8x64xf32, #tpu.memory_space<vmem>>, vector<1x8x64xf32>
    %637 = vector.shape_cast %636 : vector<1x8x64xf32> to vector<8x64xf32>
    %638 = arith.index_cast %c7_i32 : i32 to index
    %c0_287 = arith.constant 0 : index
    %c0_288 = arith.constant 0 : index
    %639 = vector.load %arg2[%638, %c0_287, %c0_288] : memref<8x8x256xf32, #tpu.memory_space<vmem>>, vector<1x8x256xf32>
    %640 = vector.shape_cast %639 : vector<1x8x256xf32> to vector<8x256xf32>
    %cst_289 = arith.constant dense<0.000000e+00> : vector<8x256xf32>
    %641 = tpu.matmul %635, %3, %cst_289 {dimension_numbers = #tpu.dot_dimension_numbers<[1], [0], [0], [1], [0, 0, 1, 1], [], []>} : vector<8x64xf32>, vector<64x256xf32>, vector<8x256xf32> -> vector<8x256xf32>
    %642 = arith.addf %640, %641 : vector<8x256xf32>
    %643 = vector.extract_strided_slice %642 {offsets = [0, 0], sizes = [8, 192], strides = [1, 1]} : vector<8x256xf32> to vector<8x192xf32>
    %cst_290 = arith.constant 0.000000e+00 : f32
    %644 = vector.broadcast %cst_290 : f32 to vector<8x192xf32>
    %645 = arith.subf %644, %643 : vector<8x192xf32>
    %646 = math.exp %645 : vector<8x192xf32>
    %cst_291 = arith.constant 1.000000e+00 : f32
    %647 = vector.broadcast %cst_291 : f32 to vector<8x192xf32>
    %648 = arith.addf %647, %646 : vector<8x192xf32>
    %649 = tpu.reciprocal %648 {approx = true} : vector<8x192xf32> -> vector<8x192xf32>
    %650 = arith.mulf %648, %649 : vector<8x192xf32>
    %cst_292 = arith.constant 2.000000e+00 : f32
    %651 = vector.broadcast %cst_292 : f32 to vector<8x192xf32>
    %652 = arith.subf %651, %650 : vector<8x192xf32>
    %653 = arith.mulf %649, %652 : vector<8x192xf32>
    %654 = vector.extract_strided_slice %653 {offsets = [0, 0], sizes = [8, 64], strides = [1, 1]} : vector<8x192xf32> to vector<8x64xf32>
    %655 = vector.extract_strided_slice %653 {offsets = [0, 64], sizes = [8, 64], strides = [1, 1]} : vector<8x192xf32> to vector<8x64xf32>
    %656 = vector.extract_strided_slice %653 {offsets = [0, 128], sizes = [8, 64], strides = [1, 1]} : vector<8x192xf32> to vector<8x64xf32>
    %657 = vector.extract_strided_slice %642 {offsets = [0, 192], sizes = [8, 64], strides = [1, 1]} : vector<8x256xf32> to vector<8x64xf32>
    %658 = math.tanh %657 : vector<8x64xf32>
    %659 = arith.mulf %655, %637 : vector<8x64xf32>
    %660 = arith.mulf %654, %658 : vector<8x64xf32>
    %661 = arith.addf %659, %660 : vector<8x64xf32>
    %662 = math.tanh %661 : vector<8x64xf32>
    %663 = arith.mulf %656, %662 : vector<8x64xf32>
    %664 = vector.broadcast %633 : vector<8x1xf32> to vector<8x64xf32>
    %665 = arith.mulf %663, %664 : vector<8x64xf32>
    %c0_293 = arith.constant 0 : index
    %c0_294 = arith.constant 0 : index
    %c0_295 = arith.constant 0 : index
    %666 = vector.load %arg8[%c0_293, %c0_294, %c0_295] : memref<2x8x64xf32, #tpu.memory_space<vmem>>, vector<1x8x64xf32>
    %667 = vector.shape_cast %666 : vector<1x8x64xf32> to vector<8x64xf32>
    %668 = vector.shape_cast %665 : vector<8x64xf32> to vector<1x8x64xf32>
    tpu.vector_store %arg8[%c0_293, %c0_294, %c0_295], %668 {strides = array<i32>} : memref<2x8x64xf32, #tpu.memory_space<vmem>>, vector<1x8x64xf32>,
    %669 = vector.broadcast %633 : vector<8x1xf32> to vector<8x64xf32>
    %670 = arith.mulf %661, %669 : vector<8x64xf32>
    %c0_296 = arith.constant 0 : index
    %c0_297 = arith.constant 0 : index
    %c0_298 = arith.constant 0 : index
    %671 = vector.load %arg9[%c0_296, %c0_297, %c0_298] : memref<2x8x64xf32, #tpu.memory_space<vmem>>, vector<1x8x64xf32>
    %672 = vector.shape_cast %671 : vector<1x8x64xf32> to vector<8x64xf32>
    %673 = vector.shape_cast %670 : vector<8x64xf32> to vector<1x8x64xf32>
    tpu.vector_store %arg9[%c0_296, %c0_297, %c0_298], %673 {strides = array<i32>} : memref<2x8x64xf32, #tpu.memory_space<vmem>>, vector<1x8x64xf32>,
    %c1_299 = arith.constant 1 : index
    %c0_300 = arith.constant 0 : index
    %c0_301 = arith.constant 0 : index
    %674 = vector.load %arg8[%c1_299, %c0_300, %c0_301] : memref<2x8x64xf32, #tpu.memory_space<vmem>>, vector<1x8x64xf32>
    %675 = vector.shape_cast %674 : vector<1x8x64xf32> to vector<8x64xf32>
    %c1_302 = arith.constant 1 : index
    %c0_303 = arith.constant 0 : index
    %c0_304 = arith.constant 0 : index
    %676 = vector.load %arg9[%c1_302, %c0_303, %c0_304] : memref<2x8x64xf32, #tpu.memory_space<vmem>>, vector<1x8x64xf32>
    %677 = vector.shape_cast %676 : vector<1x8x64xf32> to vector<8x64xf32>
    %678 = tpu.concatenate %663, %675 in 1 : vector<8x64xf32>, vector<8x64xf32> -> vector<8x128xf32>
    %cst_305 = arith.constant dense<0.000000e+00> : vector<8x256xf32>
    %679 = tpu.matmul %678, %4, %cst_305 {dimension_numbers = #tpu.dot_dimension_numbers<[1], [0], [0], [1], [0, 0, 1, 1], [], []>} : vector<8x128xf32>, vector<128x256xf32>, vector<8x256xf32> -> vector<8x256xf32>
    %680 = vector.broadcast %5 : vector<1x256xf32> to vector<8x256xf32>
    %681 = arith.addf %679, %680 : vector<8x256xf32>
    %682 = vector.extract_strided_slice %681 {offsets = [0, 0], sizes = [8, 192], strides = [1, 1]} : vector<8x256xf32> to vector<8x192xf32>
    %cst_306 = arith.constant 0.000000e+00 : f32
    %683 = vector.broadcast %cst_306 : f32 to vector<8x192xf32>
    %684 = arith.subf %683, %682 : vector<8x192xf32>
    %685 = math.exp %684 : vector<8x192xf32>
    %cst_307 = arith.constant 1.000000e+00 : f32
    %686 = vector.broadcast %cst_307 : f32 to vector<8x192xf32>
    %687 = arith.addf %686, %685 : vector<8x192xf32>
    %688 = tpu.reciprocal %687 {approx = true} : vector<8x192xf32> -> vector<8x192xf32>
    %689 = arith.mulf %687, %688 : vector<8x192xf32>
    %cst_308 = arith.constant 2.000000e+00 : f32
    %690 = vector.broadcast %cst_308 : f32 to vector<8x192xf32>
    %691 = arith.subf %690, %689 : vector<8x192xf32>
    %692 = arith.mulf %688, %691 : vector<8x192xf32>
    %693 = vector.extract_strided_slice %692 {offsets = [0, 0], sizes = [8, 64], strides = [1, 1]} : vector<8x192xf32> to vector<8x64xf32>
    %694 = vector.extract_strided_slice %692 {offsets = [0, 64], sizes = [8, 64], strides = [1, 1]} : vector<8x192xf32> to vector<8x64xf32>
    %695 = vector.extract_strided_slice %692 {offsets = [0, 128], sizes = [8, 64], strides = [1, 1]} : vector<8x192xf32> to vector<8x64xf32>
    %696 = vector.extract_strided_slice %681 {offsets = [0, 192], sizes = [8, 64], strides = [1, 1]} : vector<8x256xf32> to vector<8x64xf32>
    %697 = math.tanh %696 : vector<8x64xf32>
    %698 = arith.mulf %694, %677 : vector<8x64xf32>
    %699 = arith.mulf %693, %697 : vector<8x64xf32>
    %700 = arith.addf %698, %699 : vector<8x64xf32>
    %701 = math.tanh %700 : vector<8x64xf32>
    %702 = arith.mulf %695, %701 : vector<8x64xf32>
    %703 = vector.broadcast %633 : vector<8x1xf32> to vector<8x64xf32>
    %704 = arith.mulf %702, %703 : vector<8x64xf32>
    %c1_309 = arith.constant 1 : index
    %c0_310 = arith.constant 0 : index
    %c0_311 = arith.constant 0 : index
    %705 = vector.load %arg8[%c1_309, %c0_310, %c0_311] : memref<2x8x64xf32, #tpu.memory_space<vmem>>, vector<1x8x64xf32>
    %706 = vector.shape_cast %705 : vector<1x8x64xf32> to vector<8x64xf32>
    %707 = vector.shape_cast %704 : vector<8x64xf32> to vector<1x8x64xf32>
    tpu.vector_store %arg8[%c1_309, %c0_310, %c0_311], %707 {strides = array<i32>} : memref<2x8x64xf32, #tpu.memory_space<vmem>>, vector<1x8x64xf32>,
    %708 = vector.broadcast %633 : vector<8x1xf32> to vector<8x64xf32>
    %709 = arith.mulf %700, %708 : vector<8x64xf32>
    %c1_312 = arith.constant 1 : index
    %c0_313 = arith.constant 0 : index
    %c0_314 = arith.constant 0 : index
    %710 = vector.load %arg9[%c1_312, %c0_313, %c0_314] : memref<2x8x64xf32, #tpu.memory_space<vmem>>, vector<1x8x64xf32>
    %711 = vector.shape_cast %710 : vector<1x8x64xf32> to vector<8x64xf32>
    %712 = vector.shape_cast %709 : vector<8x64xf32> to vector<1x8x64xf32>
    tpu.vector_store %arg9[%c1_312, %c0_313, %c0_314], %712 {strides = array<i32>} : memref<2x8x64xf32, #tpu.memory_space<vmem>>, vector<1x8x64xf32>,
    %713 = tpu.concatenate %663, %702 in 1 : vector<8x64xf32>, vector<8x64xf32> -> vector<8x128xf32>
    %714 = arith.index_cast %c7_i32 : i32 to index
    %c0_315 = arith.constant 0 : index
    %c0_316 = arith.constant 0 : index
    %715 = vector.load %arg7[%714, %c0_315, %c0_316] : memref<8x8x128xf32, #tpu.memory_space<vmem>>, vector<1x8x128xf32>
    %716 = vector.shape_cast %715 : vector<1x8x128xf32> to vector<8x128xf32>
    %717 = vector.shape_cast %713 : vector<8x128xf32> to vector<1x8x128xf32>
    tpu.vector_store %arg7[%714, %c0_315, %c0_316], %717 {strides = array<i32>} : memref<8x8x128xf32, #tpu.memory_space<vmem>>, vector<1x8x128xf32>,
    %c8_i32 = arith.constant 8 : i32
    return
  }
  func.func @transform_0(%arg0: i32, %arg1: i32) -> (i32, i32, i32) {
    %c0_i32 = arith.constant 0 : i32
    %c0_i32_0 = arith.constant 0 : i32
    return %arg1, %arg0, %c0_i32 : i32, i32, i32
  }
  func.func @transform_1(%arg0: i32, %arg1: i32) -> (i32, i32, i32) {
    %c0_i32 = arith.constant 0 : i32
    %c0_i32_0 = arith.constant 0 : i32
    return %arg1, %arg0, %c0_i32 : i32, i32, i32
  }
  func.func @transform_2(%arg0: i32, %arg1: i32) -> (i32, i32) {
    %c0_i32 = arith.constant 0 : i32
    %c0_i32_0 = arith.constant 0 : i32
    %c0_i32_1 = arith.constant 0 : i32
    return %c0_i32, %c0_i32_0 : i32, i32
  }
  func.func @transform_3(%arg0: i32, %arg1: i32) -> (i32, i32) {
    %c0_i32 = arith.constant 0 : i32
    %c0_i32_0 = arith.constant 0 : i32
    %c0_i32_1 = arith.constant 0 : i32
    return %c0_i32, %c0_i32_0 : i32, i32
  }
  func.func @transform_4(%arg0: i32, %arg1: i32) -> (i32, i32) {
    %c0_i32 = arith.constant 0 : i32
    %c0_i32_0 = arith.constant 0 : i32
    %c0_i32_1 = arith.constant 0 : i32
    return %c0_i32, %c0_i32_0 : i32, i32
  }
  func.func @transform_5(%arg0: i32, %arg1: i32) -> (i32, i32, i32) {
    %c0_i32 = arith.constant 0 : i32
    %c0_i32_0 = arith.constant 0 : i32
    return %arg1, %arg0, %c0_i32 : i32, i32, i32
  }
}

</mosaic_0001>

<bundles_post_ra>
// kernel: tpu_custom_call.1
= control target key start
LH: loop header
LB: loop body
LE: loop exit
PB: predicated region body
PF: predicated region fallthrough
CT: control target
= control target key end

     0   :  { %s4518_s0 = inlined_call_operand.hbm [shape: f32[8,16,256], index: 0, kind: input, shape index: {}]   ;;  %s4519_s1 = inlined_call_operand.vmem [shape: f32[8,16,1], index: 1, kind: input, shape index: {}]   ;;  %s4520_s2 = inlined_call_operand.vmem [shape: f32[64,256], index: 2, kind: input, shape index: {}]   ;;  %s4521_s3 = inlined_call_operand.hbm [shape: f32[128,256], index: 3, kind: input, shape index: {}]   ;;  %s4522_s4 = inlined_call_operand.vmem [shape: f32[1,256], index: 4, kind: input, shape index: {}]   ;;  %s4523_s5 = inlined_call_operand.hbm [shape: f32[8,16,128], index: 5, kind: output, shape index: {}]  }
   0x1   :  { %4530 = sst [smem:[#allocation14_spill]] %s4518_s0 }
   0x2   :  { %4531 = sst [smem:[#allocation15_spill]] %s4521_s3 }
   0x3   :  { %10 = vsyncpa [#allocation5], 0 }
   0x4   :  { %12 = vsyncpa [#allocation5 + $0x1], 0 }
   0x5   :  { %13 = vsyncpa [#allocation9], 0 }
   0x6   :  { %14 = vsyncpa [#allocation6], 0 }
   0x7   :  { %16 = vsyncpa [#allocation6 + $0x1], 0  ;;  %s3597_s18 = smov 0   ;;  %s3599_s19 = smov 0  }
   0x8   :  { %s3601_s20 = smov 0   ;;  %s3603_s21 = smov 0  }
   0x9   :  { %s3605_s22 = smov 0   ;;  %s3607_s23 = smov 0  }
   0xa LB: > { %s2696_s24 = sadd.s32 4294967295, %s3551_s23   ;;  %s2697_s25 = sadd.s32 4294967294, %s3551_s23   ;;  %s3551_s23 = sphi %s3607_s23, %s22_s23   ;;  %s3547_s22 = sphi %s3605_s22, %s4551_s22   ;;  %s3543_s21 = sphi %s3603_s21, %s4550_s21   ;;  %s3539_s20 = sphi %s3601_s20, %s4549_s20   ;;  %s3535_s19 = sphi %s3599_s19, %s4548_s19   ;;  %s3531_s18 = sphi %s3597_s18, %s4547_s18  }
   0xb   : > { %s34_s26 = sadd.s32 1, %s3547_s22  ;;  %s43_s27 = sadd.s32 1, %s3539_s20 }
   0xc   : > { %p36_p0 = scmp.ge.s32.totalorder %s34_s26, 2  ;;  %p50_p1 = scmp.ne.s32.totalorder %s3539_s20, %s3535_s19 }
   0xd   : > { %p51_p2 = scmp.eq.s32.totalorder %s3551_s23, 0  ;;  %p56_p3 = scmp.ne.s32.totalorder %s3535_s19, %s3531_s18 }
   0xe   : > { %s4553_s26 = smov (%p36_p0, %s34_s26), 0  ;;  %p3642_p5 = scmp.eq.s32.totalorder %s2696_s24, 0 }
   0xf   : > { %p3638_p4 = por %p51_p2, %p50_p1  ;;  %s39_s30 = ssub.s32 %s3547_s22, %s4553_s26 }
  0x10   : > { %s4533_s29 = scalar_select %p3642_p5, 1, 0 }
  0x11   : > { %s4532_s28 = scalar_select %p3638_p4, 1, 0 }
  0x12   : > { %p173_p6 = scmp.eq.s32.totalorder %s2696_s24, 1  ;;  %p41_p7 = scmp.eq.s32.totalorder %s39_s30, 0 }
  0x13   : > { %p3650_p8 = por %p3642_p5, %p56_p3  ;;  %p179_p10 = scmp.eq.s32.totalorder %s2697_s25, 1 }
  0x14   : > { %p3654_p9 = por %p173_p6, %p50_p1  ;;  %p2698_p12 = scmp.ge.s32.totalorder %s3551_s23, 1 }
  0x15   : > { %s4534_s6 = scalar_select %p3650_p8, 1, 0 }
  0x16   : > { %s4535_s7 = scalar_select %p3654_p9, 1, 0 }
  0x17   : > { %s3659_s8 = scalar_select %p41_p7, %s3539_s20, %s43_s27  }
  0x18   : > { %p3661_p11 = por %p179_p10, %p56_p3  ;;  %p186_p13 = scmp.lt.s32.totalorder %s3551_s23, 3 }
  0x19   : > { %s3553_s11 = smov [#allocation8]   ;;  %s4539_s3 = sld [smem:[#allocation15_spill]] }
  0x1a   : > { %s4536_s9 = scalar_select %p3661_p11, 1, 0 }
  0x1b   : > { %p3667_p0 = pnand %p2698_p12, %p186_p13  ;;  %s201_s12 = sshll.u32 %s3553_s11, 4  ;;  %s202_s12 = int_to_ptr.vmem [resolvable:$true] %s201_s12 }
  0x1d   : > { %s4537_s10 = scalar_select %p3667_p0, 1, 0 }
  0x1e   : > { %p3144_p1 = pneg %p3667_p0 }
  0x1f   : > { %s3409_s16 = scalar_lea.hbm %s4539_s3, 4096 }
  0x20   : > { %p3675_p2 = pnand %p3144_p1, %p3642_p5  ;;  %p3410_p3 = scmp.ne.s32.totalorder %s4539_s3, %s3409_s16 }
  0x21   : > { %p3416_p12 = scmp.lt.u32.totalorder %s3409_s16, %s4539_s3 }
  0x22   : > { %p3411_p6 = pneg %p3675_p2 }
  0x24   : > { %p3412_p7 = pnand %p3411_p6, %p3410_p3 }
  0x26   : > { %p3413_p10 = pneg %p3412_p7 }
  0x28   : > { %p3418_p13 = pnand %p3416_p12, %p3413_p10 }
  0x2a   : > { %3421 = shalt.err (!%p3418_p13)
}
  0x2b   : > { %s3422_s30 = scalar_lea.vmem %s202_s12, 4096  ;;  %p3430_p5 = scmp.lt.s32.totalorder %s202_s12, %s202_s12 }
  0x2c   : > { %p3423_p1 = scmp.ne.s32.totalorder %s202_s12, %s3422_s30  ;;  %p3431_p8 = scmp.lt.s32.totalorder %s3422_s30, %s3422_s30 }
  0x2e   : > { %p3425_p11 = pnand %p3423_p1, %p3411_p6  ;;  %p3432_p0 = por %p3431_p8, %p3430_p5 }
  0x30   : > { %p3426_p9 = pneg %p3425_p11 }
  0x32   : > { %p3433_p4 = pnand %p3432_p0, %p3426_p9 }
  0x34   : > { %3436 = shalt.err (!%p3433_p4)
}
  0x35   : > { %s3554_s11 = smov 256   ;;  %s3555_s14 = smov 16  }
  0x36   : > { %3147 = dma.hbm_to_vmem [thread:$0]  (!%p3675_p2), %s4539_s3, 4096, %s202_s12, [#allocation9], %s3554_s11, %s3554_s11, %s3555_s14  }
  0x37   : > { %p2700_p3 = scmp.ge.s32.totalorder %s3551_s23, 2 }
  0x38   : > { %s3699_s16 = sand.u32 (!%p2700_p3), 1, %s3539_s20   ;;  %s2751_s24 = sshll.u32 (!%p2700_p3), %s3547_s22, 8 }
  0x39   : > { %214 = sbr.rel (%p2700_p3) target bundleno = 95 (0x5f), region = 28  ;;  %s2701_s25 = sshll.u32 (!%p2700_p3), %s3699_s16, 7 }
  0x3a   : > { %s4540_s0 = sld [smem:[#allocation14_spill]] (!%p2700_p3)  ;;  %s222_s12 = scalar_lea.vmem (!%p2700_p3), [#allocation4], %s2701_s25 }
  0x3b   : > { %s232_s11 = sshll.u32 (!%p2700_p3), %s222_s12, 4  ;;  %s219_s14 = scalar_lea.sflag (!%p2700_p3), [#allocation5], %s3699_s16  ;;  %s3708_s11 = int_to_ptr.vmem [resolvable:$true] %s232_s11 }
  0x3c   : > { %p4541_p5 = scmp.ne.s32.totalorder (!%p2700_p3), %s4532_s28, 0 }
  0x40   : > { %s3706_s30 = scalar_lea.hbm %s4540_s0, %s2751_s24  ;;  %s3441_s27 = scalar_lea.hbm %s4540_s0, 4096 }
  0x41   : > { %s3437_s15 = scalar_lea.hbm %s3706_s30, 2048  ;;  %p3442_p11 = scmp.lt.u32.totalorder %s3706_s30, %s4540_s0 }
  0x42   : > { %p3438_p4 = scmp.ne.s32.totalorder %s3706_s30, %s3437_s15  ;;  %p3443_p0 = scmp.lt.u32.totalorder %s3441_s27, %s3437_s15 }
  0x43   : > { %p3445_p6 = scmp.lt.u32.totalorder %s3437_s15, %s3706_s30 }
  0x44   : > { %p3439_p8 = pnand %p3438_p4, %p4541_p5  ;;  %p3444_p2 = por %p3443_p0, %p3442_p11 }
  0x46   : > { %p3440_p9 = pneg %p3439_p8  ;;  %p3446_p7 = por %p3445_p6, %p3444_p2 }
  0x48   : > { %p3447_p10 = pnand %p3446_p7, %p3440_p9 }
  0x4a   : > { %3450 = shalt.err (!%p3447_p10)
}
  0x4b   : > { %s3451_s25 = scalar_lea.vmem %s3708_s11, 2048  ;;  %s3556_s3 = smov [#allocation4]  }
  0x4c   : > { %p3452_p12 = scmp.ne.s32.totalorder %s3708_s11, %s3451_s25  ;;  %s3455_s12 = sshll.u32 %s3556_s3, 4  ;;  %s3456_s12 = int_to_ptr.vmem [resolvable:$false] %s3455_s12 }
  0x4d   : > { %s3457_s17 = scalar_lea.vmem %s3456_s12, 4096  ;;  %p3458_p4 = scmp.lt.s32.totalorder %s3708_s11, %s3456_s12 }
  0x4e   : > { %p3453_p13 = pnand %p3452_p12, %p4541_p5  ;;  %p3459_p8 = scmp.lt.s32.totalorder %s3457_s17, %s3451_s25 }
  0x50   : > { %p3454_p1 = pneg %p3453_p13  ;;  %p3460_p11 = por %p3459_p8, %p3458_p4 }
  0x52   : > { %p3461_p0 = pnand %p3460_p11, %p3454_p1 }
  0x54   : > { %3464 = shalt.err (!%p3461_p0)
}
  0x55   : > { %s3557_s15 = smov 512   ;;  %s3558_s27 = smov 256  }
  0x56   : > { %s3559_s24 = smov 16   ;;  %241 = sbr.rel (!%p4541_p5) target bundleno = 95 (0x5f), region = 36 }
  0x57   : > { %3138 = dma.hbm_to_vmem [thread:$0]  (%p4541_p5), %s3706_s30, 2048, %s3708_s11, %s219_s14, %s3557_s15, %s3558_s27, %s3559_s24  }
  0x58   : > { %s2704_s13 = sshll.u32 (%p4541_p5), %s3699_s16, 6  ;;  %s2705_s25 = sshll.u32 (%p4541_p5), %s3547_s22, 3 }
  0x59   : > { %s250_s17 = scalar_lea.vmem (%p4541_p5), %s4519_s1, %s2705_s25  ;;  %s245_s0 = scalar_lea.vmem (%p4541_p5), [#allocation7], %s2704_s13 }
  0x5a   : > { %v292_v0 = vld [vmem:[%s250_s17] sm:$0xff] (%p4541_p5)  ;;  %v294_v1 = vld [vmem:[%s250_s17 + $0x10] sm:$0xff] (%p4541_p5) }
  0x5b   : > { %v296_v2 = vld [vmem:[%s250_s17 + $0x20] sm:$0xff] (%p4541_p5)  ;;  %293 = vst [vmem:[%s245_s0] sm:$0xff] (%p4541_p5), %v292_v0  ;;  %295 = vst [vmem:[%s245_s0 + $0x8] sm:$0xff] (%p4541_p5), %v294_v1  ;;  %v298_v3 = vld [vmem:[%s250_s17 + $0x30] sm:$0xff] (%p4541_p5) }
  0x5c   : > { %297 = vst [vmem:[%s245_s0 + $0x10] sm:$0xff] (%p4541_p5), %v296_v2  ;;  %v300_v4 = vld [vmem:[%s250_s17 + $0x40] sm:$0xff] (%p4541_p5)  ;;  %v302_v5 = vld [vmem:[%s250_s17 + $0x50] sm:$0xff] (%p4541_p5)  ;;  %299 = vst [vmem:[%s245_s0 + $0x18] sm:$0xff] (%p4541_p5), %v298_v3 }
  0x5d   : > { %301 = vst [vmem:[%s245_s0 + $0x20] sm:$0xff] %v300_v4  ;;  %303 = vst [vmem:[%s245_s0 + $0x28] sm:$0xff] %v302_v5  ;;  %v304_v6 = vld [vmem:[%s250_s17 + $0x60] sm:$0xff]  ;;  %v306_v7 = vld [vmem:[%s250_s17 + $0x70] sm:$0xff] }
  0x5e   : > { %305 = vst [vmem:[%s245_s0 + $0x30] sm:$0xff] %v304_v6  ;;  %307 = vst [vmem:[%s245_s0 + $0x38] sm:$0xff] %v306_v7 }
  0x5f PF: > { %p4542_p5 = scmp.ne.s32.totalorder %s4537_s10, 0 }
  0x60   : > { %s3744_s28 = sand.u32 (!%p4542_p5), 1, %s3535_s19   ;;  %p4543_p9 = scmp.ne.s32.totalorder (!%p4542_p5), %s4534_s6, 0 }
  0x61   : > { %316 = sbr.rel (%p4542_p5) target bundleno = 6434 (0x1922), region = 74  ;;  %s2707_s16 = sshll.u32 (!%p4542_p5), %s3744_s28, 7 }
  0x62   : > { %s319_s30 = scalar_lea.sflag (!%p4542_p5), [#allocation5], %s3744_s28  ;;  %s3748_s11 = scalar_lea.vmem (!%p4542_p5), [#allocation4], %s2707_s16 }
  0x68   : > { %3518 = dma.done.wait (%p4543_p9), %s319_s30, 2048  }
  0x69   : > { %3520 = vsyncadd (%p4543_p9), %s319_s30, 4294965248  ;;  %s2708_s0 = sshll.u32 %s3744_s28, 6  ;;  %p4544_p2 = scmp.ne.s32.totalorder %s4533_s29, 0 }
  0x6a   : > { %s3757_s10 = scalar_lea.vmem [#allocation7], %s2708_s0 }
  0x6b   : > { %3522 = dma.done.wait (%p4544_p2), [#allocation9], 4096  }
  0x6c   : > { %3524 = vsyncadd (%p4544_p2), [#allocation9], 4294963200  ;;  %vm371_vm0 = vcmask 523264   ;;  %v3560_v8 = vmov 0.0   ;;  %v377_v9 = vld [vmem:[%s4520_s2 + $0x8] sm:$0xff]  ;;  %v379_v10 = vld [vmem:[%s4520_s2 + $0x18] sm:$0xff] }
  0x6d   : > { %499 = vmatprep.mubr.f32.mxu1 %v3560_v8  ;;  %372 = vst.msk [vmem:[#allocation2] sm:$0xff] %vm371_vm0, %v3560_v8  ;;  %373 = vst.msk [vmem:[#allocation2 + $0x8] sm:$0xff] %vm371_vm0, %v3560_v8  ;;  %777 = vmatprep.mubr.f32.mxu0 %v3560_v8  ;;  %v376_v11 = vld [vmem:[%s4520_s2] sm:$0xff]  ;;  %v3782_v12 = vpack.c.bf16 %v379_v10, %v377_v9  ;;  %v378_v13 = vld [vmem:[%s4520_s2 + $0x10] sm:$0xff]  ;;  %s3561_s13 = smov 64   ;;  %v3562_v53 = vmov 0  }
  0x6e   : > { %374 = vst.msk [vmem:[#allocation3] sm:$0xff] %vm371_vm0, %v3560_v8  ;;  %375 = vst.msk [vmem:[#allocation3 + $0x8] sm:$0xff] %vm371_vm0, %v3560_v8  ;;  %v381_v14 = vld [vmem:[%s4520_s2 + $0x28] sm:$0xff]  ;;  %v383_v15 = vld [vmem:[%s4520_s2 + $0x38] sm:$0xff]  ;;  %v3793_v16 = vpack.c.bf16 %v378_v13, %v376_v11  ;;  %3215 = vset.pattern.permute.xlu1 %v3562_v53  ;;  %3216 = vset.pattern.permute.xlu0 %v3562_v53  ;;  %s2565_s30 = scalar_lea.sflag [#allocation6], %s3744_s28  ;;  %p4545_p7 = scmp.ne.s32.totalorder %s4535_s7, 0 }
  0x6f   : > { %v3795_v17 = vpack.c.bf16 %v383_v15, %v381_v14  ;;  %v380_v18 = vld [vmem:[%s4520_s2 + $0x20] sm:$0xff]  ;;  %v382_v19 = vld [vmem:[%s4520_s2 + $0x30] sm:$0xff]  ;;  %v385_v20 = vld [vmem:[%s4520_s2 + $0x48] sm:$0xff]  ;;  %2753 = vmatprep.subr.bf16.mxu1 %v3782_v12  ;;  %2801 = vmatprep.subr.bf16.mxu0 %v3782_v12 }
  0x70   : > { %v387_v21 = vld [vmem:[%s4520_s2 + $0x58] sm:$0xff]  ;;  %2755 = vmatpush1.bf16.msra.mxu1 %v3793_v16  ;;  %v3812_v22 = vpack.c.bf16 %v382_v19, %v380_v18  ;;  %2803 = vmatpush1.bf16.msra.mxu0 %v3793_v16  ;;  %v384_v24 = vld [vmem:[%s4520_s2 + $0x40] sm:$0xff]  ;;  %v386_v25 = vld [vmem:[%s4520_s2 + $0x50] sm:$0xff] }
  0x71   : > { %2757 = vmatprep.subr.bf16.mxu1 %v3795_v17  ;;  %v3816_v23 = vpack.c.bf16 %v387_v21, %v385_v20  ;;  %2805 = vmatprep.subr.bf16.mxu0 %v3795_v17  ;;  %v389_v26 = vld [vmem:[%s4520_s2 + $0x68] sm:$0xff]  ;;  %v391_v27 = vld [vmem:[%s4520_s2 + $0x78] sm:$0xff]  ;;  %v3832_v28 = vpack.c.bf16 %v386_v25, %v384_v24  ;;  %v388_v30 = vld [vmem:[%s4520_s2 + $0x60] sm:$0xff] }
  0x72   : > { %v3836_v29 = vpack.c.bf16 %v391_v27, %v389_v26  ;;  %v390_v31 = vld [vmem:[%s4520_s2 + $0x70] sm:$0xff]  ;;  %v430_v34 = vld [vmem:[%s3748_s11 + $0x8] sm:$0xff]  ;;  %v429_v40 = vld [vmem:[%s3748_s11] sm:$0xff] }
  0x73   : > { %v3846_v32 = vpack.c.bf16 %v390_v31, %v388_v30  ;;  %v393_v54 = vld [vmem:[#allocation8 + $0x8] sm:$0xff]  ;;  %v395_v55 = vld [vmem:[#allocation8 + $0x18] sm:$0xff]  ;;  %v392_v56 = vld [vmem:[#allocation8] sm:$0xff] }
  0x74   : > { %2759 = vmatpush1.bf16.msra.mxu1 %v3812_v22  ;;  %2807 = vmatpush1.bf16.msra.mxu0 %v3812_v22  ;;  %v427_v33 = vld [vmem:[#allocation2] sm:$0xff]  ;;  %v560_v52 = vld [vmem:[#allocation2 + $0x8] sm:$0xff]  ;;  %v3867_v57 = vpack.c.bf16 %v395_v55, %v393_v54  ;;  %v394_v58 = vld [vmem:[#allocation8 + $0x10] sm:$0xff] }
  0x75   : > { %2761 = vmatprep.subr.bf16.mxu1 %v3816_v23  ;;  %2809 = vmatprep.subr.bf16.mxu0 %v3816_v23  ;;  %v428_v39 = vld [vmem:[#allocation3] sm:$0xff]  ;;  %v397_v59 = vld [vmem:[#allocation8 + $0x28] sm:$0xff]  ;;  %v399_v60 = vld [vmem:[#allocation8 + $0x38] sm:$0xff]  ;;  %v3869_v61 = vpack.c.bf16 %v394_v58, %v392_v56 }
  0x76   : > { %v3871_v62 = vpack.c.bf16 %v399_v60, %v397_v59  ;;  %v396_v63 = vld [vmem:[#allocation8 + $0x20] sm:$0xff]  ;;  %v398_v0 = vld [vmem:[#allocation8 + $0x30] sm:$0xff]  ;;  %v401_v1 = vld [vmem:[#allocation8 + $0x48] sm:$0xff] }
  0x77   : > { %v403_v2 = vld [vmem:[#allocation8 + $0x58] sm:$0xff]  ;;  %v3876_v3 = vpack.c.bf16 %v398_v0, %v396_v63  ;;  %v400_v5 = vld [vmem:[#allocation8 + $0x40] sm:$0xff]  ;;  %v402_v6 = vld [vmem:[#allocation8 + $0x50] sm:$0xff] }
  0x78   : > { %2763 = vmatpush1.bf16.msra.mxu1 %v3832_v28  ;;  %2811 = vmatpush1.bf16.msra.mxu0 %v3832_v28  ;;  %v3879_v4 = vpack.c.bf16 %v403_v2, %v401_v1  ;;  %v405_v7 = vld [vmem:[#allocation8 + $0x68] sm:$0xff]  ;;  %v407_v9 = vld [vmem:[#allocation8 + $0x78] sm:$0xff]  ;;  %v3882_v10 = vpack.c.bf16 %v402_v6, %v400_v5  ;;  %v404_v13 = vld [vmem:[#allocation8 + $0x60] sm:$0xff] }
  0x79   : > { %2765 = vmatprep.subr.bf16.mxu1 %v3836_v29  ;;  %2813 = vmatprep.subr.bf16.mxu0 %v3836_v29  ;;  %v3885_v11 = vpack.c.bf16 %v407_v9, %v405_v7  ;;  %v406_v14 = vld [vmem:[#allocation8 + $0x70] sm:$0xff]  ;;  %v409_v15 = vld [vmem:[#allocation8 + $0x88] sm:$0xff]  ;;  %v411_v18 = vld [vmem:[#allocation8 + $0x98] sm:$0xff] }
  0x7a   : > { %v3888_v19 = vpack.c.bf16 %v406_v14, %v404_v13  ;;  %v3891_v20 = vpack.c.bf16 %v411_v18, %v409_v15  ;;  %v408_v21 = vld [vmem:[#allocation8 + $0x80] sm:$0xff]  ;;  %v410_v24 = vld [vmem:[#allocation8 + $0x90] sm:$0xff]  ;;  %v413_v25 = vld [vmem:[#allocation8 + $0xa8] sm:$0xff]  ;;  %v569_v15 = vlaneseq }
  0x7b   : > { %v415_v26 = vld [vmem:[#allocation8 + $0xb8] sm:$0xff]  ;;  %v3894_v27 = vpack.c.bf16 %v410_v24, %v408_v21  ;;  %v412_v31 = vld [vmem:[#allocation8 + $0xa0] sm:$0xff] }
  0x7c   : > { %2767 = vmatpush1.bf16.msra.mxu1 %v3846_v32  ;;  %2815 = vmatpush1.bf16.msra.mxu0 %v3846_v32  ;;  %v3897_v30 = vpack.c.bf16 %v415_v26, %v413_v25  ;;  %v425_v53 = vld [vmem:[%s3757_s10] sm:$0xff]  ;;  %v562_v56 = vld [vmem:[#allocation3 + $0x8] sm:$0xff]  ;;  %v570_v18 = vshrl.u32 %v569_v15, 7 }
  0x7d   : > { %2769 = vmatprep.subr.bf16.mxu1 %v3867_v57  ;;  %2817 = vmatprep.subr.bf16.mxu0 %v3867_v57  ;;  %v426_v55 = vsub.f32 1.0, %v425_v53  ;;  %v424_v24 = vld [vmem:[%s4522_s4] sm:$0x3] }
  0x7e   : > { %v575_v21 = vsub.s32 1, %v570_v18 }
  0x7f   : > { %2711 = vmatmul.mubr.msk.f32.vlgmr.msra.gmra.mrb[0].mxu1 %vm371_vm0, %v427_v33  ;;  %v414_v33 = vld [vmem:[#allocation8 + $0xb0] sm:$0xff] }
  0x80   : > { %643 = vmatprep.mubr.f32.mxu1 %v3560_v8  ;;  %2771 = vmatpush1.bf16.msra.mxu1 %v3869_v61  ;;  %v3964_v25 = vrot.slane %v424_v24, %v575_v21 }
  0x81   : > { %2773 = vmatprep.subr.bf16.mxu1 %v3871_v62 }
  0x84   : > { %2775 = vmatpush1.bf16.msra.mxu1 %v3876_v3 }
  0x85   : > { %2777 = vmatprep.subr.bf16.mxu1 %v3879_v4 }
  0x88   : > { %2779 = vmatpush1.bf16.msra.mxu1 %v3882_v10 }
  0x89   : > { %2781 = vmatprep.subr.bf16.mxu1 %v3885_v11 }
  0x8c   : > { %2783 = vmatpush1.bf16.msra.mxu1 %v3888_v19 }
  0x8d   : > { %2785 = vmatprep.subr.bf16.mxu1 %v3891_v20 }
  0x90   : > { %2787 = vmatpush1.bf16.msra.mxu1 %v3894_v27 }
  0x91   : > { %2789 = vmatprep.subr.bf16.mxu1 %v3897_v30 }
 0x152   : > { %v501_v35 = vpop.f32.mrb[0].mxu1 }
 0x153   : > { %v503_v36 = vpop.f32.mrb[1].mxu1  ;;  %v506_v41 = vadd.f32 %v501_v35, %v429_v40  ;;  %v419_v35 = vld [vmem:[#allocation8 + $0xd8] sm:$0xff]  ;;  %v418_v40 = vld [vmem:[#allocation8 + $0xd0] sm:$0xff] }
 0x154   : > { %v3856_v37 = vadd.f32 %v503_v36, %v430_v34  ;;  %v417_v34 = vld [vmem:[#allocation8 + $0xc8] sm:$0xff]  ;;  %v3900_v36 = vpack.c.bf16 %v414_v33, %v412_v31 }
 0x155   : > { %v508_v42 = vsub.f32 0.0, %v506_v41  ;;  %v421_v41 = vld [vmem:[#allocation8 + $0xe8] sm:$0xff] }
 0x156   : > { %3217 = vtanh.f32 %v3856_v37  ;;  %2791 = vmatpush1.bf16.msra.mxu1 %v3900_v36 }
 0x157   : > { %v510_v43 = vmul.f32 1.442695, %v508_v42  ;;  %v423_v42 = vld [vmem:[#allocation8 + $0xf8] sm:$0xff] }
 0x159   : > { %3219 = vpow2.f32 %v510_v43 }
 0x160   : > { %v3218_v38 = vpop.eup %3217 }
 0x161   : > { %531 = vrot.lane.b32.xlu0 %v3218_v38, %s3561_s13  ;;  %v3903_v38 = vpack.c.bf16 %v419_v35, %v417_v34 }
 0x163   : > { %v3220_v44 = vpop.eup %3219  ;;  %2793 = vmatprep.subr.bf16.mxu1 %v3903_v38 }
 0x164   : > { %v514_v45 = vadd.f32 1.0, %v3220_v44  ;;  %v3909_v44 = vpack.c.bf16 %v423_v42, %v421_v41 }
 0x165   : > { %526 = vrot.lane.b32.xlu0 %v428_v39, %s3561_s13  ;;  %v416_v39 = vld [vmem:[#allocation8 + $0xc0] sm:$0xff] }
 0x166   : > { %3221 = vrcp.f32 %v514_v45  ;;  %v3906_v43 = vpack.c.bf16 %v418_v40, %v416_v39  ;;  %v2714_v39 = vld [vmem:[%s3748_s11 + $0x18] sm:$0xff] }
 0x168   : > { %2795 = vmatpush1.bf16.msra.mxu1 %v3906_v43 }
 0x169   : > { %564 = vrot.lane.b32.xlu0 %v560_v52, %s3561_s13  ;;  %2797 = vmatprep.subr.bf16.mxu1 %v3909_v44 }
 0x170   : > { %v3222_v46 = vpop.eup %3221 }
 0x171   : > { %v518_v47 = vmul.f32 %v3222_v46, %v514_v45 }
 0x173   : > { %v520_v48 = vsub.f32 2.0, %v518_v47  ;;  %v422_v47 = vld [vmem:[#allocation8 + $0xf0] sm:$0xff] }
 0x175   : > { %v3862_v49 = vmul.f32 %v3222_v46, %v520_v48  ;;  %v420_v46 = vld [vmem:[#allocation8 + $0xe0] sm:$0xff] }
 0x1d3   : > { %v532_v50 = vpop.permute.xlu0 %531 }
 0x1d4   : > { %v534_v51 = vmul.f32 %v532_v50, %v3862_v49  ;;  %v3914_v50 = vpack.c.bf16 %v422_v47, %v420_v46  ;;  %v571_v46 = vsub.s32 0, %v570_v18 }
 0x1d6   : > { %536 = vrot.lane.b32.xlu1 %v534_v51, %s3561_s13  ;;  %2799 = vmatpush1.bf16.msra.mxu1 %v3914_v50  ;;  %v3979_v47 = vrot.slane %v424_v24, %v571_v46 }
 0x1d7   : > { %v527_v45 = vpop.permute.xlu0 %526  ;;  %2849 = vmatprep.subr.bf16.mxu1 %v3782_v12 }
 0x1d8   : > { %v529_v48 = vmul.f32 %v527_v45, %v3862_v49  ;;  %v509_v49 = vsub.f32 0.0, %v3856_v37 }
 0x1da   : > { %v512_v58 = vmul.f32 1.442695, %v509_v49 }
 0x1db   : > { %v565_v6 = vpop.permute.xlu0 %564 }
 0x248   : > { %v537_v51 = vpop.permute.xlu1 %536 }
 0x249   : > { %v3916_v52 = vadd.f32 %v537_v51, %v529_v48 }
 0x24b   : > { %3223 = vtanh.f32 %v3916_v52 }
 0x24c   : > { %3225 = vpow2.f32 %v512_v58 }
 0x255   : > { %v3224_v54 = vpop.eup %3223 }
 0x256   : > { %542 = vrot.lane.b32.xlu1 %v3224_v54, %s3561_s13  ;;  %v3226_v59 = vpop.eup %3225 }
 0x257   : > { %v515_v60 = vadd.f32 1.0, %v3226_v59 }
 0x259   : > { %3227 = vrcp.f32 %v515_v60 }
 0x25a   : > { %548 = vperm.xlu1 %3215, %v426_v55  }
 0x25e   : > { %668 = vrot.lane.b32.xlu1 %v562_v56, %s3561_s13 }
 0x263   : > { %v3228_v63 = vpop.eup %3227 }
 0x264   : > { %v519_v0 = vmul.f32 %v3228_v63, %v515_v60 }
 0x266   : > { %v521_v1 = vsub.f32 2.0, %v519_v0 }
 0x268   : > { %v523_v2 = vmul.f32 %v3228_v63, %v521_v1 }
 0x2c8   : > { %v543_v5 = vpop.permute.xlu1 %542 }
 0x2c9   : > { %v3925_v7 = vmul.f32 %v543_v5, %v523_v2 }
 0x2cb   : > { %v567_v9 = vsel %vm371_vm0, %v3925_v7, %v565_v6 }
 0x2cc   : > { %644 = vmatmul.mubr.f32.vlgmr.msra.gmra.mrb[2].mxu1 %v567_v9 }
 0x2cd   : > { %2851 = vmatpush1.bf16.msra.mxu1 %v3793_v16  ;;  %1043 = vmatprep.mubr.f32.mxu1 %v3560_v8 }
 0x2ce   : > { %2853 = vmatprep.subr.bf16.mxu1 %v3795_v17 }
 0x2d1   : > { %2855 = vmatpush1.bf16.msra.mxu1 %v3812_v22 }
 0x2d2   : > { %2857 = vmatprep.subr.bf16.mxu1 %v3816_v23 }
 0x2d5   : > { %2859 = vmatpush1.bf16.msra.mxu1 %v3832_v28 }
 0x2d6   : > { %2861 = vmatprep.subr.bf16.mxu1 %v3836_v29 }
 0x2d9   : > { %v3936_v37 = vpop.permute.xlu1 %548  ;;  %2863 = vmatpush1.bf16.msra.mxu1 %v3846_v32 }
 0x2da   : > { %v551_v13 = vmul.f32 %v3936_v37, %v3925_v7  ;;  %2865 = vmatprep.subr.bf16.mxu1 %v3867_v57  ;;  %v553_v35 = vmul.f32 %v3936_v37, %v3916_v52  ;;  %v2713_v52 = vld [vmem:[%s3748_s11 + $0x10] sm:$0xff] }
 0x2dc   : > { %552 = vst.msk [vmem:[#allocation2] sm:$0xff] %vm371_vm0, %v551_v13 }
 0x2e3   : > { %v705_v14 = vld [vmem:[#allocation2] sm:$0xff] }
 0x2e4   : > { %2715 = vmatmul.mubr.msk.f32.vlgmr.msra.gmra.mrb[0].mxu0 %vm371_vm0, %v705_v14 }
 0x2e5   : > { %2819 = vmatpush1.bf16.msra.mxu0 %v3869_v61  ;;  %908 = vmatprep.mubr.f32.mxu0 %v3560_v8 }
 0x2e6   : > { %2821 = vmatprep.subr.bf16.mxu0 %v3871_v62 }
 0x2e9   : > { %2823 = vmatpush1.bf16.msra.mxu0 %v3876_v3 }
 0x2ea   : > { %2825 = vmatprep.subr.bf16.mxu0 %v3879_v4 }
 0x2ed   : > { %2827 = vmatpush1.bf16.msra.mxu0 %v3882_v10 }
 0x2ee   : > { %2829 = vmatprep.subr.bf16.mxu0 %v3885_v11 }
 0x2f1   : > { %2831 = vmatpush1.bf16.msra.mxu0 %v3888_v19 }
 0x2f2   : > { %2833 = vmatprep.subr.bf16.mxu0 %v3891_v20 }
 0x2f5   : > { %2835 = vmatpush1.bf16.msra.mxu0 %v3894_v27 }
 0x2f6   : > { %2837 = vmatprep.subr.bf16.mxu0 %v3897_v30 }
 0x2f9   : > { %2839 = vmatpush1.bf16.msra.mxu0 %v3900_v36 }
 0x2fa   : > { %2841 = vmatprep.subr.bf16.mxu0 %v3903_v38 }
 0x2fd   : > { %2843 = vmatpush1.bf16.msra.mxu0 %v3906_v43 }
 0x2fe   : > { %2845 = vmatprep.subr.bf16.mxu0 %v3909_v44 }
 0x301   : > { %2847 = vmatpush1.bf16.msra.mxu0 %v3914_v50 }
 0x302   : > { %2897 = vmatprep.subr.bf16.mxu0 %v3782_v12 }
 0x39f   : > { %v645_v26 = vpop.f32.mrb[2].mxu1 }
 0x3a0   : > { %v647_v31 = vpop.f32.mrb[3].mxu1  ;;  %v646_v48 = vadd.f32 %v645_v26, %v3979_v47 }
 0x3a1   : > { %v3967_v33 = vadd.f32 %v647_v31, %v3964_v25  ;;  %v669_v31 = vpop.permute.xlu1 %668 }
 0x3a2   : > { %v650_v51 = vsub.f32 0.0, %v646_v48 }
 0x3a3   : > { %3229 = vtanh.f32 %v3967_v33 }
 0x3a4   : > { %v652_v53 = vmul.f32 1.442695, %v650_v51  ;;  %v2712_v51 = vld [vmem:[%s3757_s10 + $0x8] sm:$0xff] }
 0x3ad   : > { %v3230_v34 = vpop.eup %3229 }
 0x3ae   : > { %673 = vrot.lane.b32.xlu0 %v3230_v34, %s3561_s13 }
 0x3b2   : > { %555 = vrot.lane.b32.xlu0 %v553_v35, %s3561_s13 }
 0x3b7   : > { %v779_v40 = vpop.f32.mrb[0].mxu0 }
 0x3b8   : > { %v781_v41 = vpop.f32.mrb[1].mxu0  ;;  %v784_v55 = vadd.f32 %v2713_v52, %v779_v40  ;;  %v704_v52 = vsub.f32 1.0, %v2712_v51 }
 0x3b9   : > { %v3975_v42 = vadd.f32 %v2714_v39, %v781_v41 }
 0x3ba   : > { %v786_v49 = vsub.f32 0.0, %v784_v55 }
 0x3bb   : > { %3231 = vtanh.f32 %v3975_v42 }
 0x3bc   : > { %3233 = vpow2.f32 %v652_v53  ;;  %v788_v58 = vmul.f32 1.442695, %v786_v49 }
 0x3c5   : > { %v3232_v45 = vpop.eup %3231 }
 0x3c6   : > { %809 = vrot.lane.b32.xlu0 %v3232_v45, %s3561_s13  ;;  %v3234_v54 = vpop.eup %3233 }
 0x3c7   : > { %v656_v56 = vadd.f32 1.0, %v3234_v54  ;;  %v651_v54 = vsub.f32 0.0, %v3967_v33 }
 0x3c9   : > { %3235 = vrcp.f32 %v656_v56  ;;  %v654_v55 = vmul.f32 1.442695, %v651_v54  ;;  %v2719_v54 = vld [vmem:[%s3748_s11 + $0x28] sm:$0xff] }
 0x3ca   : > { %3237 = vpow2.f32 %v788_v58 }
 0x3d3   : > { %v3236_v59 = vpop.eup %3235 }
 0x3d4   : > { %v660_v60 = vmul.f32 %v3236_v59, %v656_v56  ;;  %v3238_v63 = vpop.eup %3237 }
 0x3d5   : > { %v792_v1 = vadd.f32 1.0, %v3238_v63 }
 0x3d6   : > { %v662_v0 = vsub.f32 2.0, %v660_v60  ;;  %v787_v60 = vsub.f32 0.0, %v3975_v42 }
 0x3d7   : > { %3239 = vrcp.f32 %v792_v1 }
 0x3d8   : > { %v664_v2 = vmul.f32 %v3236_v59, %v662_v0  ;;  %v790_v0 = vmul.f32 1.442695, %v787_v60 }
 0x3da   : > { %v671_v34 = vmul.f32 %v669_v31, %v664_v2 }
 0x3e1   : > { %v3240_v13 = vpop.eup %3239 }
 0x3e2   : > { %v796_v15 = vmul.f32 %v3240_v13, %v792_v1 }
 0x3e4   : > { %v798_v18 = vsub.f32 2.0, %v796_v15 }
 0x3e6   : > { %v800_v21 = vmul.f32 %v3240_v13, %v798_v18 }
 0x420   : > { %v674_v5 = vpop.permute.xlu0 %673 }
 0x421   : > { %v676_v6 = vmul.f32 %v674_v5, %v664_v2 }
 0x423   : > { %678 = vrot.lane.b32.xlu1 %v676_v6, %s3561_s13 }
 0x424   : > { %v556_v9 = vpop.permute.xlu0 %555 }
 0x425   : > { %558 = vst.msk [vmem:[#allocation3] sm:$0xff] %vm371_vm0, %v556_v9 }
 0x42c   : > { %v706_v14 = vld [vmem:[#allocation3] sm:$0xff] }
 0x42d   : > { %804 = vrot.lane.b32.xlu1 %v706_v14, %s3561_s13 }
 0x438   : > { %v810_v24 = vpop.permute.xlu0 %809 }
 0x439   : > { %v812_v26 = vmul.f32 %v810_v24, %v800_v21 }
 0x43b   : > { %814 = vrot.lane.b32.xlu0 %v812_v26, %s3561_s13 }
 0x495   : > { %v679_v35 = vpop.permute.xlu1 %678 }
 0x496   : > { %v681_v39 = vadd.f32 %v679_v35, %v671_v34 }
 0x498   : > { %3241 = vtanh.f32 %v681_v39  ;;  %v690_v14 = vmul.f32 %v681_v39, %v3936_v37 }
 0x49f   : > { %v805_v41 = vpop.permute.xlu1 %804 }
 0x4a0   : > { %v807_v45 = vmul.f32 %v805_v41, %v800_v21 }
 0x4a2   : > { %v3242_v40 = vpop.eup %3241 }
 0x4a3   : > { %684 = vrot.lane.b32.xlu1 %v3242_v40, %s3561_s13 }
 0x4ad   : > { %v815_v46 = vpop.permute.xlu0 %814 }
 0x4ae   : > { %v3988_v48 = vadd.f32 %v815_v46, %v807_v45 }
 0x4b0   : > { %3243 = vtanh.f32 %v3988_v48 }
 0x4b1   : > { %3245 = vpow2.f32 %v654_v55 }
 0x4ba   : > { %v3244_v53 = vpop.eup %3243 }
 0x4bb   : > { %820 = vrot.lane.b32.xlu0 %v3244_v53, %s3561_s13  ;;  %v3246_v56 = vpop.eup %3245 }
 0x4bc   : > { %v657_v49 = vadd.f32 1.0, %v3246_v56 }
 0x4be   : > { %3247 = vrcp.f32 %v657_v49 }
 0x4bf   : > { %826 = vperm.xlu0 %3216, %v704_v52   ;;  %3249 = vpow2.f32 %v790_v0 }
 0x4c8   : > { %v3248_v58 = vpop.eup %3247 }
 0x4c9   : > { %v661_v59 = vmul.f32 %v3248_v58, %v657_v49  ;;  %v3250_v33 = vpop.eup %3249 }
 0x4ca   : > { %v793_v13 = vadd.f32 1.0, %v3250_v33 }
 0x4cb   : > { %v663_v63 = vsub.f32 2.0, %v661_v59 }
 0x4cc   : > { %3251 = vrcp.f32 %v793_v13 }
 0x4cd   : > { %v665_v1 = vmul.f32 %v3248_v58, %v663_v63  ;;  %v2718_v63 = vld [vmem:[%s3748_s11 + $0x20] sm:$0xff] }
 0x4d6   : > { %v3252_v42 = vpop.eup %3251 }
 0x4d7   : > { %v797_v15 = vmul.f32 %v3252_v42, %v793_v13 }
 0x4d9   : > { %v799_v18 = vsub.f32 2.0, %v797_v15 }
 0x4db   : > { %v801_v24 = vmul.f32 %v3252_v42, %v799_v18 }
 0x515   : > { %v685_v2 = vpop.permute.xlu1 %684 }
 0x516   : > { %v3995_v5 = vmul.f32 %v685_v2, %v665_v1 }
 0x518   : > { %v688_v6 = vmul.f32 %v3995_v5, %v3936_v37 }
 0x51a   : > { %689 = vst.msk [vmem:[#allocation2 + $0x8] sm:$0xff] %vm371_vm0, %v688_v6 }
 0x521   : > { %v837_v9 = vld [vmem:[#allocation2 + $0x8] sm:$0xff] }
 0x522   : > { %840 = vrot.lane.b32.xlu1 %v837_v9, %s3561_s13 }
 0x526   : > { %692 = vrot.lane.b32.xlu1 %v690_v14, %s3561_s13 }
 0x52d   : > { %v821_v21 = vpop.permute.xlu0 %820 }
 0x52e   : > { %v4003_v26 = vmul.f32 %v821_v21, %v801_v24 }
 0x53e   : > { %v4005_v31 = vpop.permute.xlu0 %826 }
 0x53f   : > { %v829_v34 = vmul.f32 %v4005_v31, %v4003_v26  ;;  %v831_v49 = vmul.f32 %v4005_v31, %v3988_v48 }
 0x541   : > { %830 = vst.msk [vmem:[#allocation2] sm:$0xff] %vm371_vm0, %v829_v34 }
 0x548   : > { %v971_v35 = vld [vmem:[#allocation2] sm:$0xff] }
 0x549   : > { %2720 = vmatmul.mubr.msk.f32.vlgmr.msra.gmra.mrb[4].mxu1 %vm371_vm0, %v971_v35 }
 0x54a   : > { %2867 = vmatpush1.bf16.msra.mxu1 %v3869_v61  ;;  %1174 = vmatprep.mubr.f32.mxu1 %v3560_v8 }
 0x54b   : > { %2869 = vmatprep.subr.bf16.mxu1 %v3871_v62 }
 0x54e   : > { %2871 = vmatpush1.bf16.msra.mxu1 %v3876_v3 }
 0x54f   : > { %2873 = vmatprep.subr.bf16.mxu1 %v3879_v4 }
 0x552   : > { %2875 = vmatpush1.bf16.msra.mxu1 %v3882_v10 }
 0x553   : > { %2877 = vmatprep.subr.bf16.mxu1 %v3885_v11 }
 0x556   : > { %2879 = vmatpush1.bf16.msra.mxu1 %v3888_v19 }
 0x557   : > { %2881 = vmatprep.subr.bf16.mxu1 %v3891_v20 }
 0x55a   : > { %2883 = vmatpush1.bf16.msra.mxu1 %v3894_v27 }
 0x55b   : > { %2885 = vmatprep.subr.bf16.mxu1 %v3897_v30 }
 0x55e   : > { %2887 = vmatpush1.bf16.msra.mxu1 %v3900_v36 }
 0x55f   : > { %2889 = vmatprep.subr.bf16.mxu1 %v3903_v38 }
 0x562   : > { %2891 = vmatpush1.bf16.msra.mxu1 %v3906_v43 }
 0x563   : > { %2893 = vmatprep.subr.bf16.mxu1 %v3909_v44 }
 0x566   : > { %2895 = vmatpush1.bf16.msra.mxu1 %v3914_v50 }
 0x567   : > { %2945 = vmatprep.subr.bf16.mxu1 %v3782_v12 }
 0x594   : > { %v841_v37 = vpop.permute.xlu1 %840 }
 0x595   : > { %v843_v39 = vsel %vm371_vm0, %v4003_v26, %v841_v37 }
 0x596   : > { %909 = vmatmul.mubr.f32.vlgmr.msra.gmra.mrb[2].mxu0 %v843_v39 }
 0x597   : > { %2899 = vmatpush1.bf16.msra.mxu0 %v3793_v16  ;;  %1309 = vmatprep.mubr.f32.mxu0 %v3560_v8 }
 0x598   : > { %v693_v40 = vpop.permute.xlu1 %692  ;;  %2901 = vmatprep.subr.bf16.mxu0 %v3795_v17 }
 0x599   : > { %695 = vst.msk [vmem:[#allocation3 + $0x8] sm:$0xff] %vm371_vm0, %v693_v40 }
 0x59b   : > { %2903 = vmatpush1.bf16.msra.mxu0 %v3812_v22 }
 0x59c   : > { %2905 = vmatprep.subr.bf16.mxu0 %v3816_v23 }
 0x59f   : > { %2907 = vmatpush1.bf16.msra.mxu0 %v3832_v28 }
 0x5a0   : > { %v838_v41 = vld [vmem:[#allocation3 + $0x8] sm:$0xff]  ;;  %2909 = vmatprep.subr.bf16.mxu0 %v3836_v29 }
 0x5a1   : > { %933 = vrot.lane.b32.xlu0 %v838_v41, %s3561_s13 }
 0x5a3   : > { %2911 = vmatpush1.bf16.msra.mxu0 %v3846_v32 }
 0x5a4   : > { %2913 = vmatprep.subr.bf16.mxu0 %v3867_v57 }
 0x61c   : > { %v1045_v45 = vpop.f32.mrb[4].mxu1 }
 0x61d   : > { %v1047_v46 = vpop.f32.mrb[5].mxu1  ;;  %v1050_v0 = vadd.f32 %v2718_v63, %v1045_v45 }
 0x61e   : > { %v4043_v55 = vadd.f32 %v2719_v54, %v1047_v46 }
 0x61f   : > { %v1052_v2 = vsub.f32 0.0, %v1050_v0  ;;  %v2717_v0 = vld [vmem:[%s3757_s10 + $0x10] sm:$0xff] }
 0x621   : > { %v1054_v6 = vmul.f32 1.442695, %v1052_v2  ;;  %v970_v2 = vsub.f32 1.0, %v2717_v0 }
 0x669   : > { %v910_v51 = vpop.f32.mrb[2].mxu0 }
 0x66a   : > { %v912_v53 = vpop.f32.mrb[3].mxu0  ;;  %v911_v59 = vadd.f32 %v910_v51, %v3979_v47  ;;  %v934_v51 = vpop.permute.xlu0 %933 }
 0x66b   : > { %v913_v52 = vadd.f32 %v912_v53, %v3964_v25 }
 0x66c   : > { %v915_v60 = vsub.f32 0.0, %v911_v59 }
 0x66d   : > { %3253 = vtanh.f32 %v913_v52 }
 0x66e   : > { %3255 = vtanh.f32 %v4043_v55  ;;  %v917_v1 = vmul.f32 1.442695, %v915_v60 }
 0x670   : > { %3257 = vpow2.f32 %v917_v1 }
 0x671   : > { %3259 = vpow2.f32 %v1054_v6  ;;  %v916_v6 = vsub.f32 0.0, %v913_v52 }
 0x677   : > { %v3254_v56 = vpop.eup %3253 }
 0x678   : > { %938 = vrot.lane.b32.xlu1 %v3254_v56, %s3561_s13  ;;  %v3256_v58 = vpop.eup %3255 }
 0x67a   : > { %v3258_v33 = vpop.eup %3257 }
 0x67b   : > { %v921_v9 = vadd.f32 1.0, %v3258_v33  ;;  %v3260_v13 = vpop.eup %3259  ;;  %v919_v33 = vmul.f32 1.442695, %v916_v6 }
 0x67c   : > { %833 = vrot.lane.b32.xlu1 %v831_v49, %s3561_s13  ;;  %v1058_v48 = vadd.f32 1.0, %v3260_v13 }
 0x67d   : > { %3261 = vrcp.f32 %v921_v9 }
 0x67e   : > { %3263 = vrcp.f32 %v1058_v48 }
 0x680   : > { %1075 = vrot.lane.b32.xlu1 %v3256_v58, %s3561_s13 }
 0x687   : > { %v3262_v14 = vpop.eup %3261 }
 0x688   : > { %v925_v42 = vmul.f32 %v3262_v14, %v921_v9  ;;  %v3264_v18 = vpop.eup %3263 }
 0x689   : > { %v1062_v24 = vmul.f32 %v3264_v18, %v1058_v48  ;;  %v1053_v48 = vsub.f32 0.0, %v4043_v55 }
 0x68a   : > { %v927_v15 = vsub.f32 2.0, %v925_v42 }
 0x68b   : > { %v1064_v37 = vsub.f32 2.0, %v1062_v24 }
 0x68c   : > { %v929_v21 = vmul.f32 %v3262_v14, %v927_v15  ;;  %v1056_v14 = vmul.f32 1.442695, %v1053_v48 }
 0x68d   : > { %v1066_v40 = vmul.f32 %v3264_v18, %v1064_v37 }
 0x68e   : > { %v936_v53 = vmul.f32 %v934_v51, %v929_v21 }
 0x6ea   : > { %v939_v34 = vpop.permute.xlu1 %938 }
 0x6eb   : > { %v941_v35 = vmul.f32 %v939_v34, %v929_v21 }
 0x6ed   : > { %943 = vrot.lane.b32.xlu0 %v941_v35, %s3561_s13 }
 0x6ee   : > { %v834_v39 = vpop.permute.xlu1 %833 }
 0x6ef   : > { %836 = vst.msk [vmem:[#allocation3] sm:$0xff] %vm371_vm0, %v834_v39 }
 0x6f2   : > { %v1076_v41 = vpop.permute.xlu1 %1075 }
 0x6f3   : > { %v1078_v45 = vmul.f32 %v1076_v41, %v1066_v40 }
 0x6f5   : > { %1080 = vrot.lane.b32.xlu1 %v1078_v45, %s3561_s13 }
 0x6f6   : > { %v972_v46 = vld [vmem:[#allocation3] sm:$0xff] }
 0x6f7   : > { %1070 = vrot.lane.b32.xlu0 %v972_v46, %s3561_s13 }
 0x75f   : > { %v944_v54 = vpop.permute.xlu0 %943 }
 0x760   : > { %v946_v56 = vadd.f32 %v944_v54, %v936_v53 }
 0x762   : > { %3265 = vtanh.f32 %v946_v56 }
 0x767   : > { %v1081_v59 = vpop.permute.xlu1 %1080 }
 0x769   : > { %v1071_v49 = vpop.permute.xlu0 %1070 }
 0x76a   : > { %v1073_v58 = vmul.f32 %v1071_v49, %v1066_v40  ;;  %v955_v40 = vmul.f32 %v946_v56, %v4005_v31 }
 0x76c   : > { %v3266_v60 = vpop.eup %3265  ;;  %v4057_v63 = vadd.f32 %v1081_v59, %v1073_v58 }
 0x76d   : > { %949 = vrot.lane.b32.xlu0 %v3266_v60, %s3561_s13 }
 0x76e   : > { %3267 = vtanh.f32 %v4057_v63 }
 0x76f   : > { %3269 = vpow2.f32 %v919_v33 }
 0x778   : > { %v3268_v1 = vpop.eup %3267 }
 0x779   : > { %1086 = vrot.lane.b32.xlu1 %v3268_v1, %s3561_s13  ;;  %v3270_v9 = vpop.eup %3269 }
 0x77a   : > { %v922_v13 = vadd.f32 1.0, %v3270_v9  ;;  %v2724_v9 = vld [vmem:[%s3748_s11 + $0x38] sm:$0xff] }
 0x77c   : > { %3271 = vrcp.f32 %v922_v13 }
 0x77d   : > { %1092 = vperm.xlu1 %3215, %v970_v2   ;;  %3273 = vpow2.f32 %v1056_v14 }
 0x786   : > { %v3272_v42 = vpop.eup %3271 }
 0x787   : > { %v926_v15 = vmul.f32 %v3272_v42, %v922_v13  ;;  %v3274_v21 = vpop.eup %3273 }
 0x788   : > { %v1059_v35 = vadd.f32 1.0, %v3274_v21  ;;  %v2723_v21 = vld [vmem:[%s3748_s11 + $0x30] sm:$0xff] }
 0x789   : > { %v928_v18 = vsub.f32 2.0, %v926_v15 }
 0x78a   : > { %3275 = vrcp.f32 %v1059_v35 }
 0x78b   : > { %v930_v24 = vmul.f32 %v3272_v42, %v928_v18 }
 0x794   : > { %v3276_v55 = vpop.eup %3275 }
 0x795   : > { %v1063_v41 = vmul.f32 %v3276_v55, %v1059_v35 }
 0x797   : > { %v1065_v45 = vsub.f32 2.0, %v1063_v41 }
 0x799   : > { %v1067_v51 = vmul.f32 %v3276_v55, %v1065_v45 }
 0x7df   : > { %v950_v34 = vpop.permute.xlu0 %949 }
 0x7e0   : > { %v4064_v37 = vmul.f32 %v950_v34, %v930_v24 }
 0x7e2   : > { %v953_v52 = vmul.f32 %v4064_v37, %v4005_v31 }
 0x7e4   : > { %954 = vst.msk [vmem:[#allocation2 + $0x8] sm:$0xff] %vm371_vm0, %v953_v52 }
 0x7eb   : > { %v1103_v39 = vld [vmem:[#allocation2 + $0x8] sm:$0xff]  ;;  %v1087_v46 = vpop.permute.xlu1 %1086 }
 0x7ec   : > { %1106 = vrot.lane.b32.xlu0 %v1103_v39, %s3561_s13  ;;  %v4072_v53 = vmul.f32 %v1087_v46, %v1067_v51 }
 0x7f0   : > { %957 = vrot.lane.b32.xlu0 %v955_v40, %s3561_s13 }
 0x7fc   : > { %v4074_v54 = vpop.permute.xlu1 %1092 }
 0x7fd   : > { %v1095_v49 = vmul.f32 %v4074_v54, %v4072_v53  ;;  %v1097_v14 = vmul.f32 %v4074_v54, %v4057_v63 }
 0x7ff   : > { %1096 = vst.msk [vmem:[#allocation2] sm:$0xff] %vm371_vm0, %v1095_v49 }
 0x806   : > { %v1237_v58 = vld [vmem:[#allocation2] sm:$0xff] }
 0x807   : > { %2725 = vmatmul.mubr.msk.f32.vlgmr.msra.gmra.mrb[4].mxu0 %vm371_vm0, %v1237_v58 }
 0x808   : > { %2915 = vmatpush1.bf16.msra.mxu0 %v3869_v61  ;;  %1440 = vmatprep.mubr.f32.mxu0 %v3560_v8 }
 0x809   : > { %2917 = vmatprep.subr.bf16.mxu0 %v3871_v62 }
 0x80c   : > { %2919 = vmatpush1.bf16.msra.mxu0 %v3876_v3 }
 0x80d   : > { %2921 = vmatprep.subr.bf16.mxu0 %v3879_v4 }
 0x810   : > { %2923 = vmatpush1.bf16.msra.mxu0 %v3882_v10 }
 0x811   : > { %2925 = vmatprep.subr.bf16.mxu0 %v3885_v11 }
 0x814   : > { %2927 = vmatpush1.bf16.msra.mxu0 %v3888_v19 }
 0x815   : > { %2929 = vmatprep.subr.bf16.mxu0 %v3891_v20 }
 0x818   : > { %2931 = vmatpush1.bf16.msra.mxu0 %v3894_v27 }
 0x819   : > { %2933 = vmatprep.subr.bf16.mxu0 %v3897_v30 }
 0x81c   : > { %2935 = vmatpush1.bf16.msra.mxu0 %v3900_v36 }
 0x81d   : > { %2937 = vmatprep.subr.bf16.mxu0 %v3903_v38 }
 0x820   : > { %2939 = vmatpush1.bf16.msra.mxu0 %v3906_v43 }
 0x821   : > { %2941 = vmatprep.subr.bf16.mxu0 %v3909_v44 }
 0x824   : > { %2943 = vmatpush1.bf16.msra.mxu0 %v3914_v50 }
 0x825   : > { %2993 = vmatprep.subr.bf16.mxu0 %v3782_v12 }
 0x85e   : > { %v1107_v31 = vpop.permute.xlu0 %1106 }
 0x85f   : > { %v1109_v56 = vsel %vm371_vm0, %v4072_v53, %v1107_v31 }
 0x860   : > { %1175 = vmatmul.mubr.f32.vlgmr.msra.gmra.mrb[6].mxu1 %v1109_v56 }
 0x861   : > { %2947 = vmatpush1.bf16.msra.mxu1 %v3793_v16  ;;  %1575 = vmatprep.mubr.f32.mxu1 %v3560_v8 }
 0x862   : > { %v958_v59 = vpop.permute.xlu0 %957  ;;  %2949 = vmatprep.subr.bf16.mxu1 %v3795_v17 }
 0x863   : > { %960 = vst.msk [vmem:[#allocation3 + $0x8] sm:$0xff] %vm371_vm0, %v958_v59 }
 0x865   : > { %2951 = vmatpush1.bf16.msra.mxu1 %v3812_v22 }
 0x866   : > { %2953 = vmatprep.subr.bf16.mxu1 %v3816_v23 }
 0x869   : > { %2955 = vmatpush1.bf16.msra.mxu1 %v3832_v28 }
 0x86a   : > { %v1104_v60 = vld [vmem:[#allocation3 + $0x8] sm:$0xff]  ;;  %2957 = vmatprep.subr.bf16.mxu1 %v3836_v29 }
 0x86b   : > { %1199 = vrot.lane.b32.xlu0 %v1104_v60, %s3561_s13 }
 0x86d   : > { %2959 = vmatpush1.bf16.msra.mxu1 %v3846_v32 }
 0x86e   : > { %2961 = vmatprep.subr.bf16.mxu1 %v3867_v57 }
 0x8da   : > { %v1311_v0 = vpop.f32.mrb[4].mxu0 }
 0x8db   : > { %v1313_v1 = vpop.f32.mrb[5].mxu0  ;;  %v1316_v24 = vadd.f32 %v2723_v21, %v1311_v0 }
 0x8dc   : > { %v4112_v13 = vadd.f32 %v2724_v9, %v1313_v1 }
 0x8dd   : > { %v1318_v35 = vsub.f32 0.0, %v1316_v24  ;;  %v1200_v9 = vpop.permute.xlu0 %1199 }
 0x8df   : > { %v1320_v52 = vmul.f32 1.442695, %v1318_v35  ;;  %v2722_v35 = vld [vmem:[%s3757_s10 + $0x18] sm:$0xff] }
 0x933   : > { %v1176_v2 = vpop.f32.mrb[6].mxu1 }
 0x934   : > { %v1178_v6 = vpop.f32.mrb[7].mxu1  ;;  %v1177_v15 = vadd.f32 %v1176_v2, %v3979_v47 }
 0x935   : > { %v1179_v33 = vadd.f32 %v1178_v6, %v3964_v25 }
 0x936   : > { %v1181_v18 = vsub.f32 0.0, %v1177_v15 }
 0x937   : > { %3277 = vtanh.f32 %v1179_v33 }
 0x938   : > { %3279 = vtanh.f32 %v4112_v13  ;;  %v1183_v34 = vmul.f32 1.442695, %v1181_v18 }
 0x93a   : > { %3281 = vpow2.f32 %v1183_v34 }
 0x93b   : > { %3283 = vpow2.f32 %v1320_v52 }
 0x941   : > { %v3278_v48 = vpop.eup %3277 }
 0x942   : > { %1204 = vrot.lane.b32.xlu1 %v3278_v48, %s3561_s13  ;;  %v3280_v42 = vpop.eup %3279 }
 0x944   : > { %v3282_v39 = vpop.eup %3281 }
 0x945   : > { %v1187_v55 = vadd.f32 1.0, %v3282_v39  ;;  %v3284_v40 = vpop.eup %3283  ;;  %v1236_v39 = vsub.f32 1.0, %v2722_v35 }
 0x946   : > { %1099 = vrot.lane.b32.xlu1 %v1097_v14, %s3561_s13  ;;  %v1324_v63 = vadd.f32 1.0, %v3284_v40 }
 0x947   : > { %3285 = vrcp.f32 %v1187_v55 }
 0x948   : > { %3287 = vrcp.f32 %v1324_v63 }
 0x94a   : > { %1341 = vrot.lane.b32.xlu1 %v3280_v42, %s3561_s13 }
 0x951   : > { %v3286_v41 = vpop.eup %3285 }
 0x952   : > { %v1191_v45 = vmul.f32 %v3286_v41, %v1187_v55  ;;  %v3288_v51 = vpop.eup %3287  ;;  %v1182_v55 = vsub.f32 0.0, %v1179_v33 }
 0x953   : > { %v1328_v58 = vmul.f32 %v3288_v51, %v1324_v63 }
 0x954   : > { %v1193_v46 = vsub.f32 2.0, %v1191_v45  ;;  %v1185_v40 = vmul.f32 1.442695, %v1182_v55  ;;  %v1319_v45 = vsub.f32 0.0, %v4112_v13 }
 0x955   : > { %v1330_v59 = vsub.f32 2.0, %v1328_v58 }
 0x956   : > { %v1195_v49 = vmul.f32 %v3286_v41, %v1193_v46  ;;  %v1322_v46 = vmul.f32 1.442695, %v1319_v45  ;;  %v2729_v45 = vld [vmem:[%s3748_s11 + $0x48] sm:$0xff] }
 0x957   : > { %v1332_v0 = vmul.f32 %v3288_v51, %v1330_v59 }
 0x958   : > { %v1202_v48 = vmul.f32 %v1200_v9, %v1195_v49 }
 0x9b4   : > { %v1205_v31 = vpop.permute.xlu1 %1204 }
 0x9b5   : > { %v1207_v56 = vmul.f32 %v1205_v31, %v1195_v49 }
 0x9b7   : > { %1209 = vrot.lane.b32.xlu0 %v1207_v56, %s3561_s13 }
 0x9b8   : > { %v1100_v60 = vpop.permute.xlu1 %1099 }
 0x9b9   : > { %1102 = vst.msk [vmem:[#allocation3] sm:$0xff] %vm371_vm0, %v1100_v60 }
 0x9bc   : > { %v1342_v1 = vpop.permute.xlu1 %1341 }
 0x9bd   : > { %v1344_v2 = vmul.f32 %v1342_v1, %v1332_v0 }
 0x9bf   : > { %1346 = vrot.lane.b32.xlu1 %v1344_v2, %s3561_s13 }
 0x9c0   : > { %v1238_v6 = vld [vmem:[#allocation3] sm:$0xff] }
 0x9c1   : > { %1336 = vrot.lane.b32.xlu0 %v1238_v6, %s3561_s13 }
 0xa29   : > { %v1210_v14 = vpop.permute.xlu0 %1209 }
 0xa2a   : > { %v1212_v42 = vadd.f32 %v1210_v14, %v1202_v48 }
 0xa2c   : > { %3289 = vtanh.f32 %v1212_v42  ;;  %v1221_v2 = vmul.f32 %v1212_v42, %v4074_v54 }
 0xa31   : > { %v1347_v21 = vpop.permute.xlu1 %1346 }
 0xa33   : > { %v1337_v15 = vpop.permute.xlu0 %1336 }
 0xa34   : > { %v1339_v18 = vmul.f32 %v1337_v15, %v1332_v0 }
 0xa36   : > { %v3290_v24 = vpop.eup %3289  ;;  %v4126_v34 = vadd.f32 %v1347_v21, %v1339_v18 }
 0xa37   : > { %1215 = vrot.lane.b32.xlu0 %v3290_v24, %s3561_s13 }
 0xa38   : > { %3291 = vtanh.f32 %v4126_v34 }
 0xa39   : > { %3293 = vpow2.f32 %v1185_v40 }
 0xa42   : > { %v3292_v52 = vpop.eup %3291 }
 0xa43   : > { %1352 = vrot.lane.b32.xlu1 %v3292_v52, %s3561_s13  ;;  %v3294_v63 = vpop.eup %3293 }
 0xa44   : > { %v1188_v41 = vadd.f32 1.0, %v3294_v63 }
 0xa46   : > { %3295 = vrcp.f32 %v1188_v41 }
 0xa47   : > { %1358 = vperm.xlu1 %3215, %v1236_v39   ;;  %3297 = vpow2.f32 %v1322_v46 }
 0xa50   : > { %v3296_v51 = vpop.eup %3295 }
 0xa51   : > { %v1192_v49 = vmul.f32 %v3296_v51, %v1188_v41  ;;  %v3298_v31 = vpop.eup %3297 }
 0xa52   : > { %v1325_v60 = vadd.f32 1.0, %v3298_v31 }
 0xa53   : > { %v1194_v58 = vsub.f32 2.0, %v1192_v49 }
 0xa54   : > { %3299 = vrcp.f32 %v1325_v60 }
 0xa55   : > { %v1196_v56 = vmul.f32 %v3296_v51, %v1194_v58 }
 0xa5e   : > { %v3300_v13 = vpop.eup %3299 }
 0xa5f   : > { %v1329_v6 = vmul.f32 %v3300_v13, %v1325_v60 }
 0xa61   : > { %v1331_v9 = vsub.f32 2.0, %v1329_v6 }
 0xa63   : > { %v1333_v14 = vmul.f32 %v3300_v13, %v1331_v9 }
 0xaa9   : > { %v1216_v59 = vpop.permute.xlu0 %1215 }
 0xaaa   : > { %v4133_v0 = vmul.f32 %v1216_v59, %v1196_v56  ;;  %v2728_v59 = vld [vmem:[%s3748_s11 + $0x40] sm:$0xff] }
 0xaac   : > { %v1219_v33 = vmul.f32 %v4133_v0, %v4074_v54 }
 0xaae   : > { %1220 = vst.msk [vmem:[#allocation2 + $0x8] sm:$0xff] %vm371_vm0, %v1219_v33 }
 0xab5   : > { %v1369_v1 = vld [vmem:[#allocation2 + $0x8] sm:$0xff]  ;;  %v1353_v48 = vpop.permute.xlu1 %1352 }
 0xab6   : > { %1372 = vrot.lane.b32.xlu0 %v1369_v1, %s3561_s13  ;;  %v4141_v15 = vmul.f32 %v1353_v48, %v1333_v14 }
 0xaba   : > { %1223 = vrot.lane.b32.xlu0 %v1221_v2, %s3561_s13 }
 0xac6   : > { %v4143_v18 = vpop.permute.xlu1 %1358 }
 0xac7   : > { %v1361_v21 = vmul.f32 %v4143_v18, %v4141_v15  ;;  %v1363_v49 = vmul.f32 %v4143_v18, %v4126_v34 }
 0xac9   : > { %1362 = vst.msk [vmem:[#allocation2] sm:$0xff] %vm371_vm0, %v1361_v21 }
 0xad0   : > { %v1503_v24 = vld [vmem:[#allocation2] sm:$0xff] }
 0xad1   : > { %2730 = vmatmul.mubr.msk.f32.vlgmr.msra.gmra.mrb[8].mxu1 %vm371_vm0, %v1503_v24 }
 0xad2   : > { %2963 = vmatpush1.bf16.msra.mxu1 %v3869_v61  ;;  %1706 = vmatprep.mubr.f32.mxu1 %v3560_v8 }
 0xad3   : > { %2965 = vmatprep.subr.bf16.mxu1 %v3871_v62 }
 0xad6   : > { %2967 = vmatpush1.bf16.msra.mxu1 %v3876_v3 }
 0xad7   : > { %2969 = vmatprep.subr.bf16.mxu1 %v3879_v4 }
 0xada   : > { %2971 = vmatpush1.bf16.msra.mxu1 %v3882_v10 }
 0xadb   : > { %2973 = vmatprep.subr.bf16.mxu1 %v3885_v11 }
 0xade   : > { %2975 = vmatpush1.bf16.msra.mxu1 %v3888_v19 }
 0xadf   : > { %2977 = vmatprep.subr.bf16.mxu1 %v3891_v20 }
 0xae2   : > { %2979 = vmatpush1.bf16.msra.mxu1 %v3894_v27 }
 0xae3   : > { %2981 = vmatprep.subr.bf16.mxu1 %v3897_v30 }
 0xae6   : > { %2983 = vmatpush1.bf16.msra.mxu1 %v3900_v36 }
 0xae7   : > { %2985 = vmatprep.subr.bf16.mxu1 %v3903_v38 }
 0xaea   : > { %2987 = vmatpush1.bf16.msra.mxu1 %v3906_v43 }
 0xaeb   : > { %2989 = vmatprep.subr.bf16.mxu1 %v3909_v44 }
 0xaee   : > { %2991 = vmatpush1.bf16.msra.mxu1 %v3914_v50 }
 0xaef   : > { %3041 = vmatprep.subr.bf16.mxu1 %v3782_v12 }
 0xb28   : > { %v1373_v54 = vpop.permute.xlu0 %1372 }
 0xb29   : > { %v1375_v42 = vsel %vm371_vm0, %v4141_v15, %v1373_v54 }
 0xb2a   : > { %1441 = vmatmul.mubr.f32.vlgmr.msra.gmra.mrb[6].mxu0 %v1375_v42 }
 0xb2b   : > { %2995 = vmatpush1.bf16.msra.mxu0 %v3793_v16  ;;  %1841 = vmatprep.mubr.f32.mxu0 %v3560_v8 }
 0xb2c   : > { %v1224_v35 = vpop.permute.xlu0 %1223  ;;  %2997 = vmatprep.subr.bf16.mxu0 %v3795_v17 }
 0xb2d   : > { %1226 = vst.msk [vmem:[#allocation3 + $0x8] sm:$0xff] %vm371_vm0, %v1224_v35 }
 0xb2f   : > { %2999 = vmatpush1.bf16.msra.mxu0 %v3812_v22 }
 0xb30   : > { %3001 = vmatprep.subr.bf16.mxu0 %v3816_v23 }
 0xb33   : > { %3003 = vmatpush1.bf16.msra.mxu0 %v3832_v28 }
 0xb34   : > { %v1370_v52 = vld [vmem:[#allocation3 + $0x8] sm:$0xff]  ;;  %3005 = vmatprep.subr.bf16.mxu0 %v3836_v29 }
 0xb35   : > { %1465 = vrot.lane.b32.xlu0 %v1370_v52, %s3561_s13 }
 0xb37   : > { %3007 = vmatpush1.bf16.msra.mxu0 %v3846_v32 }
 0xb38   : > { %3009 = vmatprep.subr.bf16.mxu0 %v3867_v57 }
 0xba4   : > { %v1577_v39 = vpop.f32.mrb[8].mxu1 }
 0xba5   : > { %v1579_v55 = vpop.f32.mrb[9].mxu1  ;;  %v1582_v60 = vadd.f32 %v2728_v59, %v1577_v39 }
 0xba6   : > { %v4181_v46 = vadd.f32 %v2729_v45, %v1579_v55 }
 0xba7   : > { %v1584_v1 = vsub.f32 0.0, %v1582_v60 }
 0xba9   : > { %v1586_v13 = vmul.f32 1.442695, %v1584_v1 }
 0xbfd   : > { %v1442_v40 = vpop.f32.mrb[6].mxu0 }
 0xbfe   : > { %v1444_v63 = vpop.f32.mrb[7].mxu0  ;;  %v1443_v31 = vadd.f32 %v1442_v40, %v3979_v47 }
 0xbff   : > { %v1445_v41 = vadd.f32 %v1444_v63, %v3964_v25 }
 0xc00   : > { %v1447_v56 = vsub.f32 0.0, %v1443_v31 }
 0xc01   : > { %3301 = vtanh.f32 %v1445_v41 }
 0xc02   : > { %3303 = vtanh.f32 %v4181_v46  ;;  %v1449_v33 = vmul.f32 1.442695, %v1447_v56 }
 0xc04   : > { %3305 = vpow2.f32 %v1449_v33 }
 0xc05   : > { %3307 = vpow2.f32 %v1586_v13 }
 0xc0b   : > { %v3302_v51 = vpop.eup %3301 }
 0xc0c   : > { %1470 = vrot.lane.b32.xlu1 %v3302_v51, %s3561_s13  ;;  %v3304_v58 = vpop.eup %3303 }
 0xc0e   : > { %v3306_v2 = vpop.eup %3305 }
 0xc0f   : > { %v1453_v6 = vadd.f32 1.0, %v3306_v2  ;;  %v3308_v9 = vpop.eup %3307  ;;  %v2727_v2 = vld [vmem:[%s3757_s10 + $0x20] sm:$0xff] }
 0xc10   : > { %1365 = vrot.lane.b32.xlu1 %v1363_v49, %s3561_s13  ;;  %v1590_v34 = vadd.f32 1.0, %v3308_v9  ;;  %v1466_v49 = vpop.permute.xlu0 %1465  ;;  %v1502_v9 = vsub.f32 1.0, %v2727_v2 }
 0xc11   : > { %3309 = vrcp.f32 %v1453_v6 }
 0xc12   : > { %3311 = vrcp.f32 %v1590_v34 }
 0xc14   : > { %1607 = vrot.lane.b32.xlu1 %v3304_v58, %s3561_s13 }
 0xc1b   : > { %v3310_v48 = vpop.eup %3309 }
 0xc1c   : > { %v1457_v14 = vmul.f32 %v3310_v48, %v1453_v6  ;;  %v3312_v24 = vpop.eup %3311 }
 0xc1d   : > { %v1594_v42 = vmul.f32 %v3312_v24, %v1590_v34  ;;  %v1448_v34 = vsub.f32 0.0, %v1445_v41 }
 0xc1e   : > { %v1459_v21 = vsub.f32 2.0, %v1457_v14 }
 0xc1f   : > { %v1596_v39 = vsub.f32 2.0, %v1594_v42 }
 0xc20   : > { %v1461_v54 = vmul.f32 %v3310_v48, %v1459_v21  ;;  %v1451_v48 = vmul.f32 1.442695, %v1448_v34 }
 0xc21   : > { %v1598_v40 = vmul.f32 %v3312_v24, %v1596_v39  ;;  %v1585_v24 = vsub.f32 0.0, %v4181_v46 }
 0xc22   : > { %v1468_v58 = vmul.f32 %v1466_v49, %v1461_v54 }
 0xc7e   : > { %v1471_v35 = vpop.permute.xlu1 %1470 }
 0xc7f   : > { %v1473_v52 = vmul.f32 %v1471_v35, %v1461_v54  ;;  %v1588_v54 = vmul.f32 1.442695, %v1585_v24 }
 0xc81   : > { %1475 = vrot.lane.b32.xlu0 %v1473_v52, %s3561_s13 }
 0xc82   : > { %v1366_v55 = vpop.permute.xlu1 %1365 }
 0xc83   : > { %1368 = vst.msk [vmem:[#allocation3] sm:$0xff] %vm371_vm0, %v1366_v55 }
 0xc86   : > { %v1608_v63 = vpop.permute.xlu1 %1607 }
 0xc87   : > { %v1610_v45 = vmul.f32 %v1608_v63, %v1598_v40 }
 0xc89   : > { %1612 = vrot.lane.b32.xlu1 %v1610_v45, %s3561_s13 }
 0xc8a   : > { %v1504_v51 = vld [vmem:[#allocation3] sm:$0xff] }
 0xc8b   : > { %1602 = vrot.lane.b32.xlu0 %v1504_v51, %s3561_s13 }
 0xcf3   : > { %v1476_v31 = vpop.permute.xlu0 %1475 }
 0xcf4   : > { %v1478_v56 = vadd.f32 %v1476_v31, %v1468_v58 }
 0xcf6   : > { %3313 = vtanh.f32 %v1478_v56  ;;  %v1487_v49 = vmul.f32 %v1478_v56, %v4143_v18 }
 0xcfb   : > { %v1613_v33 = vpop.permute.xlu1 %1612 }
 0xcfd   : > { %v1603_v59 = vpop.permute.xlu0 %1602 }
 0xcfe   : > { %v1605_v60 = vmul.f32 %v1603_v59, %v1598_v40 }
 0xd00   : > { %v3314_v1 = vpop.eup %3313  ;;  %v4195_v13 = vadd.f32 %v1613_v33, %v1605_v60 }
 0xd01   : > { %1481 = vrot.lane.b32.xlu0 %v3314_v1, %s3561_s13 }
 0xd02   : > { %3315 = vtanh.f32 %v4195_v13 }
 0xd03   : > { %3317 = vpow2.f32 %v1451_v48 }
 0xd0c   : > { %v3316_v6 = vpop.eup %3315 }
 0xd0d   : > { %1618 = vrot.lane.b32.xlu1 %v3316_v6, %s3561_s13  ;;  %v3318_v14 = vpop.eup %3317 }
 0xd0e   : > { %v1454_v21 = vadd.f32 1.0, %v3318_v14 }
 0xd10   : > { %3319 = vrcp.f32 %v1454_v21 }
 0xd11   : > { %1624 = vperm.xlu1 %3215, %v1502_v9   ;;  %3321 = vpow2.f32 %v1588_v54  ;;  %v2734_v54 = vld [vmem:[%s3748_s11 + $0x58] sm:$0xff] }
 0xd1a   : > { %v3320_v42 = vpop.eup %3319 }
 0xd1b   : > { %v1458_v35 = vmul.f32 %v3320_v42, %v1454_v21  ;;  %v3322_v39 = vpop.eup %3321 }
 0xd1c   : > { %v1591_v63 = vadd.f32 1.0, %v3322_v39 }
 0xd1d   : > { %v1460_v52 = vsub.f32 2.0, %v1458_v35 }
 0xd1e   : > { %3323 = vrcp.f32 %v1591_v63 }
 0xd1f   : > { %v1462_v55 = vmul.f32 %v3320_v42, %v1460_v52 }
 0xd28   : > { %v3324_v46 = vpop.eup %3323 }
 0xd29   : > { %v1595_v58 = vmul.f32 %v3324_v46, %v1591_v63  ;;  %v2733_v63 = vld [vmem:[%s3748_s11 + $0x50] sm:$0xff] }
 0xd2b   : > { %v1597_v31 = vsub.f32 2.0, %v1595_v58 }
 0xd2d   : > { %v1599_v60 = vmul.f32 %v3324_v46, %v1597_v31 }
 0xd73   : > { %v1482_v40 = vpop.permute.xlu0 %1481 }
 0xd74   : > { %v4202_v45 = vmul.f32 %v1482_v40, %v1462_v55 }
 0xd76   : > { %v1485_v41 = vmul.f32 %v4202_v45, %v4143_v18 }
 0xd78   : > { %1486 = vst.msk [vmem:[#allocation2 + $0x8] sm:$0xff] %vm371_vm0, %v1485_v41 }
 0xd7f   : > { %v1635_v51 = vld [vmem:[#allocation2 + $0x8] sm:$0xff]  ;;  %v1619_v59 = vpop.permute.xlu1 %1618 }
 0xd80   : > { %1638 = vrot.lane.b32.xlu0 %v1635_v51, %s3561_s13  ;;  %v4210_v33 = vmul.f32 %v1619_v59, %v1599_v60 }
 0xd84   : > { %1489 = vrot.lane.b32.xlu0 %v1487_v49, %s3561_s13 }
 0xd90   : > { %v4212_v1 = vpop.permute.xlu1 %1624 }
 0xd91   : > { %v1627_v2 = vmul.f32 %v4212_v1, %v4210_v33  ;;  %v1629_v52 = vmul.f32 %v4212_v1, %v4195_v13 }
 0xd93   : > { %1628 = vst.msk [vmem:[#allocation2] sm:$0xff] %vm371_vm0, %v1627_v2 }
 0xd9a   : > { %v1769_v6 = vld [vmem:[#allocation2] sm:$0xff] }
 0xd9b   : > { %2735 = vmatmul.mubr.msk.f32.vlgmr.msra.gmra.mrb[8].mxu0 %vm371_vm0, %v1769_v6 }
 0xd9c   : > { %3011 = vmatpush1.bf16.msra.mxu0 %v3869_v61  ;;  %1972 = vmatprep.mubr.f32.mxu0 %v3560_v8 }
 0xd9d   : > { %3013 = vmatprep.subr.bf16.mxu0 %v3871_v62 }
 0xda0   : > { %3015 = vmatpush1.bf16.msra.mxu0 %v3876_v3 }
 0xda1   : > { %3017 = vmatprep.subr.bf16.mxu0 %v3879_v4 }
 0xda4   : > { %3019 = vmatpush1.bf16.msra.mxu0 %v3882_v10 }
 0xda5   : > { %3021 = vmatprep.subr.bf16.mxu0 %v3885_v11 }
 0xda8   : > { %3023 = vmatpush1.bf16.msra.mxu0 %v3888_v19 }
 0xda9   : > { %3025 = vmatprep.subr.bf16.mxu0 %v3891_v20 }
 0xdac   : > { %3027 = vmatpush1.bf16.msra.mxu0 %v3894_v27 }
 0xdad   : > { %3029 = vmatprep.subr.bf16.mxu0 %v3897_v30 }
 0xdb0   : > { %3031 = vmatpush1.bf16.msra.mxu0 %v3900_v36 }
 0xdb1   : > { %3033 = vmatprep.subr.bf16.mxu0 %v3903_v38 }
 0xdb4   : > { %3035 = vmatpush1.bf16.msra.mxu0 %v3906_v43 }
 0xdb5   : > { %3037 = vmatprep.subr.bf16.mxu0 %v3909_v44 }
 0xdb8   : > { %3039 = vmatpush1.bf16.msra.mxu0 %v3914_v50 }
 0xdb9   : > { %3089 = vmatprep.subr.bf16.mxu0 %v3782_v12 }
 0xdf2   : > { %v1639_v18 = vpop.permute.xlu0 %1638 }
 0xdf3   : > { %v1641_v56 = vsel %vm371_vm0, %v4210_v33, %v1639_v18 }
 0xdf4   : > { %1707 = vmatmul.mubr.f32.vlgmr.msra.gmra.mrb[10].mxu1 %v1641_v56 }
 0xdf5   : > { %3043 = vmatpush1.bf16.msra.mxu1 %v3793_v16  ;;  %2107 = vmatprep.mubr.f32.mxu1 %v3560_v8 }
 0xdf6   : > { %v1490_v9 = vpop.permute.xlu0 %1489  ;;  %3045 = vmatprep.subr.bf16.mxu1 %v3795_v17 }
 0xdf7   : > { %1492 = vst.msk [vmem:[#allocation3 + $0x8] sm:$0xff] %vm371_vm0, %v1490_v9 }
 0xdf9   : > { %3047 = vmatpush1.bf16.msra.mxu1 %v3812_v22 }
 0xdfa   : > { %3049 = vmatprep.subr.bf16.mxu1 %v3816_v23 }
 0xdfd   : > { %3051 = vmatpush1.bf16.msra.mxu1 %v3832_v28 }
 0xdfe   : > { %v1636_v12 = vld [vmem:[#allocation3 + $0x8] sm:$0xff]  ;;  %3053 = vmatprep.subr.bf16.mxu1 %v3836_v29 }
 0xdff   : > { %1731 = vrot.lane.b32.xlu0 %v1636_v12, %s3561_s13 }
 0xe01   : > { %3055 = vmatpush1.bf16.msra.mxu1 %v3846_v32 }
 0xe02   : > { %3057 = vmatprep.subr.bf16.mxu1 %v3867_v57 }
 0xe6e   : > { %v1843_v34 = vpop.f32.mrb[8].mxu0 }
 0xe6f   : > { %v1845_v48 = vpop.f32.mrb[9].mxu0  ;;  %v1848_v41 = vadd.f32 %v2733_v63, %v1843_v34 }
 0xe70   : > { %v4250_v42 = vadd.f32 %v2734_v54, %v1845_v48 }
 0xe71   : > { %v1850_v46 = vsub.f32 0.0, %v1848_v41 }
 0xe73   : > { %v1852_v49 = vmul.f32 1.442695, %v1850_v46 }
 0xec7   : > { %v1708_v14 = vpop.f32.mrb[10].mxu1 }
 0xec8   : > { %v1710_v21 = vpop.f32.mrb[11].mxu1  ;;  %v1709_v55 = vadd.f32 %v1708_v14, %v3979_v47 }
 0xec9   : > { %v1711_v24 = vadd.f32 %v1710_v21, %v3964_v25 }
 0xeca   : > { %v1713_v40 = vsub.f32 0.0, %v1709_v55 }
 0xecb   : > { %3325 = vtanh.f32 %v1711_v24 }
 0xecc   : > { %3327 = vtanh.f32 %v4250_v42  ;;  %v1715_v51 = vmul.f32 1.442695, %v1713_v40 }
 0xece   : > { %3329 = vpow2.f32 %v1715_v51 }
 0xecf   : > { %3331 = vpow2.f32 %v1852_v49 }
 0xed5   : > { %v3326_v35 = vpop.eup %3325 }
 0xed6   : > { %1736 = vrot.lane.b32.xlu1 %v3326_v35, %s3561_s13  ;;  %v3328_v39 = vpop.eup %3327 }
 0xed8   : > { %v3330_v58 = vpop.eup %3329 }
 0xed9   : > { %v1719_v31 = vadd.f32 1.0, %v3330_v58  ;;  %v3332_v59 = vpop.eup %3331 }
 0xeda   : > { %1631 = vrot.lane.b32.xlu1 %v1629_v52, %s3561_s13  ;;  %v1856_v13 = vadd.f32 1.0, %v3332_v59 }
 0xedb   : > { %3333 = vrcp.f32 %v1719_v31 }
 0xedc   : > { %3335 = vrcp.f32 %v1856_v13 }
 0xede   : > { %1873 = vrot.lane.b32.xlu1 %v3328_v39, %s3561_s13  ;;  %v1732_v39 = vpop.permute.xlu0 %1731 }
 0xee5   : > { %v3334_v60 = vpop.eup %3333 }
 0xee6   : > { %v1723_v2 = vmul.f32 %v3334_v60, %v1719_v31  ;;  %v3336_v18 = vpop.eup %3335  ;;  %v2732_v31 = vld [vmem:[%s3757_s10 + $0x28] sm:$0xff] }
 0xee7   : > { %v1860_v9 = vmul.f32 %v3336_v18, %v1856_v13  ;;  %v1768_v13 = vsub.f32 1.0, %v2732_v31 }
 0xee8   : > { %v1725_v6 = vsub.f32 2.0, %v1723_v2 }
 0xee9   : > { %v1862_v34 = vsub.f32 2.0, %v1860_v9 }
 0xeea   : > { %v1727_v56 = vmul.f32 %v3334_v60, %v1725_v6  ;;  %v1714_v60 = vsub.f32 0.0, %v1711_v24 }
 0xeeb   : > { %v1864_v21 = vmul.f32 %v3336_v18, %v1862_v34 }
 0xeec   : > { %v1734_v55 = vmul.f32 %v1732_v39, %v1727_v56  ;;  %v1717_v2 = vmul.f32 1.442695, %v1714_v60 }
 0xf48   : > { %v1737_v12 = vpop.permute.xlu1 %1736 }
 0xf49   : > { %v1739_v48 = vmul.f32 %v1737_v12, %v1727_v56  ;;  %v1851_v56 = vsub.f32 0.0, %v4250_v42 }
 0xf4b   : > { %1741 = vrot.lane.b32.xlu0 %v1739_v48, %s3561_s13  ;;  %v1854_v9 = vmul.f32 1.442695, %v1851_v56 }
 0xf4c   : > { %v1632_v14 = vpop.permute.xlu1 %1631 }
 0xf4d   : > { %1634 = vst.msk [vmem:[#allocation3] sm:$0xff] %vm371_vm0, %v1632_v14 }
 0xf50   : > { %v1874_v54 = vpop.permute.xlu1 %1873 }
 0xf51   : > { %v1876_v35 = vmul.f32 %v1874_v54, %v1864_v21 }
 0xf53   : > { %1878 = vrot.lane.b32.xlu1 %v1876_v35, %s3561_s13 }
 0xf54   : > { %v1770_v52 = vld [vmem:[#allocation3] sm:$0xff] }
 0xf55   : > { %1868 = vrot.lane.b32.xlu0 %v1770_v52, %s3561_s13 }
 0xfbd   : > { %v1742_v40 = vpop.permute.xlu0 %1741 }
 0xfbe   : > { %v1744_v63 = vadd.f32 %v1742_v40, %v1734_v55 }
 0xfc0   : > { %3337 = vtanh.f32 %v1744_v63  ;;  %v1753_v55 = vmul.f32 %v1744_v63, %v4212_v1 }
 0xfc5   : > { %v1879_v46 = vpop.permute.xlu1 %1878 }
 0xfc7   : > { %v1869_v41 = vpop.permute.xlu0 %1868 }
 0xfc8   : > { %v1871_v51 = vmul.f32 %v1869_v41, %v1864_v21 }
 0xfca   : > { %v3338_v49 = vpop.eup %3337  ;;  %v4264_v58 = vadd.f32 %v1879_v46, %v1871_v51 }
 0xfcb   : > { %1747 = vrot.lane.b32.xlu0 %v3338_v49, %s3561_s13 }
 0xfcc   : > { %3339 = vtanh.f32 %v4264_v58 }
 0xfcd   : > { %3341 = vpow2.f32 %v1717_v2 }
 0xfd6   : > { %v3340_v59 = vpop.eup %3339 }
 0xfd7   : > { %1884 = vrot.lane.b32.xlu1 %v3340_v59, %s3561_s13  ;;  %v3342_v6 = vpop.eup %3341 }
 0xfd8   : > { %v1720_v18 = vadd.f32 1.0, %v3342_v6 }
 0xfda   : > { %3343 = vrcp.f32 %v1720_v18 }
 0xfdb   : > { %1890 = vperm.xlu1 %3215, %v1768_v13   ;;  %3345 = vpow2.f32 %v1854_v9 }
 0xfe4   : > { %v3344_v12 = vpop.eup %3343 }
 0xfe5   : > { %v1724_v48 = vmul.f32 %v3344_v12, %v1720_v18  ;;  %v3346_v14 = vpop.eup %3345 }
 0xfe6   : > { %v1857_v35 = vadd.f32 1.0, %v3346_v14 }
 0xfe7   : > { %v1726_v34 = vsub.f32 2.0, %v1724_v48 }
 0xfe8   : > { %3347 = vrcp.f32 %v1857_v35 }
 0xfe9   : > { %v1728_v21 = vmul.f32 %v3344_v12, %v1726_v34  ;;  %v2738_v12 = vld [vmem:[%s3748_s11 + $0x60] sm:$0xff] }
 0xff2   : > { %v3348_v42 = vpop.eup %3347 }
 0xff3   : > { %v1861_v40 = vmul.f32 %v3348_v42, %v1857_v35 }
 0xff5   : > { %v1863_v41 = vsub.f32 2.0, %v1861_v40 }
 0xff7   : > { %v1865_v46 = vmul.f32 %v3348_v42, %v1863_v41 }
0x103d   : > { %v1748_v54 = vpop.permute.xlu0 %1747 }
0x103e   : > { %v4271_v52 = vmul.f32 %v1748_v54, %v1728_v21 }
0x1040   : > { %v1751_v24 = vmul.f32 %v4271_v52, %v4212_v1 }
0x1042   : > { %1752 = vst.msk [vmem:[#allocation2 + $0x8] sm:$0xff] %vm371_vm0, %v1751_v24 }
0x1049   : > { %v1901_v39 = vld [vmem:[#allocation2 + $0x8] sm:$0xff]  ;;  %v1885_v51 = vpop.permute.xlu1 %1884 }
0x104a   : > { %1904 = vrot.lane.b32.xlu0 %v1901_v39, %s3561_s13  ;;  %v4279_v49 = vmul.f32 %v1885_v51, %v1865_v46 }
0x104e   : > { %1755 = vrot.lane.b32.xlu0 %v1753_v55, %s3561_s13 }
0x105a   : > { %v4281_v31 = vpop.permute.xlu1 %1890 }
0x105b   : > { %v1893_v59 = vmul.f32 %v4281_v31, %v4279_v49 }
0x105d   : > { %1894 = vst.msk [vmem:[#allocation2] sm:$0xff] %vm371_vm0, %v1893_v59 }
0x1064   : > { %v2035_v13 = vld [vmem:[#allocation2] sm:$0xff] }
0x1065   : > { %2740 = vmatmul.mubr.msk.f32.vlgmr.msra.gmra.mrb[12].mxu1 %vm371_vm0, %v2035_v13 }
0x1066   : > { %3059 = vmatpush1.bf16.msra.mxu1 %v3869_v61  ;;  %2238 = vmatprep.mubr.f32.mxu1 %v3560_v8 }
0x1067   : > { %3061 = vmatprep.subr.bf16.mxu1 %v3871_v62 }
0x106a   : > { %3063 = vmatpush1.bf16.msra.mxu1 %v3876_v3 }
0x106b   : > { %3065 = vmatprep.subr.bf16.mxu1 %v3879_v4 }
0x106e   : > { %3067 = vmatpush1.bf16.msra.mxu1 %v3882_v10 }
0x106f   : > { %3069 = vmatprep.subr.bf16.mxu1 %v3885_v11 }
0x1072   : > { %3071 = vmatpush1.bf16.msra.mxu1 %v3888_v19 }
0x1073   : > { %3073 = vmatprep.subr.bf16.mxu1 %v3891_v20 }
0x1076   : > { %3075 = vmatpush1.bf16.msra.mxu1 %v3894_v27 }
0x1077   : > { %3077 = vmatprep.subr.bf16.mxu1 %v3897_v30 }
0x107a   : > { %3079 = vmatpush1.bf16.msra.mxu1 %v3900_v36 }
0x107b   : > { %3081 = vmatprep.subr.bf16.mxu1 %v3903_v38 }
0x107e   : > { %3083 = vmatpush1.bf16.msra.mxu1 %v3906_v43 }
0x107f   : > { %3085 = vmatprep.subr.bf16.mxu1 %v3909_v44 }
0x1082   : > { %3087 = vmatpush1.bf16.msra.mxu1 %v3914_v50 }
0x10bc   : > { %v1905_v1 = vpop.permute.xlu0 %1904 }
0x10bd   : > { %v1907_v63 = vsel %vm371_vm0, %v4279_v49, %v1905_v1 }
0x10be   : > { %1973 = vmatmul.mubr.f32.vlgmr.msra.gmra.mrb[10].mxu0 %v1907_v63 }
0x10bf   : > { %3091 = vmatpush1.bf16.msra.mxu0 %v3793_v16  ;;  %2373 = vmatprep.mubr.f32.mxu0 %v3560_v8 }
0x10c0   : > { %v1756_v60 = vpop.permute.xlu0 %1755  ;;  %3093 = vmatprep.subr.bf16.mxu0 %v3795_v17 }
0x10c1   : > { %1758 = vst.msk [vmem:[#allocation3 + $0x8] sm:$0xff] %vm371_vm0, %v1756_v60 }
0x10c3   : > { %3095 = vmatpush1.bf16.msra.mxu0 %v3812_v22 }
0x10c4   : > { %3097 = vmatprep.subr.bf16.mxu0 %v3816_v23  ;;  %v2739_v23 = vld [vmem:[%s3748_s11 + $0x68] sm:$0xff] }
0x10c7   : > { %3099 = vmatpush1.bf16.msra.mxu0 %v3832_v28 }
0x10c8   : > { %v1902_v2 = vld [vmem:[#allocation3 + $0x8] sm:$0xff]  ;;  %3101 = vmatprep.subr.bf16.mxu0 %v3836_v29  ;;  %v1895_v29 = vmul.f32 %v4281_v31, %v4264_v58 }
0x10c9   : > { %1997 = vrot.lane.b32.xlu0 %v1902_v2, %s3561_s13 }
0x10cb   : > { %3103 = vmatpush1.bf16.msra.mxu0 %v3846_v32 }
0x10cc   : > { %3105 = vmatprep.subr.bf16.mxu0 %v3867_v57 }
0x1138   : > { %v2109_v16 = vpop.f32.mrb[12].mxu1 }
0x1139   : > { %v2111_v17 = vpop.f32.mrb[13].mxu1  ;;  %v2114_v48 = vadd.f32 %v2738_v12, %v2109_v16  ;;  %v2737_v12 = vld [vmem:[%s3757_s10 + $0x30] sm:$0xff] }
0x113a   : > { %v4318_v56 = vadd.f32 %v2739_v23, %v2111_v17 }
0x113b   : > { %v2116_v14 = vsub.f32 0.0, %v2114_v48  ;;  %v1998_v17 = vpop.permute.xlu0 %1997 }
0x113d   : > { %v2118_v21 = vmul.f32 1.442695, %v2116_v14 }
0x1191   : > { %v1974_v6 = vpop.f32.mrb[10].mxu0 }
0x1192   : > { %v1976_v18 = vpop.f32.mrb[11].mxu0  ;;  %v1975_v57 = vadd.f32 %v1974_v6, %v3979_v47 }
0x1193   : > { %v1977_v22 = vadd.f32 %v1976_v18, %v3964_v25 }
0x1194   : > { %v1979_v9 = vsub.f32 0.0, %v1975_v57 }
0x1195   : > { %3349 = vtanh.f32 %v1977_v22  ;;  %v1980_v14 = vsub.f32 0.0, %v1977_v22 }
0x1196   : > { %3351 = vtanh.f32 %v4318_v56  ;;  %v1981_v34 = vmul.f32 1.442695, %v1979_v9 }
0x1198   : > { %3353 = vpow2.f32 %v1981_v34  ;;  %v2034_v34 = vsub.f32 1.0, %v2737_v12 }
0x1199   : > { %3355 = vpow2.f32 %v2118_v21  ;;  %v1983_v21 = vmul.f32 1.442695, %v1980_v14 }
0x119f   : > { %v3350_v28 = vpop.eup %3349 }
0x11a0   : > { %2002 = vrot.lane.b32.xlu1 %v3350_v28, %s3561_s13  ;;  %v3352_v32 = vpop.eup %3351 }
0x11a2   : > { %v3354_v54 = vpop.eup %3353 }
0x11a3   : > { %v1985_v35 = vadd.f32 1.0, %v3354_v54  ;;  %v3356_v24 = vpop.eup %3355 }
0x11a4   : > { %1897 = vrot.lane.b32.xlu1 %v1895_v29, %s3561_s13  ;;  %v2122_v58 = vadd.f32 1.0, %v3356_v24  ;;  %v2117_v24 = vsub.f32 0.0, %v4318_v56 }
0x11a5   : > { %3357 = vrcp.f32 %v1985_v35 }
0x11a6   : > { %3359 = vrcp.f32 %v2122_v58 }
0x11a8   : > { %2139 = vrot.lane.b32.xlu1 %v3352_v32, %s3561_s13 }
0x11af   : > { %v3358_v39 = vpop.eup %3357 }
0x11b0   : > { %v1989_v42 = vmul.f32 %v3358_v39, %v1985_v35  ;;  %v3360_v40 = vpop.eup %3359 }
0x11b1   : > { %v2126_v51 = vmul.f32 %v3360_v40, %v2122_v58  ;;  %v2120_v58 = vmul.f32 1.442695, %v2117_v24 }
0x11b2   : > { %v1991_v55 = vsub.f32 2.0, %v1989_v42 }
0x11b3   : > { %v2128_v13 = vsub.f32 2.0, %v2126_v51 }
0x11b4   : > { %v1993_v41 = vmul.f32 %v3358_v39, %v1991_v55 }
0x11b5   : > { %v2130_v63 = vmul.f32 %v3360_v40, %v2128_v13 }
0x11b6   : > { %v2000_v6 = vmul.f32 %v1998_v17, %v1993_v41 }
0x1212   : > { %v2003_v46 = vpop.permute.xlu1 %2002 }
0x1213   : > { %v2005_v59 = vmul.f32 %v2003_v46, %v1993_v41 }
0x1215   : > { %2007 = vrot.lane.b32.xlu0 %v2005_v59, %s3561_s13 }
0x1216   : > { %v1898_v1 = vpop.permute.xlu1 %1897 }
0x1217   : > { %1900 = vst.msk [vmem:[#allocation3] sm:$0xff] %vm371_vm0, %v1898_v1 }
0x121a   : > { %v2140_v60 = vpop.permute.xlu1 %2139 }
0x121b   : > { %v2142_v2 = vmul.f32 %v2140_v60, %v2130_v63 }
0x121d   : > { %2144 = vrot.lane.b32.xlu1 %v2142_v2, %s3561_s13 }
0x121e   : > { %v2036_v16 = vld [vmem:[#allocation3] sm:$0xff] }
0x121f   : > { %2134 = vrot.lane.b32.xlu0 %v2036_v16, %s3561_s13 }
0x1287   : > { %v2008_v18 = vpop.permute.xlu0 %2007 }
0x1288   : > { %v2010_v23 = vadd.f32 %v2008_v18, %v2000_v6 }
0x128a   : > { %3361 = vtanh.f32 %v2010_v23  ;;  %v2019_v1 = vmul.f32 %v2010_v23, %v4281_v31 }
0x128f   : > { %v2145_v32 = vpop.permute.xlu1 %2144 }
0x1291   : > { %v2135_v28 = vpop.permute.xlu0 %2134 }
0x1292   : > { %v2137_v29 = vmul.f32 %v2135_v28, %v2130_v63 }
0x1294   : > { %v3362_v57 = vpop.eup %3361  ;;  %v4332_v9 = vadd.f32 %v2145_v32, %v2137_v29 }
0x1295   : > { %2013 = vrot.lane.b32.xlu0 %v3362_v57, %s3561_s13 }
0x1296   : > { %3363 = vtanh.f32 %v4332_v9 }
0x1297   : > { %3365 = vpow2.f32 %v1983_v21 }
0x12a0   : > { %v3364_v48 = vpop.eup %3363 }
0x12a1   : > { %2150 = vrot.lane.b32.xlu1 %v3364_v48, %s3561_s13  ;;  %v3366_v54 = vpop.eup %3365 }
0x12a2   : > { %v1986_v35 = vadd.f32 1.0, %v3366_v54 }
0x12a4   : > { %3367 = vrcp.f32 %v1986_v35 }
0x12a5   : > { %2156 = vperm.xlu1 %3215, %v2034_v34   ;;  %3369 = vpow2.f32 %v2120_v58 }
0x12ae   : > { %v3368_v39 = vpop.eup %3367 }
0x12af   : > { %v1990_v42 = vmul.f32 %v3368_v39, %v1986_v35  ;;  %v3370_v40 = vpop.eup %3369 }
0x12b0   : > { %v2123_v46 = vadd.f32 1.0, %v3370_v40 }
0x12b1   : > { %v1992_v55 = vsub.f32 2.0, %v1990_v42 }
0x12b2   : > { %3371 = vrcp.f32 %v2123_v46 }
0x12b3   : > { %v1994_v41 = vmul.f32 %v3368_v39, %v1992_v55 }
0x12bc   : > { %v3372_v56 = vpop.eup %3371 }
0x12bd   : > { %v2127_v63 = vmul.f32 %v3372_v56, %v2123_v46 }
0x12bf   : > { %v2129_v60 = vsub.f32 2.0, %v2127_v63 }
0x12c1   : > { %v2131_v16 = vmul.f32 %v3372_v56, %v2129_v60 }
0x1307   : > { %v2014_v51 = vpop.permute.xlu0 %2013 }
0x1308   : > { %v4339_v59 = vmul.f32 %v2014_v51, %v1994_v41 }
0x130a   : > { %v2017_v22 = vmul.f32 %v4339_v59, %v4281_v31  ;;  %v2743_v31 = vld [vmem:[%s3748_s11 + $0x70] sm:$0xff] }
0x130c   : > { %2018 = vst.msk [vmem:[#allocation2 + $0x8] sm:$0xff] %vm371_vm0, %v2017_v22 }
0x1313   : > { %v2167_v13 = vld [vmem:[#allocation2 + $0x8] sm:$0xff]  ;;  %v2151_v2 = vpop.permute.xlu1 %2150 }
0x1314   : > { %2170 = vrot.lane.b32.xlu0 %v2167_v13, %s3561_s13  ;;  %v4347_v17 = vmul.f32 %v2151_v2, %v2131_v16 }
0x1318   : > { %2021 = vrot.lane.b32.xlu0 %v2019_v1, %s3561_s13 }
0x1324   : > { %v4349_v6 = vpop.permute.xlu1 %2156 }
0x1325   : > { %v2159_v18 = vmul.f32 %v4349_v6, %v4347_v17 }
0x1327   : > { %2160 = vst.msk [vmem:[#allocation2] sm:$0xff] %vm371_vm0, %v2159_v18 }
0x132e   : > { %v2301_v28 = vld [vmem:[#allocation2] sm:$0xff] }
0x132f   : > { %2745 = vmatmul.mubr.msk.f32.vlgmr.msra.gmra.mrb[12].mxu0 %vm371_vm0, %v2301_v28 }
0x1330   : > { %3107 = vmatpush1.bf16.msra.mxu0 %v3869_v61  ;;  %2504 = vmatprep.mubr.f32.mxu0 %v3560_v8 }
0x1331   : > { %3109 = vmatprep.subr.bf16.mxu0 %v3871_v62 }
0x1334   : > { %3111 = vmatpush1.bf16.msra.mxu0 %v3876_v3 }
0x1335   : > { %3113 = vmatprep.subr.bf16.mxu0 %v3879_v4 }
0x1338   : > { %3115 = vmatpush1.bf16.msra.mxu0 %v3882_v10 }
0x1339   : > { %3117 = vmatprep.subr.bf16.mxu0 %v3885_v11 }
0x133c   : > { %3119 = vmatpush1.bf16.msra.mxu0 %v3888_v19 }
0x133d   : > { %3121 = vmatprep.subr.bf16.mxu0 %v3891_v20 }
0x1340   : > { %3123 = vmatpush1.bf16.msra.mxu0 %v3894_v27  ;;  %v2744_v27 = vld [vmem:[%s3748_s11 + $0x78] sm:$0xff]  ;;  %s4420_s11 = scalar_lea.vmem [#allocation10], %s2708_s0 }
0x1341   : > { %3125 = vmatprep.subr.bf16.mxu0 %v3897_v30  ;;  %s2580_s0 = sshll.u32 %s4420_s11, 4  ;;  %s4460_s0 = int_to_ptr.vmem [resolvable:$true] %s2580_s0 }
0x1342   : > { %s3465_s29 = scalar_lea.vmem %s4460_s0, 1024 }
0x1343   : > { %p3466_p6 = scmp.ne.s32.totalorder %s4460_s0, %s3465_s29 }
0x1344   : > { %3127 = vmatpush1.bf16.msra.mxu0 %v3900_v36 }
0x1345   : > { %3129 = vmatprep.subr.bf16.mxu0 %v3903_v38  ;;  %v2161_v38 = vmul.f32 %v4349_v6, %v4332_v9  ;;  %p3467_p10 = pnand %p3466_p6, %p4545_p7 }
0x1347   : > { %p3468_p12 = pneg %p3467_p10 }
0x1348   : > { %3131 = vmatpush1.bf16.msra.mxu0 %v3906_v43 }
0x1349   : > { %3133 = vmatprep.subr.bf16.mxu0 %v3909_v44 }
0x134c   : > { %3135 = vmatpush1.bf16.msra.mxu0 %v3914_v50 }
0x1386   : > { %v2171_v8 = vpop.permute.xlu0 %2170 }
0x1387   : > { %v2173_v61 = vsel %vm371_vm0, %v4347_v17, %v2171_v8 }
0x1388   : > { %2239 = vmatmul.mubr.f32.vlgmr.msra.gmra.mrb[14].mxu1 %v2173_v61 }
0x138a   : > { %v2022_v62 = vpop.permute.xlu0 %2021 }
0x138b   : > { %2024 = vst.msk [vmem:[#allocation3 + $0x8] sm:$0xff] %vm371_vm0, %v2022_v62 }
0x1392   : > { %v2168_v3 = vld [vmem:[#allocation3 + $0x8] sm:$0xff] }
0x1393   : > { %2263 = vrot.lane.b32.xlu0 %v2168_v3, %s3561_s13 }
0x1402   : > { %v2375_v4 = vpop.f32.mrb[12].mxu0 }
0x1403   : > { %v2377_v10 = vpop.f32.mrb[13].mxu0  ;;  %v2380_v23 = vadd.f32 %v2743_v31, %v2375_v4 }
0x1404   : > { %v2381_v30 = vadd.f32 %v2744_v27, %v2377_v10 }
0x1405   : > { %v2382_v32 = vsub.f32 0.0, %v2380_v23  ;;  %v2264_v13 = vpop.permute.xlu0 %2263 }
0x1406   : > { %v2383_v4 = vsub.f32 0.0, %v2381_v30 }
0x1407   : > { %v2384_v57 = vmul.f32 1.442695, %v2382_v32 }
0x1408   : > { %v2386_v10 = vmul.f32 1.442695, %v2383_v4 }
0x145b   : > { %v2240_v11 = vpop.f32.mrb[14].mxu1 }
0x145c   : > { %v2242_v19 = vpop.f32.mrb[15].mxu1  ;;  %v2241_v44 = vadd.f32 %v2240_v11, %v3979_v47 }
0x145d   : > { %v2243_v20 = vadd.f32 %v2242_v19, %v3964_v25 }
0x145e   : > { %v2245_v50 = vsub.f32 0.0, %v2241_v44 }
0x145f   : > { %3373 = vtanh.f32 %v2243_v20  ;;  %v2246_v62 = vsub.f32 0.0, %v2243_v20 }
0x1460   : > { %3375 = vtanh.f32 %v2381_v30  ;;  %v2247_v29 = vmul.f32 1.442695, %v2245_v50 }
0x1461   : > { %v2249_v3 = vmul.f32 1.442695, %v2246_v62 }
0x1462   : > { %3377 = vpow2.f32 %v2247_v29 }
0x1463   : > { %3379 = vpow2.f32 %v2384_v57 }
0x1469   : > { %v3374_v36 = vpop.eup %3373 }
0x146a   : > { %2268 = vrot.lane.b32.xlu1 %v3374_v36, %s3561_s13  ;;  %v3376_v43 = vpop.eup %3375 }
0x146c   : > { %v3378_v12 = vpop.eup %3377 }
0x146d   : > { %v2251_v48 = vadd.f32 1.0, %v3378_v12  ;;  %v3380_v34 = vpop.eup %3379 }
0x146e   : > { %2163 = vrot.lane.b32.xlu1 %v2161_v38, %s3561_s13  ;;  %v2388_v9 = vadd.f32 1.0, %v3380_v34 }
0x146f   : > { %3381 = vrcp.f32 %v2251_v48 }
0x1470   : > { %3383 = vrcp.f32 %v2388_v9 }
0x1472   : > { %2405 = vrot.lane.b32.xlu1 %v3376_v43, %s3561_s13 }
0x1479   : > { %v3382_v14 = vpop.eup %3381 }
0x147a   : > { %v2255_v21 = vmul.f32 %v3382_v14, %v2251_v48  ;;  %v3384_v35 = vpop.eup %3383 }
0x147b   : > { %v2392_v58 = vmul.f32 %v3384_v35, %v2388_v9 }
0x147c   : > { %v2257_v54 = vsub.f32 2.0, %v2255_v21 }
0x147d   : > { %v2394_v55 = vsub.f32 2.0, %v2392_v58 }
0x147e   : > { %v2259_v24 = vmul.f32 %v3382_v14, %v2257_v54  ;;  %v2742_v14 = vld [vmem:[%s3757_s10 + $0x38] sm:$0xff]  ;;  %s2748_s10 = sshll.u32 %s3543_s21, 7  ;;  %s3563_s21 = smov [#allocation10]  }
0x147f   : > { %v2396_v41 = vmul.f32 %v3384_v35, %v2394_v55  ;;  %v2300_v54 = vsub.f32 1.0, %v2742_v14  ;;  %s4465_s16 = scalar_lea.hbm %s4523_s5, %s2748_s10  ;;  %s3469_s6 = sshll.u32 %s3563_s21, 4  ;;  %s3470_s6 = int_to_ptr.vmem [resolvable:$false] %s3469_s6 }
0x1480   : > { %v2266_v56 = vmul.f32 %v2264_v13, %v2259_v24  ;;  %s3471_s14 = scalar_lea.vmem %s3470_s6, 2048  ;;  %p3472_p13 = scmp.lt.s32.totalorder %s4460_s0, %s3470_s6 }
0x1481   : > { %p3473_p1 = scmp.lt.s32.totalorder %s3471_s14, %s3465_s29 }
0x1483   : > { %p3474_p4 = por %p3473_p1, %p3472_p13 }
0x1485   : > { %p3475_p8 = pnand %p3474_p4, %p3468_p12 }
0x14dc   : > { %v2269_v39 = vpop.permute.xlu1 %2268 }
0x14dd   : > { %v2271_v42 = vmul.f32 %v2269_v39, %v2259_v24 }
0x14df   : > { %2273 = vrot.lane.b32.xlu0 %v2271_v42, %s3561_s13 }
0x14e0   : > { %v2164_v40 = vpop.permute.xlu1 %2163 }
0x14e1   : > { %2166 = vst.msk [vmem:[#allocation3] sm:$0xff] %vm371_vm0, %v2164_v40 }
0x14e4   : > { %v2406_v51 = vpop.permute.xlu1 %2405 }
0x14e5   : > { %v2408_v46 = vmul.f32 %v2406_v51, %v2396_v41 }
0x14e7   : > { %2410 = vrot.lane.b32.xlu1 %v2408_v46, %s3561_s13 }
0x14e8   : > { %v2302_v22 = vld [vmem:[#allocation3] sm:$0xff] }
0x14e9   : > { %2400 = vrot.lane.b32.xlu0 %v2302_v22, %s3561_s13 }
0x1551   : > { %v2274_v1 = vpop.permute.xlu0 %2273 }
0x1552   : > { %v2276_v63 = vadd.f32 %v2274_v1, %v2266_v56 }
0x1554   : > { %3385 = vtanh.f32 %v2276_v63  ;;  %v2285_v61 = vmul.f32 %v2276_v63, %v4349_v6 }
0x1559   : > { %v2411_v16 = vpop.permute.xlu1 %2410 }
0x155b   : > { %v2401_v60 = vpop.permute.xlu0 %2400 }
0x155c   : > { %v2403_v2 = vmul.f32 %v2401_v60, %v2396_v41 }
0x155e   : > { %v3386_v18 = vpop.eup %3385  ;;  %v2413_v28 = vadd.f32 %v2411_v16, %v2403_v2 }
0x155f   : > { %2279 = vrot.lane.b32.xlu0 %v3386_v18, %s3561_s13 }
0x1560   : > { %3387 = vtanh.f32 %v2413_v28 }
0x1561   : > { %3389 = vpow2.f32 %v2249_v3 }
0x1562   : > { %3391 = vpow2.f32 %v2386_v10 }
0x156a   : > { %v3388_v8 = vpop.eup %3387 }
0x156b   : > { %2416 = vrot.lane.b32.xlu1 %v3388_v8, %s3561_s13  ;;  %v3390_v11 = vpop.eup %3389 }
0x156c   : > { %v2252_v19 = vadd.f32 1.0, %v3390_v11  ;;  %v3392_v27 = vpop.eup %3391 }
0x156d   : > { %v2389_v36 = vadd.f32 1.0, %v3392_v27 }
0x156e   : > { %3393 = vrcp.f32 %v2252_v19 }
0x156f   : > { %2287 = vrot.lane.b32.xlu1 %v2285_v61, %s3561_s13  ;;  %3395 = vrcp.f32 %v2389_v36 }
0x1578   : > { %v3394_v38 = vpop.eup %3393 }
0x1579   : > { %v2256_v43 = vmul.f32 %v3394_v38, %v2252_v19  ;;  %v3396_v31 = vpop.eup %3395 }
0x157a   : > { %v2393_v32 = vmul.f32 %v3396_v31, %v2389_v36 }
0x157b   : > { %v2258_v44 = vsub.f32 2.0, %v2256_v43 }
0x157c   : > { %v2395_v30 = vsub.f32 2.0, %v2393_v32 }
0x157d   : > { %v2260_v50 = vmul.f32 %v3394_v38, %v2258_v44 }
0x157e   : > { %v2397_v57 = vmul.f32 %v3396_v31, %v2395_v30 }
0x15d1   : > { %v2280_v23 = vpop.permute.xlu0 %2279 }
0x15d2   : > { %v2282_v29 = vmul.f32 %v2280_v23, %v2260_v50 }
0x15d4   : > { %v2283_v20 = vmul.f32 %v2282_v29, %v4349_v6 }
0x15d6   : > { %2284 = vst.msk [vmem:[#allocation2 + $0x8] sm:$0xff] %vm371_vm0, %v2283_v20 }
0x15dd   : > { %v2417_v12 = vpop.permute.xlu1 %2416  ;;  %v2433_v48 = vld [vmem:[#allocation2 + $0x8] sm:$0xff] }
0x15de   : > { %v4394_v34 = vmul.f32 %v2417_v12, %v2397_v57  ;;  %2436 = vrot.lane.b32.xlu0 %v2433_v48, %s3561_s13 }
0x15e1   : > { %v2288_v9 = vpop.permute.xlu1 %2287 }
0x15e2   : > { %2290 = vst.msk [vmem:[#allocation3 + $0x8] sm:$0xff] %vm371_vm0, %v2288_v9 }
0x15e9   : > { %v2434_v21 = vld [vmem:[#allocation3 + $0x8] sm:$0xff] }
0x15ea   : > { %2529 = vrot.lane.b32.xlu1 %v2434_v21, %s3561_s13 }
0x15ee   : > { %2422 = vperm.xlu1 %3215, %v2300_v54  }
0x15f2   : > { %697 = vrot.lane.b32.xlu1 %v3995_v5, %s3561_s13 }
0x15f6   : > { %1228 = vrot.lane.b32.xlu1 %v4133_v0, %s3561_s13 }
0x15fa   : > { %1760 = vrot.lane.b32.xlu1 %v4271_v52, %s3561_s13 }
0x15fe   : > { %2292 = vrot.lane.b32.xlu1 %v2282_v29, %s3561_s13 }
0x1650   : > { %v2437_v6 = vpop.permute.xlu0 %2436 }
0x1651   : > { %v2439_v35 = vsel %vm371_vm0, %v4394_v34, %v2437_v6 }
0x1652   : > { %2505 = vmatmul.mubr.f32.vlgmr.msra.gmra.mrb[14].mxu0 %v2439_v35 }
0x165c   : > { %v2530_v24 = vpop.permute.xlu1 %2529 }
0x166d   : > { %v4409_v58 = vpop.permute.xlu1 %2422 }
0x166e   : > { %v2425_v39 = vmul.f32 %v4409_v58, %v4394_v34  ;;  %v2427_v5 = vmul.f32 %v4409_v58, %v2413_v28 }
0x1670   : > { %2426 = vst.msk [vmem:[#allocation2] sm:$0xff] %vm371_vm0, %v2425_v39  ;;  %2429 = vrot.lane.b32.xlu1 %v2427_v5, %s3561_s13 }
0x1671   : > { %v698_v0 = vpop.permute.xlu1 %697 }
0x1672   : > { %v700_v52 = vsel %vm371_vm0, %v3925_v7, %v698_v0 }
0x1673   : > { %701 = vst [vmem:[%s4420_s11] sm:$0xff] %v700_v52 }
0x1675   : > { %v1229_v42 = vpop.permute.xlu1 %1228 }
0x1676   : > { %v1231_v55 = vsel %vm371_vm0, %v4072_v53, %v1229_v42 }
0x1677   : > { %2721 = vst [vmem:[%s4420_s11 + $0x10] sm:$0xff] %v1231_v55 }
0x1679   : > { %v1761_v40 = vpop.permute.xlu1 %1760 }
0x167a   : > { %v1763_v41 = vsel %vm371_vm0, %v4210_v33, %v1761_v40 }
0x167b   : > { %2731 = vst [vmem:[%s4420_s11 + $0x20] sm:$0xff] %v1763_v41 }
0x167d   : > { %v2293_v51 = vpop.permute.xlu1 %2292 }
0x167e   : > { %v2295_v7 = vsel %vm371_vm0, %v4347_v17, %v2293_v51 }
0x167f   : > { %2741 = vst [vmem:[%s4420_s11 + $0x30] sm:$0xff] %v2295_v7 }
0x16e2   : > { %v2430_v46 = vpop.permute.xlu1 %2429 }
0x16e3   : > { %2432 = vst.msk [vmem:[#allocation3] sm:$0xff] %vm371_vm0, %v2430_v46 }
0x1725   : > { %v2506_v22 = vpop.f32.mrb[14].mxu0 }
0x1726   : > { %v2508_v13 = vpop.f32.mrb[15].mxu0  ;;  %v2507_v1 = vadd.f32 %v2506_v22, %v3979_v47 }
0x1727   : > { %v2509_v56 = vadd.f32 %v2508_v13, %v3964_v25 }
0x1728   : > { %v2511_v33 = vsub.f32 0.0, %v2507_v1 }
0x1729   : > { %3397 = vtanh.f32 %v2509_v56  ;;  %v2512_v47 = vsub.f32 0.0, %v2509_v56 }
0x172a   : > { %v2513_v63 = vmul.f32 1.442695, %v2511_v33 }
0x172b   : > { %v2515_v10 = vmul.f32 1.442695, %v2512_v47 }
0x172c   : > { %3399 = vpow2.f32 %v2513_v63 }
0x1733   : > { %v3398_v53 = vpop.eup %3397 }
0x1734   : > { %2534 = vrot.lane.b32.xlu0 %v3398_v53, %s3561_s13 }
0x1736   : > { %v3400_v60 = vpop.eup %3399 }
0x1737   : > { %v2517_v2 = vadd.f32 1.0, %v3400_v60 }
0x1739   : > { %3401 = vrcp.f32 %v2517_v2 }
0x1743   : > { %v3402_v17 = vpop.eup %3401 }
0x1744   : > { %v2521_v16 = vmul.f32 %v3402_v17, %v2517_v2 }
0x1746   : > { %v2523_v18 = vsub.f32 2.0, %v2521_v16 }
0x1748   : > { %v2525_v28 = vmul.f32 %v3402_v17, %v2523_v18 }
0x174a   : > { %v2532_v25 = vmul.f32 %v2530_v24, %v2525_v28 }
0x17a6   : > { %v2535_v8 = vpop.permute.xlu0 %2534 }
0x17a7   : > { %v2537_v61 = vmul.f32 %v2535_v8, %v2525_v28 }
0x17a9   : > { %2539 = vrot.lane.b32.xlu0 %v2537_v61, %s3561_s13 }
0x181b   : > { %v2540_v62 = vpop.permute.xlu0 %2539 }
0x181c   : > { %v2542_v3 = vadd.f32 %v2540_v62, %v2532_v25 }
0x181e   : > { %3403 = vtanh.f32 %v2542_v3  ;;  %v2551_v50 = vmul.f32 %v2542_v3, %v4409_v58 }
0x181f   : > { %3405 = vpow2.f32 %v2515_v10 }
0x1828   : > { %v3404_v4 = vpop.eup %3403 }
0x1829   : > { %2545 = vrot.lane.b32.xlu0 %v3404_v4, %s3561_s13  ;;  %v3406_v11 = vpop.eup %3405 }
0x182a   : > { %v2518_v19 = vadd.f32 1.0, %v3406_v11 }
0x182c   : > { %3407 = vrcp.f32 %v2518_v19 }
0x182d   : > { %962 = vrot.lane.b32.xlu0 %v4064_v37, %s3561_s13 }
0x1831   : > { %1494 = vrot.lane.b32.xlu0 %v4202_v45, %s3561_s13 }
0x1835   : > { %2026 = vrot.lane.b32.xlu0 %v4339_v59, %s3561_s13 }
0x1836   : > { %v3408_v27 = vpop.eup %3407 }
0x1837   : > { %v2522_v36 = vmul.f32 %v3408_v27, %v2518_v19 }
0x1839   : > { %v2524_v38 = vsub.f32 2.0, %v2522_v36 }
0x183b   : > { %v2526_v43 = vmul.f32 %v3408_v27, %v2524_v38 }
0x189b   : > { %v2546_v37 = vpop.permute.xlu0 %2545 }
0x189c   : > { %v2548_v44 = vmul.f32 %v2546_v37, %v2526_v43 }
0x189e   : > { %v2549_v45 = vmul.f32 %v2548_v44, %v4409_v58  ;;  %2558 = vrot.lane.b32.xlu0 %v2548_v44, %s3561_s13 }
0x189f   : > { %v963_v59 = vpop.permute.xlu0 %962 }
0x18a0   : > { %2550 = vst.msk [vmem:[#allocation2 + $0x8] sm:$0xff] %vm371_vm0, %v2549_v45  ;;  %v965_v31 = vsel %vm371_vm0, %v4003_v26, %v963_v59 }
0x18a1   : > { %2716 = vst [vmem:[%s4420_s11 + $0x8] sm:$0xff] %v965_v31 }
0x18a2   : > { %2553 = vrot.lane.b32.xlu0 %v2551_v50, %s3561_s13 }
0x18a3   : > { %v1495_v23 = vpop.permute.xlu0 %1494 }
0x18a4   : > { %v1497_v29 = vsel %vm371_vm0, %v4141_v15, %v1495_v23 }
0x18a5   : > { %2726 = vst [vmem:[%s4420_s11 + $0x18] sm:$0xff] %v1497_v29 }
0x18a7   : > { %v2027_v20 = vpop.permute.xlu0 %2026 }
0x18a8   : > { %v2029_v32 = vsel %vm371_vm0, %v4279_v49, %v2027_v20 }
0x18a9   : > { %2736 = vst [vmem:[%s4420_s11 + $0x28] sm:$0xff] %v2029_v32 }
0x1910   : > { %v2559_v26 = vpop.permute.xlu0 %2558 }
0x1911   : > { %v2561_v15 = vsel %vm371_vm0, %v4394_v34, %v2559_v26 }
0x1912   : > { %2746 = vst [vmem:[%s4420_s11 + $0x38] sm:$0xff] %v2561_v15 }
0x1913   : > { %3478 = shalt.err (!%p3475_p8)
}
0x1914   : > { %s3479_s15 = scalar_lea.hbm %s4465_s16, 1024  ;;  %s3483_s13 = scalar_lea.hbm %s4523_s5, 2048 }
0x1915   : > { %p3480_p11 = scmp.ne.s32.totalorder %s4465_s16, %s3479_s15  ;;  %p3484_p9 = scmp.lt.u32.totalorder %s4465_s16, %s4523_s5 }
0x1916   : > { %p3485_p2 = scmp.lt.u32.totalorder %s3483_s13, %s3479_s15  ;;  %p3487_p10 = scmp.lt.u32.totalorder %s3479_s15, %s4465_s16 }
0x1917   : > { %p3481_p0 = pnand %p3480_p11, %p4545_p7 }
0x1918   : > { %p3486_p6 = por %p3485_p2, %p3484_p9 }
0x1919   : > { %p3482_p5 = pneg %p3481_p0 }
0x191a   : > { %p3488_p12 = por %p3487_p10, %p3486_p6 }
0x191c   : > { %p3489_p13 = pnand %p3488_p12, %p3482_p5 }
0x191e   : > { %3492 = shalt.err (!%p3489_p13)
}
0x191f   : > { %s3564_s11 = smov 128   ;;  %s3565_s10 = smov 256   ;;  %v2554_v49 = vpop.permute.xlu0 %2553 }
0x1920   : > { %s3566_s12 = smov 8   ;;  %2556 = vst.msk [vmem:[#allocation3 + $0x8] sm:$0xff] %vm371_vm0, %v2554_v49 }
0x1921   : > { %3142 = dma.vmem_to_hbm [thread:$0]  (%p4545_p7), %s4460_s0, 1024, %s4465_s16, %s2565_s30, %s3564_s11, %s3565_s10, %s3566_s12  }
0x1922 PF: > { %s2595_s17 = sand.u32 1, %s3531_s18   ;;  %p4546_p1 = scmp.ne.s32.totalorder %s4536_s9, 0 }
0x1923   : > { %s2596_s29 = scalar_lea.sflag [#allocation6], %s2595_s17 }
0x1924   : > { %p3149_p4 = pnand %p2700_p3, %p4546_p1 }
0x1926   : > { %3526 = dma.done.wait (!%p3149_p4), %s2596_s29, 1024  }
0x1927   : > { %3528 = vsyncadd (!%p3149_p4), %s2596_s29, 4294966272  ;;  %s22_s23 = sadd.s32 1, %s3551_s23   ;;  %s4547_s18 = smov %s3535_s19 }
0x1928   : > { %p19_p8 = scmp.ge.s32.totalorder %s22_s23, 4   ;;  %s4548_s19 = smov %s3539_s20 }
0x1929   : > { %s4549_s20 = smov %s3659_s8  ;;  %s4550_s21 = smov %s3547_s22 }
0x192a   : > { %s4551_s22 = smov %s4553_s26  ;;  %21 = sbr.rel (!%p19_p8) target bundleno = 10 (0xa), region = 162 }
0x1931   :  { %2601 = vsyncpa [#allocation5], 1 }
0x1932   :  { %2603 = vsyncpa [#allocation5 + $0x1], 1 }
0x1933   :  { %2604 = vsyncpa [#allocation9], 1 }
0x1934   :  { %2605 = vsyncpa [#allocation6], 1 }
0x1935   :  { %2607 = vsyncpa [#allocation6 + $0x1], 1 }

</bundles_post_ra>
